<compile_context>
chip_gen: v7x
topology: tpu7x:2x2x1
jax: 0.10.0
libtpu: 0.0.40
codegen_flags: <defaults>
</compile_context>

<pallas_src>
import functools

import jax
import jax.numpy as jnp
from jax.experimental import pallas as pl
from jax.experimental.pallas import tpu as pltpu


def _sigmoid(x):
    # exp + divide: EUP-friendly, guaranteed Mosaic lowering.
    return 1.0 / (1.0 + jnp.exp(-x))


# ----------------------------------------------------------------------------
# Fused kernel: 2-layer BiLSTM -> flatten -> relu(fc1) -> relu(fc2)
# ----------------------------------------------------------------------------
def _rnn_fused_kernel(x_ref, *refs, seq_len, hidden, num_layers):
    H = hidden
    S = seq_len
    B = x_ref.shape[0]

    # refs layout: [per layer, per direction: (w_ih, w_hh, b)] + fc1_w, fc1_b,
    #              fc2_w, fc2_b, then the output ref.
    n_lstm = num_layers * 2 * 3
    lstm_refs = refs[:n_lstm]
    fc1_w_ref, fc1_b_ref, fc2_w_ref, fc2_b_ref, o_ref = refs[n_lstm:]

    x = x_ref[...].astype(jnp.float32)                      # (B, S, IN)

    def lstm_cell(gx, h_prev, c_prev, w_hh):
        # gx already contains x_t @ W_ih^T + (b_ih + b_hh)
        g = gx + jnp.dot(h_prev, w_hh, preferred_element_type=jnp.float32)  # (B, 4H)
        i_g = _sigmoid(g[:, 0 * H:1 * H])
        f_g = _sigmoid(g[:, 1 * H:2 * H])
        c_hat = jnp.tanh(g[:, 2 * H:3 * H])
        o_g = _sigmoid(g[:, 3 * H:4 * H])
        c = f_g * c_prev + i_g * c_hat
        h = o_g * jnp.tanh(c)
        return h, c

    def gates_x(chunks, w_ih, b):
        # Input at one timestep is represented as a tuple of lane-chunks whose
        # concatenation is the true input; split W_ih rows to match so that no
        # in-kernel concatenate is ever needed.
        acc = b                                              # (1, 4H), broadcasts
        off = 0
        for ch in chunks:
            width = ch.shape[1]
            acc = acc + jnp.dot(ch, w_ih[off:off + width, :],
                                preferred_element_type=jnp.float32)
            off += width
        return acc                                           # (B, 4H)

    # Per-timestep layer input (layer 0: a single chunk of width IN).
    chunks_t = [(x[:, t, :],) for t in range(S)]

    for l in range(num_layers):
        base = l * 6
        w_ih_f = lstm_refs[base + 0][...]
        w_hh_f = lstm_refs[base + 1][...]
        b_f = lstm_refs[base + 2][...]
        w_ih_r = lstm_refs[base + 3][...]
        w_hh_r = lstm_refs[base + 4][...]
        b_r = lstm_refs[base + 5][...]

        zeros = jnp.zeros((B, H), jnp.float32)
        h_f, c_f = zeros, zeros
        h_r, c_r = zeros, zeros
        outs_f = [None] * S
        outs_r = [None] * S
        # Statically unrolled time loops (S small & known at trace time).
        for t in range(S):
            h_f, c_f = lstm_cell(gates_x(chunks_t[t], w_ih_f, b_f),
                                 h_f, c_f, w_hh_f)
            outs_f[t] = h_f
            tr = S - 1 - t
            h_r, c_r = lstm_cell(gates_x(chunks_t[tr], w_ih_r, b_r),
                                 h_r, c_r, w_hh_r)
            outs_r[tr] = h_r
        # TODO(synk): inter-layer LSTM dropout (args.lstm_dropout) is training-only;
        # eval-mode (identity) semantics implemented.
        chunks_t = [(outs_f[t], outs_r[t]) for t in range(S)]

    # --- head: flatten (B,S,2H)->(B,S*2H) folded into fc1 via row-slices ---
    H2 = 2 * H
    acc = fc1_b_ref[...]                                     # (1, FC_HIDDEN)
    for t in range(S):
        h_fwd, h_rev = chunks_t[t]
        acc = acc + jnp.dot(h_fwd, fc1_w_ref[t * H2: t * H2 + H, :],
                            preferred_element_type=jnp.float32)
        acc = acc + jnp.dot(h_rev, fc1_w_ref[t * H2 + H: (t + 1) * H2, :],
                            preferred_element_type=jnp.float32)
    h1 = jnp.maximum(acc, 0.0)                               # relu(fc1)
    out = jnp.dot(h1, fc2_w_ref[...], preferred_element_type=jnp.float32)
    out = jnp.maximum(out + fc2_b_ref[...], 0.0)             # relu(fc2)
    o_ref[...] = out.astype(o_ref.dtype)


# ----------------------------------------------------------------------------
# Wrapper
# ----------------------------------------------------------------------------
def rnn_forward(params, x, *, hidden_size, num_layers):
    """x: (B, S, input_size) f32 -> (B, output_size) f32."""
    B, S, _ = x.shape

    flat = [x]
    for l in range(num_layers):
        for d in range(2):
            p = params["layers"][l][d]
            flat += [p["w_ih"], p["w_hh"], p["b"]]
    flat += [params["fc1_w"], params["fc1_b"], params["fc2_w"], params["fc2_b"]]

    out_size = params["fc2_w"].shape[1]

    def full_spec(a):
        nd = a.ndim
        return pl.BlockSpec(a.shape, lambda i, _nd=nd: (0,) * _nd)

    kernel = functools.partial(_rnn_fused_kernel, seq_len=S,
                               hidden=hidden_size, num_layers=num_layers)

    return pl.pallas_call(
        kernel,
        out_shape=jax.ShapeDtypeStruct((B, out_size), jnp.float32),
        grid=(1,),
        in_specs=[full_spec(a) for a in flat],
        out_specs=pl.BlockSpec((B, out_size), lambda i: (0, 0)),
        compiler_params=pltpu.CompilerParams(
            dimension_semantics=("arbitrary",)),
    )(*flat)


# ----------------------------------------------------------------------------
# Parameters (weights stored transposed, i.e. PyTorch W^T; b = b_ih + b_hh)
# ----------------------------------------------------------------------------
def init_params(key, *, input_size, hidden_size, num_layers, lstm_output_size,
                output_size):
    H = hidden_size

    def w(k, shape, scale):
        return scale * jax.random.normal(k, shape, jnp.float32)

    params = {"layers": []}
    for l in range(num_layers):
        in_dim = input_size if l == 0 else 2 * H
        dirs = []
        for d in range(2):
            k = jax.random.fold_in(key, l * 2 + d)
            k1, k2, k3 = jax.random.split(k, 3)
            dirs.append({
                "w_ih": w(k1, (in_dim, 4 * H), 0.1),   # (in, 4H) == weight_ih^T
                "w_hh": w(k2, (H, 4 * H), 0.1),        # (H, 4H)  == weight_hh^T
                "b": w(k3, (1, 4 * H), 0.1),           # b_ih + b_hh combined
            })
        params["layers"].append(dirs)

    fc_hidden = lstm_output_size // 2
    kf = jax.random.fold_in(key, 1000)
    kf1, kf2, kb1, kb2 = jax.random.split(kf, 4)
    params["fc1_w"] = w(kf1, (lstm_output_size, fc_hidden), 0.05)
    params["fc1_b"] = w(kb1, (1, fc_hidden), 0.05)
    params["fc2_w"] = w(kf2, (fc_hidden, output_size), 0.05)
    params["fc2_b"] = w(kb2, (1, output_size), 0.05)
    return params


# ----------------------------------------------------------------------------
# Pure-JAX reference (same math, XLA ops) for a sanity check
# ----------------------------------------------------------------------------
def _reference_forward(params, x, *, hidden_size, num_layers):
    B, S, _ = x.shape
    H = hidden_size

    def cell(x_t, h, c, p):
        g = x_t @ p["w_ih"] + h @ p["w_hh"] + p["b"][0]
        i_g = jax.nn.sigmoid(g[:, :H])
        f_g = jax.nn.sigmoid(g[:, H:2 * H])
        c_hat = jnp.tanh(g[:, 2 * H:3 * H])
        o_g = jax.nn.sigmoid(g[:, 3 * H:])
        c = f_g * c + i_g * c_hat
        h = o_g * jnp.tanh(c)
        return h, c

    inp = x
    for l in range(num_layers):
        pf, pr = params["layers"][l]
        h = jnp.zeros((B, H)); c = jnp.zeros((B, H)); outs_f = []
        for t in range(S):
            h, c = cell(inp[:, t], h, c, pf)
            outs_f.append(h)
        h = jnp.zeros((B, H)); c = jnp.zeros((B, H)); outs_r = [None] * S
        for t in range(S - 1, -1, -1):
            h, c = cell(inp[:, t], h, c, pr)
            outs_r[t] = h
        inp = jnp.stack(
            [jnp.concatenate([outs_f[t], outs_r[t]], axis=-1) for t in range(S)],
            axis=1)
    flat = inp.reshape(B, -1)
    h1 = jax.nn.relu(flat @ params["fc1_w"] + params["fc1_b"][0])
    return jax.nn.relu(h1 @ params["fc2_w"] + params["fc2_b"][0])


# ----------------------------------------------------------------------------
if __name__ == "__main__":
    # Shapes implied by the module: x = (rnn_batch_size, timepoints, input_size),
    # lstm_output_size = 2 * hidden * timepoints, fc: L -> L/2, fc2: L/2 -> out.
    B, S = 2, 8               # rnn_batch_size, timepoints
    INPUT_SIZE = 32
    HIDDEN = 32
    NUM_LAYERS = 2
    OUTPUT_SIZE = 8
    LSTM_OUT = 2 * HIDDEN * S  # 512  -> fc: 512 -> 256 -> 8

    key = jax.random.PRNGKey(0)
    kp, kx = jax.random.split(key)
    params = init_params(kp, input_size=INPUT_SIZE, hidden_size=HIDDEN,
                         num_layers=NUM_LAYERS, lstm_output_size=LSTM_OUT,
                         output_size=OUTPUT_SIZE)
    x = jax.random.normal(kx, (B, S, INPUT_SIZE), jnp.float32)

    out = rnn_forward(params, x, hidden_size=HIDDEN, num_layers=NUM_LAYERS)
    out = jax.block_until_ready(out)
    assert out.shape == (B, OUTPUT_SIZE) and out.dtype == jnp.float32

    ref = _reference_forward(params, x, hidden_size=HIDDEN,
                             num_layers=NUM_LAYERS)
    ref = jax.block_until_ready(ref)
    # Loose tolerance: MXU matmul input rounding may differ from XLA default.
    assert jnp.allclose(out, ref, atol=1e-2, rtol=1e-2), float(
        jnp.max(jnp.abs(out - ref)))

    print("KERNEL_OK")
</pallas_src>

<mosaic_0001>
module attributes {stable_mosaic.version = 11 : i64} {
  func.func @_rnn_fused_kernel(%arg0: i32, %arg1: memref<2x8x32xf32, #tpu.memory_space<vmem>>, %arg2: memref<32x128xf32, #tpu.memory_space<vmem>>, %arg3: memref<32x128xf32, #tpu.memory_space<vmem>>, %arg4: memref<1x128xf32, #tpu.memory_space<vmem>>, %arg5: memref<32x128xf32, #tpu.memory_space<vmem>>, %arg6: memref<32x128xf32, #tpu.memory_space<vmem>>, %arg7: memref<1x128xf32, #tpu.memory_space<vmem>>, %arg8: memref<64x128xf32, #tpu.memory_space<vmem>>, %arg9: memref<32x128xf32, #tpu.memory_space<vmem>>, %arg10: memref<1x128xf32, #tpu.memory_space<vmem>>, %arg11: memref<64x128xf32, #tpu.memory_space<vmem>>, %arg12: memref<32x128xf32, #tpu.memory_space<vmem>>, %arg13: memref<1x128xf32, #tpu.memory_space<vmem>>, %arg14: memref<512x256xf32, #tpu.memory_space<vmem>>, %arg15: memref<1x256xf32, #tpu.memory_space<vmem>>, %arg16: memref<256x8xf32, #tpu.memory_space<vmem>>, %arg17: memref<1x8xf32, #tpu.memory_space<vmem>>, %arg18: memref<2x8xf32, #tpu.memory_space<vmem>>) attributes {dimension_semantics = [#tpu.dimension_semantics<arbitrary>], iteration_bounds = array<i64: 1>, scalar_prefetch = 0 : i64, scratch_operands = 0 : i64, tpu.core_type = #tpu.core_type<tc>, window_params = [{pipeline_mode = #tpu.pipeline_mode<synchronous>, transform_indices = @transform_0, window_bounds = array<i64: 2, 8, 32>}, {pipeline_mode = #tpu.pipeline_mode<synchronous>, transform_indices = @transform_1, window_bounds = array<i64: 32, 128>}, {pipeline_mode = #tpu.pipeline_mode<synchronous>, transform_indices = @transform_2, window_bounds = array<i64: 32, 128>}, {pipeline_mode = #tpu.pipeline_mode<synchronous>, transform_indices = @transform_3, window_bounds = array<i64: 1, 128>}, {pipeline_mode = #tpu.pipeline_mode<synchronous>, transform_indices = @transform_4, window_bounds = array<i64: 32, 128>}, {pipeline_mode = #tpu.pipeline_mode<synchronous>, transform_indices = @transform_5, window_bounds = array<i64: 32, 128>}, {pipeline_mode = #tpu.pipeline_mode<synchronous>, transform_indices = @transform_6, window_bounds = array<i64: 1, 128>}, {pipeline_mode = #tpu.pipeline_mode<synchronous>, transform_indices = @transform_7, window_bounds = array<i64: 64, 128>}, {pipeline_mode = #tpu.pipeline_mode<synchronous>, transform_indices = @transform_8, window_bounds = array<i64: 32, 128>}, {pipeline_mode = #tpu.pipeline_mode<synchronous>, transform_indices = @transform_9, window_bounds = array<i64: 1, 128>}, {pipeline_mode = #tpu.pipeline_mode<synchronous>, transform_indices = @transform_10, window_bounds = array<i64: 64, 128>}, {pipeline_mode = #tpu.pipeline_mode<synchronous>, transform_indices = @transform_11, window_bounds = array<i64: 32, 128>}, {pipeline_mode = #tpu.pipeline_mode<synchronous>, transform_indices = @transform_12, window_bounds = array<i64: 1, 128>}, {pipeline_mode = #tpu.pipeline_mode<synchronous>, transform_indices = @transform_13, window_bounds = array<i64: 512, 256>}, {pipeline_mode = #tpu.pipeline_mode<synchronous>, transform_indices = @transform_14, window_bounds = array<i64: 1, 256>}, {pipeline_mode = #tpu.pipeline_mode<synchronous>, transform_indices = @transform_15, window_bounds = array<i64: 256, 8>}, {pipeline_mode = #tpu.pipeline_mode<synchronous>, transform_indices = @transform_16, window_bounds = array<i64: 1, 8>}, {pipeline_mode = #tpu.pipeline_mode<synchronous>, transform_indices = @transform_17, window_bounds = array<i64: 2, 8>}]} {
    %c0 = arith.constant 0 : index
    %c0_0 = arith.constant 0 : index
    %c0_1 = arith.constant 0 : index
    %0 = vector.load %arg1[%c0, %c0_0, %c0_1] : memref<2x8x32xf32, #tpu.memory_space<vmem>>, vector<2x8x32xf32>
    %1 = vector.extract_strided_slice %0 {offsets = [0, 0, 0], sizes = [2, 1, 32], strides = [1, 1, 1]} : vector<2x8x32xf32> to vector<2x1x32xf32>
    %2 = vector.shape_cast %1 : vector<2x1x32xf32> to vector<2x32xf32>
    %3 = vector.extract_strided_slice %0 {offsets = [0, 1, 0], sizes = [2, 1, 32], strides = [1, 1, 1]} : vector<2x8x32xf32> to vector<2x1x32xf32>
    %4 = vector.shape_cast %3 : vector<2x1x32xf32> to vector<2x32xf32>
    %5 = vector.extract_strided_slice %0 {offsets = [0, 2, 0], sizes = [2, 1, 32], strides = [1, 1, 1]} : vector<2x8x32xf32> to vector<2x1x32xf32>
    %6 = vector.shape_cast %5 : vector<2x1x32xf32> to vector<2x32xf32>
    %7 = vector.extract_strided_slice %0 {offsets = [0, 3, 0], sizes = [2, 1, 32], strides = [1, 1, 1]} : vector<2x8x32xf32> to vector<2x1x32xf32>
    %8 = vector.shape_cast %7 : vector<2x1x32xf32> to vector<2x32xf32>
    %9 = vector.extract_strided_slice %0 {offsets = [0, 4, 0], sizes = [2, 1, 32], strides = [1, 1, 1]} : vector<2x8x32xf32> to vector<2x1x32xf32>
    %10 = vector.shape_cast %9 : vector<2x1x32xf32> to vector<2x32xf32>
    %11 = vector.extract_strided_slice %0 {offsets = [0, 5, 0], sizes = [2, 1, 32], strides = [1, 1, 1]} : vector<2x8x32xf32> to vector<2x1x32xf32>
    %12 = vector.shape_cast %11 : vector<2x1x32xf32> to vector<2x32xf32>
    %13 = vector.extract_strided_slice %0 {offsets = [0, 6, 0], sizes = [2, 1, 32], strides = [1, 1, 1]} : vector<2x8x32xf32> to vector<2x1x32xf32>
    %14 = vector.shape_cast %13 : vector<2x1x32xf32> to vector<2x32xf32>
    %15 = vector.extract_strided_slice %0 {offsets = [0, 7, 0], sizes = [2, 1, 32], strides = [1, 1, 1]} : vector<2x8x32xf32> to vector<2x1x32xf32>
    %16 = vector.shape_cast %15 : vector<2x1x32xf32> to vector<2x32xf32>
    %c0_2 = arith.constant 0 : index
    %c0_3 = arith.constant 0 : index
    %17 = vector.load %arg2[%c0_2, %c0_3] : memref<32x128xf32, #tpu.memory_space<vmem>>, vector<32x128xf32>
    %c0_4 = arith.constant 0 : index
    %c0_5 = arith.constant 0 : index
    %18 = vector.load %arg3[%c0_4, %c0_5] : memref<32x128xf32, #tpu.memory_space<vmem>>, vector<32x128xf32>
    %c0_6 = arith.constant 0 : index
    %c0_7 = arith.constant 0 : index
    %19 = vector.load %arg4[%c0_6, %c0_7] : memref<1x128xf32, #tpu.memory_space<vmem>>, vector<1x128xf32>
    %c0_8 = arith.constant 0 : index
    %c0_9 = arith.constant 0 : index
    %20 = vector.load %arg5[%c0_8, %c0_9] : memref<32x128xf32, #tpu.memory_space<vmem>>, vector<32x128xf32>
    %c0_10 = arith.constant 0 : index
    %c0_11 = arith.constant 0 : index
    %21 = vector.load %arg6[%c0_10, %c0_11] : memref<32x128xf32, #tpu.memory_space<vmem>>, vector<32x128xf32>
    %c0_12 = arith.constant 0 : index
    %c0_13 = arith.constant 0 : index
    %22 = vector.load %arg7[%c0_12, %c0_13] : memref<1x128xf32, #tpu.memory_space<vmem>>, vector<1x128xf32>
    %cst = arith.constant 0.000000e+00 : f32
    %23 = vector.broadcast %cst : f32 to vector<2x32xf32>
    %cst_14 = arith.constant dense<0.000000e+00> : vector<2x128xf32>
    %24 = tpu.matmul %2, %17, %cst_14 {dimension_numbers = #tpu.dot_dimension_numbers<[1], [0], [0], [1], [0, 0, 1, 1], [], []>} : vector<2x32xf32>, vector<32x128xf32>, vector<2x128xf32> -> vector<2x128xf32>
    %25 = vector.broadcast %19 : vector<1x128xf32> to vector<2x128xf32>
    %26 = arith.addf %25, %24 : vector<2x128xf32>
    %cst_15 = arith.constant dense<0.000000e+00> : vector<2x128xf32>
    %27 = tpu.matmul %23, %18, %cst_15 {dimension_numbers = #tpu.dot_dimension_numbers<[1], [0], [0], [1], [0, 0, 1, 1], [], []>} : vector<2x32xf32>, vector<32x128xf32>, vector<2x128xf32> -> vector<2x128xf32>
    %28 = arith.addf %26, %27 : vector<2x128xf32>
    %29 = vector.extract_strided_slice %28 {offsets = [0, 0], sizes = [2, 32], strides = [1, 1]} : vector<2x128xf32> to vector<2x32xf32>
    %cst_16 = arith.constant 0.000000e+00 : f32
    %30 = vector.broadcast %cst_16 : f32 to vector<2x32xf32>
    %31 = arith.subf %30, %29 : vector<2x32xf32>
    %32 = math.exp %31 : vector<2x32xf32>
    %cst_17 = arith.constant 1.000000e+00 : f32
    %33 = vector.broadcast %cst_17 : f32 to vector<2x32xf32>
    %34 = arith.addf %33, %32 : vector<2x32xf32>
    %cst_18 = arith.constant 1.000000e+00 : f32
    %35 = vector.broadcast %cst_18 : f32 to vector<2x32xf32>
    %36 = arith.divf %35, %34 : vector<2x32xf32>
    %37 = vector.extract_strided_slice %28 {offsets = [0, 32], sizes = [2, 32], strides = [1, 1]} : vector<2x128xf32> to vector<2x32xf32>
    %cst_19 = arith.constant 0.000000e+00 : f32
    %38 = vector.broadcast %cst_19 : f32 to vector<2x32xf32>
    %39 = arith.subf %38, %37 : vector<2x32xf32>
    %40 = math.exp %39 : vector<2x32xf32>
    %cst_20 = arith.constant 1.000000e+00 : f32
    %41 = vector.broadcast %cst_20 : f32 to vector<2x32xf32>
    %42 = arith.addf %41, %40 : vector<2x32xf32>
    %cst_21 = arith.constant 1.000000e+00 : f32
    %43 = vector.broadcast %cst_21 : f32 to vector<2x32xf32>
    %44 = arith.divf %43, %42 : vector<2x32xf32>
    %45 = vector.extract_strided_slice %28 {offsets = [0, 64], sizes = [2, 32], strides = [1, 1]} : vector<2x128xf32> to vector<2x32xf32>
    %46 = math.tanh %45 : vector<2x32xf32>
    %47 = vector.extract_strided_slice %28 {offsets = [0, 96], sizes = [2, 32], strides = [1, 1]} : vector<2x128xf32> to vector<2x32xf32>
    %cst_22 = arith.constant 0.000000e+00 : f32
    %48 = vector.broadcast %cst_22 : f32 to vector<2x32xf32>
    %49 = arith.subf %48, %47 : vector<2x32xf32>
    %50 = math.exp %49 : vector<2x32xf32>
    %cst_23 = arith.constant 1.000000e+00 : f32
    %51 = vector.broadcast %cst_23 : f32 to vector<2x32xf32>
    %52 = arith.addf %51, %50 : vector<2x32xf32>
    %cst_24 = arith.constant 1.000000e+00 : f32
    %53 = vector.broadcast %cst_24 : f32 to vector<2x32xf32>
    %54 = arith.divf %53, %52 : vector<2x32xf32>
    %55 = arith.mulf %44, %23 : vector<2x32xf32>
    %56 = arith.mulf %36, %46 : vector<2x32xf32>
    %57 = arith.addf %55, %56 : vector<2x32xf32>
    %58 = math.tanh %57 : vector<2x32xf32>
    %59 = arith.mulf %54, %58 : vector<2x32xf32>
    %cst_25 = arith.constant dense<0.000000e+00> : vector<2x128xf32>
    %60 = tpu.matmul %16, %20, %cst_25 {dimension_numbers = #tpu.dot_dimension_numbers<[1], [0], [0], [1], [0, 0, 1, 1], [], []>} : vector<2x32xf32>, vector<32x128xf32>, vector<2x128xf32> -> vector<2x128xf32>
    %61 = vector.broadcast %22 : vector<1x128xf32> to vector<2x128xf32>
    %62 = arith.addf %61, %60 : vector<2x128xf32>
    %cst_26 = arith.constant dense<0.000000e+00> : vector<2x128xf32>
    %63 = tpu.matmul %23, %21, %cst_26 {dimension_numbers = #tpu.dot_dimension_numbers<[1], [0], [0], [1], [0, 0, 1, 1], [], []>} : vector<2x32xf32>, vector<32x128xf32>, vector<2x128xf32> -> vector<2x128xf32>
    %64 = arith.addf %62, %63 : vector<2x128xf32>
    %65 = vector.extract_strided_slice %64 {offsets = [0, 0], sizes = [2, 32], strides = [1, 1]} : vector<2x128xf32> to vector<2x32xf32>
    %cst_27 = arith.constant 0.000000e+00 : f32
    %66 = vector.broadcast %cst_27 : f32 to vector<2x32xf32>
    %67 = arith.subf %66, %65 : vector<2x32xf32>
    %68 = math.exp %67 : vector<2x32xf32>
    %cst_28 = arith.constant 1.000000e+00 : f32
    %69 = vector.broadcast %cst_28 : f32 to vector<2x32xf32>
    %70 = arith.addf %69, %68 : vector<2x32xf32>
    %cst_29 = arith.constant 1.000000e+00 : f32
    %71 = vector.broadcast %cst_29 : f32 to vector<2x32xf32>
    %72 = arith.divf %71, %70 : vector<2x32xf32>
    %73 = vector.extract_strided_slice %64 {offsets = [0, 32], sizes = [2, 32], strides = [1, 1]} : vector<2x128xf32> to vector<2x32xf32>
    %cst_30 = arith.constant 0.000000e+00 : f32
    %74 = vector.broadcast %cst_30 : f32 to vector<2x32xf32>
    %75 = arith.subf %74, %73 : vector<2x32xf32>
    %76 = math.exp %75 : vector<2x32xf32>
    %cst_31 = arith.constant 1.000000e+00 : f32
    %77 = vector.broadcast %cst_31 : f32 to vector<2x32xf32>
    %78 = arith.addf %77, %76 : vector<2x32xf32>
    %cst_32 = arith.constant 1.000000e+00 : f32
    %79 = vector.broadcast %cst_32 : f32 to vector<2x32xf32>
    %80 = arith.divf %79, %78 : vector<2x32xf32>
    %81 = vector.extract_strided_slice %64 {offsets = [0, 64], sizes = [2, 32], strides = [1, 1]} : vector<2x128xf32> to vector<2x32xf32>
    %82 = math.tanh %81 : vector<2x32xf32>
    %83 = vector.extract_strided_slice %64 {offsets = [0, 96], sizes = [2, 32], strides = [1, 1]} : vector<2x128xf32> to vector<2x32xf32>
    %cst_33 = arith.constant 0.000000e+00 : f32
    %84 = vector.broadcast %cst_33 : f32 to vector<2x32xf32>
    %85 = arith.subf %84, %83 : vector<2x32xf32>
    %86 = math.exp %85 : vector<2x32xf32>
    %cst_34 = arith.constant 1.000000e+00 : f32
    %87 = vector.broadcast %cst_34 : f32 to vector<2x32xf32>
    %88 = arith.addf %87, %86 : vector<2x32xf32>
    %cst_35 = arith.constant 1.000000e+00 : f32
    %89 = vector.broadcast %cst_35 : f32 to vector<2x32xf32>
    %90 = arith.divf %89, %88 : vector<2x32xf32>
    %91 = arith.mulf %80, %23 : vector<2x32xf32>
    %92 = arith.mulf %72, %82 : vector<2x32xf32>
    %93 = arith.addf %91, %92 : vector<2x32xf32>
    %94 = math.tanh %93 : vector<2x32xf32>
    %95 = arith.mulf %90, %94 : vector<2x32xf32>
    %cst_36 = arith.constant dense<0.000000e+00> : vector<2x128xf32>
    %96 = tpu.matmul %4, %17, %cst_36 {dimension_numbers = #tpu.dot_dimension_numbers<[1], [0], [0], [1], [0, 0, 1, 1], [], []>} : vector<2x32xf32>, vector<32x128xf32>, vector<2x128xf32> -> vector<2x128xf32>
    %97 = vector.broadcast %19 : vector<1x128xf32> to vector<2x128xf32>
    %98 = arith.addf %97, %96 : vector<2x128xf32>
    %cst_37 = arith.constant dense<0.000000e+00> : vector<2x128xf32>
    %99 = tpu.matmul %59, %18, %cst_37 {dimension_numbers = #tpu.dot_dimension_numbers<[1], [0], [0], [1], [0, 0, 1, 1], [], []>} : vector<2x32xf32>, vector<32x128xf32>, vector<2x128xf32> -> vector<2x128xf32>
    %100 = arith.addf %98, %99 : vector<2x128xf32>
    %101 = vector.extract_strided_slice %100 {offsets = [0, 0], sizes = [2, 32], strides = [1, 1]} : vector<2x128xf32> to vector<2x32xf32>
    %cst_38 = arith.constant 0.000000e+00 : f32
    %102 = vector.broadcast %cst_38 : f32 to vector<2x32xf32>
    %103 = arith.subf %102, %101 : vector<2x32xf32>
    %104 = math.exp %103 : vector<2x32xf32>
    %cst_39 = arith.constant 1.000000e+00 : f32
    %105 = vector.broadcast %cst_39 : f32 to vector<2x32xf32>
    %106 = arith.addf %105, %104 : vector<2x32xf32>
    %cst_40 = arith.constant 1.000000e+00 : f32
    %107 = vector.broadcast %cst_40 : f32 to vector<2x32xf32>
    %108 = arith.divf %107, %106 : vector<2x32xf32>
    %109 = vector.extract_strided_slice %100 {offsets = [0, 32], sizes = [2, 32], strides = [1, 1]} : vector<2x128xf32> to vector<2x32xf32>
    %cst_41 = arith.constant 0.000000e+00 : f32
    %110 = vector.broadcast %cst_41 : f32 to vector<2x32xf32>
    %111 = arith.subf %110, %109 : vector<2x32xf32>
    %112 = math.exp %111 : vector<2x32xf32>
    %cst_42 = arith.constant 1.000000e+00 : f32
    %113 = vector.broadcast %cst_42 : f32 to vector<2x32xf32>
    %114 = arith.addf %113, %112 : vector<2x32xf32>
    %cst_43 = arith.constant 1.000000e+00 : f32
    %115 = vector.broadcast %cst_43 : f32 to vector<2x32xf32>
    %116 = arith.divf %115, %114 : vector<2x32xf32>
    %117 = vector.extract_strided_slice %100 {offsets = [0, 64], sizes = [2, 32], strides = [1, 1]} : vector<2x128xf32> to vector<2x32xf32>
    %118 = math.tanh %117 : vector<2x32xf32>
    %119 = vector.extract_strided_slice %100 {offsets = [0, 96], sizes = [2, 32], strides = [1, 1]} : vector<2x128xf32> to vector<2x32xf32>
    %cst_44 = arith.constant 0.000000e+00 : f32
    %120 = vector.broadcast %cst_44 : f32 to vector<2x32xf32>
    %121 = arith.subf %120, %119 : vector<2x32xf32>
    %122 = math.exp %121 : vector<2x32xf32>
    %cst_45 = arith.constant 1.000000e+00 : f32
    %123 = vector.broadcast %cst_45 : f32 to vector<2x32xf32>
    %124 = arith.addf %123, %122 : vector<2x32xf32>
    %cst_46 = arith.constant 1.000000e+00 : f32
    %125 = vector.broadcast %cst_46 : f32 to vector<2x32xf32>
    %126 = arith.divf %125, %124 : vector<2x32xf32>
    %127 = arith.mulf %116, %57 : vector<2x32xf32>
    %128 = arith.mulf %108, %118 : vector<2x32xf32>
    %129 = arith.addf %127, %128 : vector<2x32xf32>
    %130 = math.tanh %129 : vector<2x32xf32>
    %131 = arith.mulf %126, %130 : vector<2x32xf32>
    %cst_47 = arith.constant dense<0.000000e+00> : vector<2x128xf32>
    %132 = tpu.matmul %14, %20, %cst_47 {dimension_numbers = #tpu.dot_dimension_numbers<[1], [0], [0], [1], [0, 0, 1, 1], [], []>} : vector<2x32xf32>, vector<32x128xf32>, vector<2x128xf32> -> vector<2x128xf32>
    %133 = vector.broadcast %22 : vector<1x128xf32> to vector<2x128xf32>
    %134 = arith.addf %133, %132 : vector<2x128xf32>
    %cst_48 = arith.constant dense<0.000000e+00> : vector<2x128xf32>
    %135 = tpu.matmul %95, %21, %cst_48 {dimension_numbers = #tpu.dot_dimension_numbers<[1], [0], [0], [1], [0, 0, 1, 1], [], []>} : vector<2x32xf32>, vector<32x128xf32>, vector<2x128xf32> -> vector<2x128xf32>
    %136 = arith.addf %134, %135 : vector<2x128xf32>
    %137 = vector.extract_strided_slice %136 {offsets = [0, 0], sizes = [2, 32], strides = [1, 1]} : vector<2x128xf32> to vector<2x32xf32>
    %cst_49 = arith.constant 0.000000e+00 : f32
    %138 = vector.broadcast %cst_49 : f32 to vector<2x32xf32>
    %139 = arith.subf %138, %137 : vector<2x32xf32>
    %140 = math.exp %139 : vector<2x32xf32>
    %cst_50 = arith.constant 1.000000e+00 : f32
    %141 = vector.broadcast %cst_50 : f32 to vector<2x32xf32>
    %142 = arith.addf %141, %140 : vector<2x32xf32>
    %cst_51 = arith.constant 1.000000e+00 : f32
    %143 = vector.broadcast %cst_51 : f32 to vector<2x32xf32>
    %144 = arith.divf %143, %142 : vector<2x32xf32>
    %145 = vector.extract_strided_slice %136 {offsets = [0, 32], sizes = [2, 32], strides = [1, 1]} : vector<2x128xf32> to vector<2x32xf32>
    %cst_52 = arith.constant 0.000000e+00 : f32
    %146 = vector.broadcast %cst_52 : f32 to vector<2x32xf32>
    %147 = arith.subf %146, %145 : vector<2x32xf32>
    %148 = math.exp %147 : vector<2x32xf32>
    %cst_53 = arith.constant 1.000000e+00 : f32
    %149 = vector.broadcast %cst_53 : f32 to vector<2x32xf32>
    %150 = arith.addf %149, %148 : vector<2x32xf32>
    %cst_54 = arith.constant 1.000000e+00 : f32
    %151 = vector.broadcast %cst_54 : f32 to vector<2x32xf32>
    %152 = arith.divf %151, %150 : vector<2x32xf32>
    %153 = vector.extract_strided_slice %136 {offsets = [0, 64], sizes = [2, 32], strides = [1, 1]} : vector<2x128xf32> to vector<2x32xf32>
    %154 = math.tanh %153 : vector<2x32xf32>
    %155 = vector.extract_strided_slice %136 {offsets = [0, 96], sizes = [2, 32], strides = [1, 1]} : vector<2x128xf32> to vector<2x32xf32>
    %cst_55 = arith.constant 0.000000e+00 : f32
    %156 = vector.broadcast %cst_55 : f32 to vector<2x32xf32>
    %157 = arith.subf %156, %155 : vector<2x32xf32>
    %158 = math.exp %157 : vector<2x32xf32>
    %cst_56 = arith.constant 1.000000e+00 : f32
    %159 = vector.broadcast %cst_56 : f32 to vector<2x32xf32>
    %160 = arith.addf %159, %158 : vector<2x32xf32>
    %cst_57 = arith.constant 1.000000e+00 : f32
    %161 = vector.broadcast %cst_57 : f32 to vector<2x32xf32>
    %162 = arith.divf %161, %160 : vector<2x32xf32>
    %163 = arith.mulf %152, %93 : vector<2x32xf32>
    %164 = arith.mulf %144, %154 : vector<2x32xf32>
    %165 = arith.addf %163, %164 : vector<2x32xf32>
    %166 = math.tanh %165 : vector<2x32xf32>
    %167 = arith.mulf %162, %166 : vector<2x32xf32>
    %cst_58 = arith.constant dense<0.000000e+00> : vector<2x128xf32>
    %168 = tpu.matmul %6, %17, %cst_58 {dimension_numbers = #tpu.dot_dimension_numbers<[1], [0], [0], [1], [0, 0, 1, 1], [], []>} : vector<2x32xf32>, vector<32x128xf32>, vector<2x128xf32> -> vector<2x128xf32>
    %169 = vector.broadcast %19 : vector<1x128xf32> to vector<2x128xf32>
    %170 = arith.addf %169, %168 : vector<2x128xf32>
    %cst_59 = arith.constant dense<0.000000e+00> : vector<2x128xf32>
    %171 = tpu.matmul %131, %18, %cst_59 {dimension_numbers = #tpu.dot_dimension_numbers<[1], [0], [0], [1], [0, 0, 1, 1], [], []>} : vector<2x32xf32>, vector<32x128xf32>, vector<2x128xf32> -> vector<2x128xf32>
    %172 = arith.addf %170, %171 : vector<2x128xf32>
    %173 = vector.extract_strided_slice %172 {offsets = [0, 0], sizes = [2, 32], strides = [1, 1]} : vector<2x128xf32> to vector<2x32xf32>
    %cst_60 = arith.constant 0.000000e+00 : f32
    %174 = vector.broadcast %cst_60 : f32 to vector<2x32xf32>
    %175 = arith.subf %174, %173 : vector<2x32xf32>
    %176 = math.exp %175 : vector<2x32xf32>
    %cst_61 = arith.constant 1.000000e+00 : f32
    %177 = vector.broadcast %cst_61 : f32 to vector<2x32xf32>
    %178 = arith.addf %177, %176 : vector<2x32xf32>
    %cst_62 = arith.constant 1.000000e+00 : f32
    %179 = vector.broadcast %cst_62 : f32 to vector<2x32xf32>
    %180 = arith.divf %179, %178 : vector<2x32xf32>
    %181 = vector.extract_strided_slice %172 {offsets = [0, 32], sizes = [2, 32], strides = [1, 1]} : vector<2x128xf32> to vector<2x32xf32>
    %cst_63 = arith.constant 0.000000e+00 : f32
    %182 = vector.broadcast %cst_63 : f32 to vector<2x32xf32>
    %183 = arith.subf %182, %181 : vector<2x32xf32>
    %184 = math.exp %183 : vector<2x32xf32>
    %cst_64 = arith.constant 1.000000e+00 : f32
    %185 = vector.broadcast %cst_64 : f32 to vector<2x32xf32>
    %186 = arith.addf %185, %184 : vector<2x32xf32>
    %cst_65 = arith.constant 1.000000e+00 : f32
    %187 = vector.broadcast %cst_65 : f32 to vector<2x32xf32>
    %188 = arith.divf %187, %186 : vector<2x32xf32>
    %189 = vector.extract_strided_slice %172 {offsets = [0, 64], sizes = [2, 32], strides = [1, 1]} : vector<2x128xf32> to vector<2x32xf32>
    %190 = math.tanh %189 : vector<2x32xf32>
    %191 = vector.extract_strided_slice %172 {offsets = [0, 96], sizes = [2, 32], strides = [1, 1]} : vector<2x128xf32> to vector<2x32xf32>
    %cst_66 = arith.constant 0.000000e+00 : f32
    %192 = vector.broadcast %cst_66 : f32 to vector<2x32xf32>
    %193 = arith.subf %192, %191 : vector<2x32xf32>
    %194 = math.exp %193 : vector<2x32xf32>
    %cst_67 = arith.constant 1.000000e+00 : f32
    %195 = vector.broadcast %cst_67 : f32 to vector<2x32xf32>
    %196 = arith.addf %195, %194 : vector<2x32xf32>
    %cst_68 = arith.constant 1.000000e+00 : f32
    %197 = vector.broadcast %cst_68 : f32 to vector<2x32xf32>
    %198 = arith.divf %197, %196 : vector<2x32xf32>
    %199 = arith.mulf %188, %129 : vector<2x32xf32>
    %200 = arith.mulf %180, %190 : vector<2x32xf32>
    %201 = arith.addf %199, %200 : vector<2x32xf32>
    %202 = math.tanh %201 : vector<2x32xf32>
    %203 = arith.mulf %198, %202 : vector<2x32xf32>
    %cst_69 = arith.constant dense<0.000000e+00> : vector<2x128xf32>
    %204 = tpu.matmul %12, %20, %cst_69 {dimension_numbers = #tpu.dot_dimension_numbers<[1], [0], [0], [1], [0, 0, 1, 1], [], []>} : vector<2x32xf32>, vector<32x128xf32>, vector<2x128xf32> -> vector<2x128xf32>
    %205 = vector.broadcast %22 : vector<1x128xf32> to vector<2x128xf32>
    %206 = arith.addf %205, %204 : vector<2x128xf32>
    %cst_70 = arith.constant dense<0.000000e+00> : vector<2x128xf32>
    %207 = tpu.matmul %167, %21, %cst_70 {dimension_numbers = #tpu.dot_dimension_numbers<[1], [0], [0], [1], [0, 0, 1, 1], [], []>} : vector<2x32xf32>, vector<32x128xf32>, vector<2x128xf32> -> vector<2x128xf32>
    %208 = arith.addf %206, %207 : vector<2x128xf32>
    %209 = vector.extract_strided_slice %208 {offsets = [0, 0], sizes = [2, 32], strides = [1, 1]} : vector<2x128xf32> to vector<2x32xf32>
    %cst_71 = arith.constant 0.000000e+00 : f32
    %210 = vector.broadcast %cst_71 : f32 to vector<2x32xf32>
    %211 = arith.subf %210, %209 : vector<2x32xf32>
    %212 = math.exp %211 : vector<2x32xf32>
    %cst_72 = arith.constant 1.000000e+00 : f32
    %213 = vector.broadcast %cst_72 : f32 to vector<2x32xf32>
    %214 = arith.addf %213, %212 : vector<2x32xf32>
    %cst_73 = arith.constant 1.000000e+00 : f32
    %215 = vector.broadcast %cst_73 : f32 to vector<2x32xf32>
    %216 = arith.divf %215, %214 : vector<2x32xf32>
    %217 = vector.extract_strided_slice %208 {offsets = [0, 32], sizes = [2, 32], strides = [1, 1]} : vector<2x128xf32> to vector<2x32xf32>
    %cst_74 = arith.constant 0.000000e+00 : f32
    %218 = vector.broadcast %cst_74 : f32 to vector<2x32xf32>
    %219 = arith.subf %218, %217 : vector<2x32xf32>
    %220 = math.exp %219 : vector<2x32xf32>
    %cst_75 = arith.constant 1.000000e+00 : f32
    %221 = vector.broadcast %cst_75 : f32 to vector<2x32xf32>
    %222 = arith.addf %221, %220 : vector<2x32xf32>
    %cst_76 = arith.constant 1.000000e+00 : f32
    %223 = vector.broadcast %cst_76 : f32 to vector<2x32xf32>
    %224 = arith.divf %223, %222 : vector<2x32xf32>
    %225 = vector.extract_strided_slice %208 {offsets = [0, 64], sizes = [2, 32], strides = [1, 1]} : vector<2x128xf32> to vector<2x32xf32>
    %226 = math.tanh %225 : vector<2x32xf32>
    %227 = vector.extract_strided_slice %208 {offsets = [0, 96], sizes = [2, 32], strides = [1, 1]} : vector<2x128xf32> to vector<2x32xf32>
    %cst_77 = arith.constant 0.000000e+00 : f32
    %228 = vector.broadcast %cst_77 : f32 to vector<2x32xf32>
    %229 = arith.subf %228, %227 : vector<2x32xf32>
    %230 = math.exp %229 : vector<2x32xf32>
    %cst_78 = arith.constant 1.000000e+00 : f32
    %231 = vector.broadcast %cst_78 : f32 to vector<2x32xf32>
    %232 = arith.addf %231, %230 : vector<2x32xf32>
    %cst_79 = arith.constant 1.000000e+00 : f32
    %233 = vector.broadcast %cst_79 : f32 to vector<2x32xf32>
    %234 = arith.divf %233, %232 : vector<2x32xf32>
    %235 = arith.mulf %224, %165 : vector<2x32xf32>
    %236 = arith.mulf %216, %226 : vector<2x32xf32>
    %237 = arith.addf %235, %236 : vector<2x32xf32>
    %238 = math.tanh %237 : vector<2x32xf32>
    %239 = arith.mulf %234, %238 : vector<2x32xf32>
    %cst_80 = arith.constant dense<0.000000e+00> : vector<2x128xf32>
    %240 = tpu.matmul %8, %17, %cst_80 {dimension_numbers = #tpu.dot_dimension_numbers<[1], [0], [0], [1], [0, 0, 1, 1], [], []>} : vector<2x32xf32>, vector<32x128xf32>, vector<2x128xf32> -> vector<2x128xf32>
    %241 = vector.broadcast %19 : vector<1x128xf32> to vector<2x128xf32>
    %242 = arith.addf %241, %240 : vector<2x128xf32>
    %cst_81 = arith.constant dense<0.000000e+00> : vector<2x128xf32>
    %243 = tpu.matmul %203, %18, %cst_81 {dimension_numbers = #tpu.dot_dimension_numbers<[1], [0], [0], [1], [0, 0, 1, 1], [], []>} : vector<2x32xf32>, vector<32x128xf32>, vector<2x128xf32> -> vector<2x128xf32>
    %244 = arith.addf %242, %243 : vector<2x128xf32>
    %245 = vector.extract_strided_slice %244 {offsets = [0, 0], sizes = [2, 32], strides = [1, 1]} : vector<2x128xf32> to vector<2x32xf32>
    %cst_82 = arith.constant 0.000000e+00 : f32
    %246 = vector.broadcast %cst_82 : f32 to vector<2x32xf32>
    %247 = arith.subf %246, %245 : vector<2x32xf32>
    %248 = math.exp %247 : vector<2x32xf32>
    %cst_83 = arith.constant 1.000000e+00 : f32
    %249 = vector.broadcast %cst_83 : f32 to vector<2x32xf32>
    %250 = arith.addf %249, %248 : vector<2x32xf32>
    %cst_84 = arith.constant 1.000000e+00 : f32
    %251 = vector.broadcast %cst_84 : f32 to vector<2x32xf32>
    %252 = arith.divf %251, %250 : vector<2x32xf32>
    %253 = vector.extract_strided_slice %244 {offsets = [0, 32], sizes = [2, 32], strides = [1, 1]} : vector<2x128xf32> to vector<2x32xf32>
    %cst_85 = arith.constant 0.000000e+00 : f32
    %254 = vector.broadcast %cst_85 : f32 to vector<2x32xf32>
    %255 = arith.subf %254, %253 : vector<2x32xf32>
    %256 = math.exp %255 : vector<2x32xf32>
    %cst_86 = arith.constant 1.000000e+00 : f32
    %257 = vector.broadcast %cst_86 : f32 to vector<2x32xf32>
    %258 = arith.addf %257, %256 : vector<2x32xf32>
    %cst_87 = arith.constant 1.000000e+00 : f32
    %259 = vector.broadcast %cst_87 : f32 to vector<2x32xf32>
    %260 = arith.divf %259, %258 : vector<2x32xf32>
    %261 = vector.extract_strided_slice %244 {offsets = [0, 64], sizes = [2, 32], strides = [1, 1]} : vector<2x128xf32> to vector<2x32xf32>
    %262 = math.tanh %261 : vector<2x32xf32>
    %263 = vector.extract_strided_slice %244 {offsets = [0, 96], sizes = [2, 32], strides = [1, 1]} : vector<2x128xf32> to vector<2x32xf32>
    %cst_88 = arith.constant 0.000000e+00 : f32
    %264 = vector.broadcast %cst_88 : f32 to vector<2x32xf32>
    %265 = arith.subf %264, %263 : vector<2x32xf32>
    %266 = math.exp %265 : vector<2x32xf32>
    %cst_89 = arith.constant 1.000000e+00 : f32
    %267 = vector.broadcast %cst_89 : f32 to vector<2x32xf32>
    %268 = arith.addf %267, %266 : vector<2x32xf32>
    %cst_90 = arith.constant 1.000000e+00 : f32
    %269 = vector.broadcast %cst_90 : f32 to vector<2x32xf32>
    %270 = arith.divf %269, %268 : vector<2x32xf32>
    %271 = arith.mulf %260, %201 : vector<2x32xf32>
    %272 = arith.mulf %252, %262 : vector<2x32xf32>
    %273 = arith.addf %271, %272 : vector<2x32xf32>
    %274 = math.tanh %273 : vector<2x32xf32>
    %275 = arith.mulf %270, %274 : vector<2x32xf32>
    %cst_91 = arith.constant dense<0.000000e+00> : vector<2x128xf32>
    %276 = tpu.matmul %10, %20, %cst_91 {dimension_numbers = #tpu.dot_dimension_numbers<[1], [0], [0], [1], [0, 0, 1, 1], [], []>} : vector<2x32xf32>, vector<32x128xf32>, vector<2x128xf32> -> vector<2x128xf32>
    %277 = vector.broadcast %22 : vector<1x128xf32> to vector<2x128xf32>
    %278 = arith.addf %277, %276 : vector<2x128xf32>
    %cst_92 = arith.constant dense<0.000000e+00> : vector<2x128xf32>
    %279 = tpu.matmul %239, %21, %cst_92 {dimension_numbers = #tpu.dot_dimension_numbers<[1], [0], [0], [1], [0, 0, 1, 1], [], []>} : vector<2x32xf32>, vector<32x128xf32>, vector<2x128xf32> -> vector<2x128xf32>
    %280 = arith.addf %278, %279 : vector<2x128xf32>
    %281 = vector.extract_strided_slice %280 {offsets = [0, 0], sizes = [2, 32], strides = [1, 1]} : vector<2x128xf32> to vector<2x32xf32>
    %cst_93 = arith.constant 0.000000e+00 : f32
    %282 = vector.broadcast %cst_93 : f32 to vector<2x32xf32>
    %283 = arith.subf %282, %281 : vector<2x32xf32>
    %284 = math.exp %283 : vector<2x32xf32>
    %cst_94 = arith.constant 1.000000e+00 : f32
    %285 = vector.broadcast %cst_94 : f32 to vector<2x32xf32>
    %286 = arith.addf %285, %284 : vector<2x32xf32>
    %cst_95 = arith.constant 1.000000e+00 : f32
    %287 = vector.broadcast %cst_95 : f32 to vector<2x32xf32>
    %288 = arith.divf %287, %286 : vector<2x32xf32>
    %289 = vector.extract_strided_slice %280 {offsets = [0, 32], sizes = [2, 32], strides = [1, 1]} : vector<2x128xf32> to vector<2x32xf32>
    %cst_96 = arith.constant 0.000000e+00 : f32
    %290 = vector.broadcast %cst_96 : f32 to vector<2x32xf32>
    %291 = arith.subf %290, %289 : vector<2x32xf32>
    %292 = math.exp %291 : vector<2x32xf32>
    %cst_97 = arith.constant 1.000000e+00 : f32
    %293 = vector.broadcast %cst_97 : f32 to vector<2x32xf32>
    %294 = arith.addf %293, %292 : vector<2x32xf32>
    %cst_98 = arith.constant 1.000000e+00 : f32
    %295 = vector.broadcast %cst_98 : f32 to vector<2x32xf32>
    %296 = arith.divf %295, %294 : vector<2x32xf32>
    %297 = vector.extract_strided_slice %280 {offsets = [0, 64], sizes = [2, 32], strides = [1, 1]} : vector<2x128xf32> to vector<2x32xf32>
    %298 = math.tanh %297 : vector<2x32xf32>
    %299 = vector.extract_strided_slice %280 {offsets = [0, 96], sizes = [2, 32], strides = [1, 1]} : vector<2x128xf32> to vector<2x32xf32>
    %cst_99 = arith.constant 0.000000e+00 : f32
    %300 = vector.broadcast %cst_99 : f32 to vector<2x32xf32>
    %301 = arith.subf %300, %299 : vector<2x32xf32>
    %302 = math.exp %301 : vector<2x32xf32>
    %cst_100 = arith.constant 1.000000e+00 : f32
    %303 = vector.broadcast %cst_100 : f32 to vector<2x32xf32>
    %304 = arith.addf %303, %302 : vector<2x32xf32>
    %cst_101 = arith.constant 1.000000e+00 : f32
    %305 = vector.broadcast %cst_101 : f32 to vector<2x32xf32>
    %306 = arith.divf %305, %304 : vector<2x32xf32>
    %307 = arith.mulf %296, %237 : vector<2x32xf32>
    %308 = arith.mulf %288, %298 : vector<2x32xf32>
    %309 = arith.addf %307, %308 : vector<2x32xf32>
    %310 = math.tanh %309 : vector<2x32xf32>
    %311 = arith.mulf %306, %310 : vector<2x32xf32>
    %cst_102 = arith.constant dense<0.000000e+00> : vector<2x128xf32>
    %312 = tpu.matmul %10, %17, %cst_102 {dimension_numbers = #tpu.dot_dimension_numbers<[1], [0], [0], [1], [0, 0, 1, 1], [], []>} : vector<2x32xf32>, vector<32x128xf32>, vector<2x128xf32> -> vector<2x128xf32>
    %313 = vector.broadcast %19 : vector<1x128xf32> to vector<2x128xf32>
    %314 = arith.addf %313, %312 : vector<2x128xf32>
    %cst_103 = arith.constant dense<0.000000e+00> : vector<2x128xf32>
    %315 = tpu.matmul %275, %18, %cst_103 {dimension_numbers = #tpu.dot_dimension_numbers<[1], [0], [0], [1], [0, 0, 1, 1], [], []>} : vector<2x32xf32>, vector<32x128xf32>, vector<2x128xf32> -> vector<2x128xf32>
    %316 = arith.addf %314, %315 : vector<2x128xf32>
    %317 = vector.extract_strided_slice %316 {offsets = [0, 0], sizes = [2, 32], strides = [1, 1]} : vector<2x128xf32> to vector<2x32xf32>
    %cst_104 = arith.constant 0.000000e+00 : f32
    %318 = vector.broadcast %cst_104 : f32 to vector<2x32xf32>
    %319 = arith.subf %318, %317 : vector<2x32xf32>
    %320 = math.exp %319 : vector<2x32xf32>
    %cst_105 = arith.constant 1.000000e+00 : f32
    %321 = vector.broadcast %cst_105 : f32 to vector<2x32xf32>
    %322 = arith.addf %321, %320 : vector<2x32xf32>
    %cst_106 = arith.constant 1.000000e+00 : f32
    %323 = vector.broadcast %cst_106 : f32 to vector<2x32xf32>
    %324 = arith.divf %323, %322 : vector<2x32xf32>
    %325 = vector.extract_strided_slice %316 {offsets = [0, 32], sizes = [2, 32], strides = [1, 1]} : vector<2x128xf32> to vector<2x32xf32>
    %cst_107 = arith.constant 0.000000e+00 : f32
    %326 = vector.broadcast %cst_107 : f32 to vector<2x32xf32>
    %327 = arith.subf %326, %325 : vector<2x32xf32>
    %328 = math.exp %327 : vector<2x32xf32>
    %cst_108 = arith.constant 1.000000e+00 : f32
    %329 = vector.broadcast %cst_108 : f32 to vector<2x32xf32>
    %330 = arith.addf %329, %328 : vector<2x32xf32>
    %cst_109 = arith.constant 1.000000e+00 : f32
    %331 = vector.broadcast %cst_109 : f32 to vector<2x32xf32>
    %332 = arith.divf %331, %330 : vector<2x32xf32>
    %333 = vector.extract_strided_slice %316 {offsets = [0, 64], sizes = [2, 32], strides = [1, 1]} : vector<2x128xf32> to vector<2x32xf32>
    %334 = math.tanh %333 : vector<2x32xf32>
    %335 = vector.extract_strided_slice %316 {offsets = [0, 96], sizes = [2, 32], strides = [1, 1]} : vector<2x128xf32> to vector<2x32xf32>
    %cst_110 = arith.constant 0.000000e+00 : f32
    %336 = vector.broadcast %cst_110 : f32 to vector<2x32xf32>
    %337 = arith.subf %336, %335 : vector<2x32xf32>
    %338 = math.exp %337 : vector<2x32xf32>
    %cst_111 = arith.constant 1.000000e+00 : f32
    %339 = vector.broadcast %cst_111 : f32 to vector<2x32xf32>
    %340 = arith.addf %339, %338 : vector<2x32xf32>
    %cst_112 = arith.constant 1.000000e+00 : f32
    %341 = vector.broadcast %cst_112 : f32 to vector<2x32xf32>
    %342 = arith.divf %341, %340 : vector<2x32xf32>
    %343 = arith.mulf %332, %273 : vector<2x32xf32>
    %344 = arith.mulf %324, %334 : vector<2x32xf32>
    %345 = arith.addf %343, %344 : vector<2x32xf32>
    %346 = math.tanh %345 : vector<2x32xf32>
    %347 = arith.mulf %342, %346 : vector<2x32xf32>
    %cst_113 = arith.constant dense<0.000000e+00> : vector<2x128xf32>
    %348 = tpu.matmul %8, %20, %cst_113 {dimension_numbers = #tpu.dot_dimension_numbers<[1], [0], [0], [1], [0, 0, 1, 1], [], []>} : vector<2x32xf32>, vector<32x128xf32>, vector<2x128xf32> -> vector<2x128xf32>
    %349 = vector.broadcast %22 : vector<1x128xf32> to vector<2x128xf32>
    %350 = arith.addf %349, %348 : vector<2x128xf32>
    %cst_114 = arith.constant dense<0.000000e+00> : vector<2x128xf32>
    %351 = tpu.matmul %311, %21, %cst_114 {dimension_numbers = #tpu.dot_dimension_numbers<[1], [0], [0], [1], [0, 0, 1, 1], [], []>} : vector<2x32xf32>, vector<32x128xf32>, vector<2x128xf32> -> vector<2x128xf32>
    %352 = arith.addf %350, %351 : vector<2x128xf32>
    %353 = vector.extract_strided_slice %352 {offsets = [0, 0], sizes = [2, 32], strides = [1, 1]} : vector<2x128xf32> to vector<2x32xf32>
    %cst_115 = arith.constant 0.000000e+00 : f32
    %354 = vector.broadcast %cst_115 : f32 to vector<2x32xf32>
    %355 = arith.subf %354, %353 : vector<2x32xf32>
    %356 = math.exp %355 : vector<2x32xf32>
    %cst_116 = arith.constant 1.000000e+00 : f32
    %357 = vector.broadcast %cst_116 : f32 to vector<2x32xf32>
    %358 = arith.addf %357, %356 : vector<2x32xf32>
    %cst_117 = arith.constant 1.000000e+00 : f32
    %359 = vector.broadcast %cst_117 : f32 to vector<2x32xf32>
    %360 = arith.divf %359, %358 : vector<2x32xf32>
    %361 = vector.extract_strided_slice %352 {offsets = [0, 32], sizes = [2, 32], strides = [1, 1]} : vector<2x128xf32> to vector<2x32xf32>
    %cst_118 = arith.constant 0.000000e+00 : f32
    %362 = vector.broadcast %cst_118 : f32 to vector<2x32xf32>
    %363 = arith.subf %362, %361 : vector<2x32xf32>
    %364 = math.exp %363 : vector<2x32xf32>
    %cst_119 = arith.constant 1.000000e+00 : f32
    %365 = vector.broadcast %cst_119 : f32 to vector<2x32xf32>
    %366 = arith.addf %365, %364 : vector<2x32xf32>
    %cst_120 = arith.constant 1.000000e+00 : f32
    %367 = vector.broadcast %cst_120 : f32 to vector<2x32xf32>
    %368 = arith.divf %367, %366 : vector<2x32xf32>
    %369 = vector.extract_strided_slice %352 {offsets = [0, 64], sizes = [2, 32], strides = [1, 1]} : vector<2x128xf32> to vector<2x32xf32>
    %370 = math.tanh %369 : vector<2x32xf32>
    %371 = vector.extract_strided_slice %352 {offsets = [0, 96], sizes = [2, 32], strides = [1, 1]} : vector<2x128xf32> to vector<2x32xf32>
    %cst_121 = arith.constant 0.000000e+00 : f32
    %372 = vector.broadcast %cst_121 : f32 to vector<2x32xf32>
    %373 = arith.subf %372, %371 : vector<2x32xf32>
    %374 = math.exp %373 : vector<2x32xf32>
    %cst_122 = arith.constant 1.000000e+00 : f32
    %375 = vector.broadcast %cst_122 : f32 to vector<2x32xf32>
    %376 = arith.addf %375, %374 : vector<2x32xf32>
    %cst_123 = arith.constant 1.000000e+00 : f32
    %377 = vector.broadcast %cst_123 : f32 to vector<2x32xf32>
    %378 = arith.divf %377, %376 : vector<2x32xf32>
    %379 = arith.mulf %368, %309 : vector<2x32xf32>
    %380 = arith.mulf %360, %370 : vector<2x32xf32>
    %381 = arith.addf %379, %380 : vector<2x32xf32>
    %382 = math.tanh %381 : vector<2x32xf32>
    %383 = arith.mulf %378, %382 : vector<2x32xf32>
    %cst_124 = arith.constant dense<0.000000e+00> : vector<2x128xf32>
    %384 = tpu.matmul %12, %17, %cst_124 {dimension_numbers = #tpu.dot_dimension_numbers<[1], [0], [0], [1], [0, 0, 1, 1], [], []>} : vector<2x32xf32>, vector<32x128xf32>, vector<2x128xf32> -> vector<2x128xf32>
    %385 = vector.broadcast %19 : vector<1x128xf32> to vector<2x128xf32>
    %386 = arith.addf %385, %384 : vector<2x128xf32>
    %cst_125 = arith.constant dense<0.000000e+00> : vector<2x128xf32>
    %387 = tpu.matmul %347, %18, %cst_125 {dimension_numbers = #tpu.dot_dimension_numbers<[1], [0], [0], [1], [0, 0, 1, 1], [], []>} : vector<2x32xf32>, vector<32x128xf32>, vector<2x128xf32> -> vector<2x128xf32>
    %388 = arith.addf %386, %387 : vector<2x128xf32>
    %389 = vector.extract_strided_slice %388 {offsets = [0, 0], sizes = [2, 32], strides = [1, 1]} : vector<2x128xf32> to vector<2x32xf32>
    %cst_126 = arith.constant 0.000000e+00 : f32
    %390 = vector.broadcast %cst_126 : f32 to vector<2x32xf32>
    %391 = arith.subf %390, %389 : vector<2x32xf32>
    %392 = math.exp %391 : vector<2x32xf32>
    %cst_127 = arith.constant 1.000000e+00 : f32
    %393 = vector.broadcast %cst_127 : f32 to vector<2x32xf32>
    %394 = arith.addf %393, %392 : vector<2x32xf32>
    %cst_128 = arith.constant 1.000000e+00 : f32
    %395 = vector.broadcast %cst_128 : f32 to vector<2x32xf32>
    %396 = arith.divf %395, %394 : vector<2x32xf32>
    %397 = vector.extract_strided_slice %388 {offsets = [0, 32], sizes = [2, 32], strides = [1, 1]} : vector<2x128xf32> to vector<2x32xf32>
    %cst_129 = arith.constant 0.000000e+00 : f32
    %398 = vector.broadcast %cst_129 : f32 to vector<2x32xf32>
    %399 = arith.subf %398, %397 : vector<2x32xf32>
    %400 = math.exp %399 : vector<2x32xf32>
    %cst_130 = arith.constant 1.000000e+00 : f32
    %401 = vector.broadcast %cst_130 : f32 to vector<2x32xf32>
    %402 = arith.addf %401, %400 : vector<2x32xf32>
    %cst_131 = arith.constant 1.000000e+00 : f32
    %403 = vector.broadcast %cst_131 : f32 to vector<2x32xf32>
    %404 = arith.divf %403, %402 : vector<2x32xf32>
    %405 = vector.extract_strided_slice %388 {offsets = [0, 64], sizes = [2, 32], strides = [1, 1]} : vector<2x128xf32> to vector<2x32xf32>
    %406 = math.tanh %405 : vector<2x32xf32>
    %407 = vector.extract_strided_slice %388 {offsets = [0, 96], sizes = [2, 32], strides = [1, 1]} : vector<2x128xf32> to vector<2x32xf32>
    %cst_132 = arith.constant 0.000000e+00 : f32
    %408 = vector.broadcast %cst_132 : f32 to vector<2x32xf32>
    %409 = arith.subf %408, %407 : vector<2x32xf32>
    %410 = math.exp %409 : vector<2x32xf32>
    %cst_133 = arith.constant 1.000000e+00 : f32
    %411 = vector.broadcast %cst_133 : f32 to vector<2x32xf32>
    %412 = arith.addf %411, %410 : vector<2x32xf32>
    %cst_134 = arith.constant 1.000000e+00 : f32
    %413 = vector.broadcast %cst_134 : f32 to vector<2x32xf32>
    %414 = arith.divf %413, %412 : vector<2x32xf32>
    %415 = arith.mulf %404, %345 : vector<2x32xf32>
    %416 = arith.mulf %396, %406 : vector<2x32xf32>
    %417 = arith.addf %415, %416 : vector<2x32xf32>
    %418 = math.tanh %417 : vector<2x32xf32>
    %419 = arith.mulf %414, %418 : vector<2x32xf32>
    %cst_135 = arith.constant dense<0.000000e+00> : vector<2x128xf32>
    %420 = tpu.matmul %6, %20, %cst_135 {dimension_numbers = #tpu.dot_dimension_numbers<[1], [0], [0], [1], [0, 0, 1, 1], [], []>} : vector<2x32xf32>, vector<32x128xf32>, vector<2x128xf32> -> vector<2x128xf32>
    %421 = vector.broadcast %22 : vector<1x128xf32> to vector<2x128xf32>
    %422 = arith.addf %421, %420 : vector<2x128xf32>
    %cst_136 = arith.constant dense<0.000000e+00> : vector<2x128xf32>
    %423 = tpu.matmul %383, %21, %cst_136 {dimension_numbers = #tpu.dot_dimension_numbers<[1], [0], [0], [1], [0, 0, 1, 1], [], []>} : vector<2x32xf32>, vector<32x128xf32>, vector<2x128xf32> -> vector<2x128xf32>
    %424 = arith.addf %422, %423 : vector<2x128xf32>
    %425 = vector.extract_strided_slice %424 {offsets = [0, 0], sizes = [2, 32], strides = [1, 1]} : vector<2x128xf32> to vector<2x32xf32>
    %cst_137 = arith.constant 0.000000e+00 : f32
    %426 = vector.broadcast %cst_137 : f32 to vector<2x32xf32>
    %427 = arith.subf %426, %425 : vector<2x32xf32>
    %428 = math.exp %427 : vector<2x32xf32>
    %cst_138 = arith.constant 1.000000e+00 : f32
    %429 = vector.broadcast %cst_138 : f32 to vector<2x32xf32>
    %430 = arith.addf %429, %428 : vector<2x32xf32>
    %cst_139 = arith.constant 1.000000e+00 : f32
    %431 = vector.broadcast %cst_139 : f32 to vector<2x32xf32>
    %432 = arith.divf %431, %430 : vector<2x32xf32>
    %433 = vector.extract_strided_slice %424 {offsets = [0, 32], sizes = [2, 32], strides = [1, 1]} : vector<2x128xf32> to vector<2x32xf32>
    %cst_140 = arith.constant 0.000000e+00 : f32
    %434 = vector.broadcast %cst_140 : f32 to vector<2x32xf32>
    %435 = arith.subf %434, %433 : vector<2x32xf32>
    %436 = math.exp %435 : vector<2x32xf32>
    %cst_141 = arith.constant 1.000000e+00 : f32
    %437 = vector.broadcast %cst_141 : f32 to vector<2x32xf32>
    %438 = arith.addf %437, %436 : vector<2x32xf32>
    %cst_142 = arith.constant 1.000000e+00 : f32
    %439 = vector.broadcast %cst_142 : f32 to vector<2x32xf32>
    %440 = arith.divf %439, %438 : vector<2x32xf32>
    %441 = vector.extract_strided_slice %424 {offsets = [0, 64], sizes = [2, 32], strides = [1, 1]} : vector<2x128xf32> to vector<2x32xf32>
    %442 = math.tanh %441 : vector<2x32xf32>
    %443 = vector.extract_strided_slice %424 {offsets = [0, 96], sizes = [2, 32], strides = [1, 1]} : vector<2x128xf32> to vector<2x32xf32>
    %cst_143 = arith.constant 0.000000e+00 : f32
    %444 = vector.broadcast %cst_143 : f32 to vector<2x32xf32>
    %445 = arith.subf %444, %443 : vector<2x32xf32>
    %446 = math.exp %445 : vector<2x32xf32>
    %cst_144 = arith.constant 1.000000e+00 : f32
    %447 = vector.broadcast %cst_144 : f32 to vector<2x32xf32>
    %448 = arith.addf %447, %446 : vector<2x32xf32>
    %cst_145 = arith.constant 1.000000e+00 : f32
    %449 = vector.broadcast %cst_145 : f32 to vector<2x32xf32>
    %450 = arith.divf %449, %448 : vector<2x32xf32>
    %451 = arith.mulf %440, %381 : vector<2x32xf32>
    %452 = arith.mulf %432, %442 : vector<2x32xf32>
    %453 = arith.addf %451, %452 : vector<2x32xf32>
    %454 = math.tanh %453 : vector<2x32xf32>
    %455 = arith.mulf %450, %454 : vector<2x32xf32>
    %cst_146 = arith.constant dense<0.000000e+00> : vector<2x128xf32>
    %456 = tpu.matmul %14, %17, %cst_146 {dimension_numbers = #tpu.dot_dimension_numbers<[1], [0], [0], [1], [0, 0, 1, 1], [], []>} : vector<2x32xf32>, vector<32x128xf32>, vector<2x128xf32> -> vector<2x128xf32>
    %457 = vector.broadcast %19 : vector<1x128xf32> to vector<2x128xf32>
    %458 = arith.addf %457, %456 : vector<2x128xf32>
    %cst_147 = arith.constant dense<0.000000e+00> : vector<2x128xf32>
    %459 = tpu.matmul %419, %18, %cst_147 {dimension_numbers = #tpu.dot_dimension_numbers<[1], [0], [0], [1], [0, 0, 1, 1], [], []>} : vector<2x32xf32>, vector<32x128xf32>, vector<2x128xf32> -> vector<2x128xf32>
    %460 = arith.addf %458, %459 : vector<2x128xf32>
    %461 = vector.extract_strided_slice %460 {offsets = [0, 0], sizes = [2, 32], strides = [1, 1]} : vector<2x128xf32> to vector<2x32xf32>
    %cst_148 = arith.constant 0.000000e+00 : f32
    %462 = vector.broadcast %cst_148 : f32 to vector<2x32xf32>
    %463 = arith.subf %462, %461 : vector<2x32xf32>
    %464 = math.exp %463 : vector<2x32xf32>
    %cst_149 = arith.constant 1.000000e+00 : f32
    %465 = vector.broadcast %cst_149 : f32 to vector<2x32xf32>
    %466 = arith.addf %465, %464 : vector<2x32xf32>
    %cst_150 = arith.constant 1.000000e+00 : f32
    %467 = vector.broadcast %cst_150 : f32 to vector<2x32xf32>
    %468 = arith.divf %467, %466 : vector<2x32xf32>
    %469 = vector.extract_strided_slice %460 {offsets = [0, 32], sizes = [2, 32], strides = [1, 1]} : vector<2x128xf32> to vector<2x32xf32>
    %cst_151 = arith.constant 0.000000e+00 : f32
    %470 = vector.broadcast %cst_151 : f32 to vector<2x32xf32>
    %471 = arith.subf %470, %469 : vector<2x32xf32>
    %472 = math.exp %471 : vector<2x32xf32>
    %cst_152 = arith.constant 1.000000e+00 : f32
    %473 = vector.broadcast %cst_152 : f32 to vector<2x32xf32>
    %474 = arith.addf %473, %472 : vector<2x32xf32>
    %cst_153 = arith.constant 1.000000e+00 : f32
    %475 = vector.broadcast %cst_153 : f32 to vector<2x32xf32>
    %476 = arith.divf %475, %474 : vector<2x32xf32>
    %477 = vector.extract_strided_slice %460 {offsets = [0, 64], sizes = [2, 32], strides = [1, 1]} : vector<2x128xf32> to vector<2x32xf32>
    %478 = math.tanh %477 : vector<2x32xf32>
    %479 = vector.extract_strided_slice %460 {offsets = [0, 96], sizes = [2, 32], strides = [1, 1]} : vector<2x128xf32> to vector<2x32xf32>
    %cst_154 = arith.constant 0.000000e+00 : f32
    %480 = vector.broadcast %cst_154 : f32 to vector<2x32xf32>
    %481 = arith.subf %480, %479 : vector<2x32xf32>
    %482 = math.exp %481 : vector<2x32xf32>
    %cst_155 = arith.constant 1.000000e+00 : f32
    %483 = vector.broadcast %cst_155 : f32 to vector<2x32xf32>
    %484 = arith.addf %483, %482 : vector<2x32xf32>
    %cst_156 = arith.constant 1.000000e+00 : f32
    %485 = vector.broadcast %cst_156 : f32 to vector<2x32xf32>
    %486 = arith.divf %485, %484 : vector<2x32xf32>
    %487 = arith.mulf %476, %417 : vector<2x32xf32>
    %488 = arith.mulf %468, %478 : vector<2x32xf32>
    %489 = arith.addf %487, %488 : vector<2x32xf32>
    %490 = math.tanh %489 : vector<2x32xf32>
    %491 = arith.mulf %486, %490 : vector<2x32xf32>
    %cst_157 = arith.constant dense<0.000000e+00> : vector<2x128xf32>
    %492 = tpu.matmul %4, %20, %cst_157 {dimension_numbers = #tpu.dot_dimension_numbers<[1], [0], [0], [1], [0, 0, 1, 1], [], []>} : vector<2x32xf32>, vector<32x128xf32>, vector<2x128xf32> -> vector<2x128xf32>
    %493 = vector.broadcast %22 : vector<1x128xf32> to vector<2x128xf32>
    %494 = arith.addf %493, %492 : vector<2x128xf32>
    %cst_158 = arith.constant dense<0.000000e+00> : vector<2x128xf32>
    %495 = tpu.matmul %455, %21, %cst_158 {dimension_numbers = #tpu.dot_dimension_numbers<[1], [0], [0], [1], [0, 0, 1, 1], [], []>} : vector<2x32xf32>, vector<32x128xf32>, vector<2x128xf32> -> vector<2x128xf32>
    %496 = arith.addf %494, %495 : vector<2x128xf32>
    %497 = vector.extract_strided_slice %496 {offsets = [0, 0], sizes = [2, 32], strides = [1, 1]} : vector<2x128xf32> to vector<2x32xf32>
    %cst_159 = arith.constant 0.000000e+00 : f32
    %498 = vector.broadcast %cst_159 : f32 to vector<2x32xf32>
    %499 = arith.subf %498, %497 : vector<2x32xf32>
    %500 = math.exp %499 : vector<2x32xf32>
    %cst_160 = arith.constant 1.000000e+00 : f32
    %501 = vector.broadcast %cst_160 : f32 to vector<2x32xf32>
    %502 = arith.addf %501, %500 : vector<2x32xf32>
    %cst_161 = arith.constant 1.000000e+00 : f32
    %503 = vector.broadcast %cst_161 : f32 to vector<2x32xf32>
    %504 = arith.divf %503, %502 : vector<2x32xf32>
    %505 = vector.extract_strided_slice %496 {offsets = [0, 32], sizes = [2, 32], strides = [1, 1]} : vector<2x128xf32> to vector<2x32xf32>
    %cst_162 = arith.constant 0.000000e+00 : f32
    %506 = vector.broadcast %cst_162 : f32 to vector<2x32xf32>
    %507 = arith.subf %506, %505 : vector<2x32xf32>
    %508 = math.exp %507 : vector<2x32xf32>
    %cst_163 = arith.constant 1.000000e+00 : f32
    %509 = vector.broadcast %cst_163 : f32 to vector<2x32xf32>
    %510 = arith.addf %509, %508 : vector<2x32xf32>
    %cst_164 = arith.constant 1.000000e+00 : f32
    %511 = vector.broadcast %cst_164 : f32 to vector<2x32xf32>
    %512 = arith.divf %511, %510 : vector<2x32xf32>
    %513 = vector.extract_strided_slice %496 {offsets = [0, 64], sizes = [2, 32], strides = [1, 1]} : vector<2x128xf32> to vector<2x32xf32>
    %514 = math.tanh %513 : vector<2x32xf32>
    %515 = vector.extract_strided_slice %496 {offsets = [0, 96], sizes = [2, 32], strides = [1, 1]} : vector<2x128xf32> to vector<2x32xf32>
    %cst_165 = arith.constant 0.000000e+00 : f32
    %516 = vector.broadcast %cst_165 : f32 to vector<2x32xf32>
    %517 = arith.subf %516, %515 : vector<2x32xf32>
    %518 = math.exp %517 : vector<2x32xf32>
    %cst_166 = arith.constant 1.000000e+00 : f32
    %519 = vector.broadcast %cst_166 : f32 to vector<2x32xf32>
    %520 = arith.addf %519, %518 : vector<2x32xf32>
    %cst_167 = arith.constant 1.000000e+00 : f32
    %521 = vector.broadcast %cst_167 : f32 to vector<2x32xf32>
    %522 = arith.divf %521, %520 : vector<2x32xf32>
    %523 = arith.mulf %512, %453 : vector<2x32xf32>
    %524 = arith.mulf %504, %514 : vector<2x32xf32>
    %525 = arith.addf %523, %524 : vector<2x32xf32>
    %526 = math.tanh %525 : vector<2x32xf32>
    %527 = arith.mulf %522, %526 : vector<2x32xf32>
    %cst_168 = arith.constant dense<0.000000e+00> : vector<2x128xf32>
    %528 = tpu.matmul %16, %17, %cst_168 {dimension_numbers = #tpu.dot_dimension_numbers<[1], [0], [0], [1], [0, 0, 1, 1], [], []>} : vector<2x32xf32>, vector<32x128xf32>, vector<2x128xf32> -> vector<2x128xf32>
    %529 = vector.broadcast %19 : vector<1x128xf32> to vector<2x128xf32>
    %530 = arith.addf %529, %528 : vector<2x128xf32>
    %cst_169 = arith.constant dense<0.000000e+00> : vector<2x128xf32>
    %531 = tpu.matmul %491, %18, %cst_169 {dimension_numbers = #tpu.dot_dimension_numbers<[1], [0], [0], [1], [0, 0, 1, 1], [], []>} : vector<2x32xf32>, vector<32x128xf32>, vector<2x128xf32> -> vector<2x128xf32>
    %532 = arith.addf %530, %531 : vector<2x128xf32>
    %533 = vector.extract_strided_slice %532 {offsets = [0, 0], sizes = [2, 32], strides = [1, 1]} : vector<2x128xf32> to vector<2x32xf32>
    %cst_170 = arith.constant 0.000000e+00 : f32
    %534 = vector.broadcast %cst_170 : f32 to vector<2x32xf32>
    %535 = arith.subf %534, %533 : vector<2x32xf32>
    %536 = math.exp %535 : vector<2x32xf32>
    %cst_171 = arith.constant 1.000000e+00 : f32
    %537 = vector.broadcast %cst_171 : f32 to vector<2x32xf32>
    %538 = arith.addf %537, %536 : vector<2x32xf32>
    %cst_172 = arith.constant 1.000000e+00 : f32
    %539 = vector.broadcast %cst_172 : f32 to vector<2x32xf32>
    %540 = arith.divf %539, %538 : vector<2x32xf32>
    %541 = vector.extract_strided_slice %532 {offsets = [0, 32], sizes = [2, 32], strides = [1, 1]} : vector<2x128xf32> to vector<2x32xf32>
    %cst_173 = arith.constant 0.000000e+00 : f32
    %542 = vector.broadcast %cst_173 : f32 to vector<2x32xf32>
    %543 = arith.subf %542, %541 : vector<2x32xf32>
    %544 = math.exp %543 : vector<2x32xf32>
    %cst_174 = arith.constant 1.000000e+00 : f32
    %545 = vector.broadcast %cst_174 : f32 to vector<2x32xf32>
    %546 = arith.addf %545, %544 : vector<2x32xf32>
    %cst_175 = arith.constant 1.000000e+00 : f32
    %547 = vector.broadcast %cst_175 : f32 to vector<2x32xf32>
    %548 = arith.divf %547, %546 : vector<2x32xf32>
    %549 = vector.extract_strided_slice %532 {offsets = [0, 64], sizes = [2, 32], strides = [1, 1]} : vector<2x128xf32> to vector<2x32xf32>
    %550 = math.tanh %549 : vector<2x32xf32>
    %551 = vector.extract_strided_slice %532 {offsets = [0, 96], sizes = [2, 32], strides = [1, 1]} : vector<2x128xf32> to vector<2x32xf32>
    %cst_176 = arith.constant 0.000000e+00 : f32
    %552 = vector.broadcast %cst_176 : f32 to vector<2x32xf32>
    %553 = arith.subf %552, %551 : vector<2x32xf32>
    %554 = math.exp %553 : vector<2x32xf32>
    %cst_177 = arith.constant 1.000000e+00 : f32
    %555 = vector.broadcast %cst_177 : f32 to vector<2x32xf32>
    %556 = arith.addf %555, %554 : vector<2x32xf32>
    %cst_178 = arith.constant 1.000000e+00 : f32
    %557 = vector.broadcast %cst_178 : f32 to vector<2x32xf32>
    %558 = arith.divf %557, %556 : vector<2x32xf32>
    %559 = arith.mulf %548, %489 : vector<2x32xf32>
    %560 = arith.mulf %540, %550 : vector<2x32xf32>
    %561 = arith.addf %559, %560 : vector<2x32xf32>
    %562 = math.tanh %561 : vector<2x32xf32>
    %563 = arith.mulf %558, %562 : vector<2x32xf32>
    %cst_179 = arith.constant dense<0.000000e+00> : vector<2x128xf32>
    %564 = tpu.matmul %2, %20, %cst_179 {dimension_numbers = #tpu.dot_dimension_numbers<[1], [0], [0], [1], [0, 0, 1, 1], [], []>} : vector<2x32xf32>, vector<32x128xf32>, vector<2x128xf32> -> vector<2x128xf32>
    %565 = vector.broadcast %22 : vector<1x128xf32> to vector<2x128xf32>
    %566 = arith.addf %565, %564 : vector<2x128xf32>
    %cst_180 = arith.constant dense<0.000000e+00> : vector<2x128xf32>
    %567 = tpu.matmul %527, %21, %cst_180 {dimension_numbers = #tpu.dot_dimension_numbers<[1], [0], [0], [1], [0, 0, 1, 1], [], []>} : vector<2x32xf32>, vector<32x128xf32>, vector<2x128xf32> -> vector<2x128xf32>
    %568 = arith.addf %566, %567 : vector<2x128xf32>
    %569 = vector.extract_strided_slice %568 {offsets = [0, 0], sizes = [2, 32], strides = [1, 1]} : vector<2x128xf32> to vector<2x32xf32>
    %cst_181 = arith.constant 0.000000e+00 : f32
    %570 = vector.broadcast %cst_181 : f32 to vector<2x32xf32>
    %571 = arith.subf %570, %569 : vector<2x32xf32>
    %572 = math.exp %571 : vector<2x32xf32>
    %cst_182 = arith.constant 1.000000e+00 : f32
    %573 = vector.broadcast %cst_182 : f32 to vector<2x32xf32>
    %574 = arith.addf %573, %572 : vector<2x32xf32>
    %cst_183 = arith.constant 1.000000e+00 : f32
    %575 = vector.broadcast %cst_183 : f32 to vector<2x32xf32>
    %576 = arith.divf %575, %574 : vector<2x32xf32>
    %577 = vector.extract_strided_slice %568 {offsets = [0, 32], sizes = [2, 32], strides = [1, 1]} : vector<2x128xf32> to vector<2x32xf32>
    %cst_184 = arith.constant 0.000000e+00 : f32
    %578 = vector.broadcast %cst_184 : f32 to vector<2x32xf32>
    %579 = arith.subf %578, %577 : vector<2x32xf32>
    %580 = math.exp %579 : vector<2x32xf32>
    %cst_185 = arith.constant 1.000000e+00 : f32
    %581 = vector.broadcast %cst_185 : f32 to vector<2x32xf32>
    %582 = arith.addf %581, %580 : vector<2x32xf32>
    %cst_186 = arith.constant 1.000000e+00 : f32
    %583 = vector.broadcast %cst_186 : f32 to vector<2x32xf32>
    %584 = arith.divf %583, %582 : vector<2x32xf32>
    %585 = vector.extract_strided_slice %568 {offsets = [0, 64], sizes = [2, 32], strides = [1, 1]} : vector<2x128xf32> to vector<2x32xf32>
    %586 = math.tanh %585 : vector<2x32xf32>
    %587 = vector.extract_strided_slice %568 {offsets = [0, 96], sizes = [2, 32], strides = [1, 1]} : vector<2x128xf32> to vector<2x32xf32>
    %cst_187 = arith.constant 0.000000e+00 : f32
    %588 = vector.broadcast %cst_187 : f32 to vector<2x32xf32>
    %589 = arith.subf %588, %587 : vector<2x32xf32>
    %590 = math.exp %589 : vector<2x32xf32>
    %cst_188 = arith.constant 1.000000e+00 : f32
    %591 = vector.broadcast %cst_188 : f32 to vector<2x32xf32>
    %592 = arith.addf %591, %590 : vector<2x32xf32>
    %cst_189 = arith.constant 1.000000e+00 : f32
    %593 = vector.broadcast %cst_189 : f32 to vector<2x32xf32>
    %594 = arith.divf %593, %592 : vector<2x32xf32>
    %595 = arith.mulf %584, %525 : vector<2x32xf32>
    %596 = arith.mulf %576, %586 : vector<2x32xf32>
    %597 = arith.addf %595, %596 : vector<2x32xf32>
    %598 = math.tanh %597 : vector<2x32xf32>
    %599 = arith.mulf %594, %598 : vector<2x32xf32>
    %c0_190 = arith.constant 0 : index
    %c0_191 = arith.constant 0 : index
    %600 = vector.load %arg8[%c0_190, %c0_191] : memref<64x128xf32, #tpu.memory_space<vmem>>, vector<64x128xf32>
    %c0_192 = arith.constant 0 : index
    %c0_193 = arith.constant 0 : index
    %601 = vector.load %arg9[%c0_192, %c0_193] : memref<32x128xf32, #tpu.memory_space<vmem>>, vector<32x128xf32>
    %c0_194 = arith.constant 0 : index
    %c0_195 = arith.constant 0 : index
    %602 = vector.load %arg10[%c0_194, %c0_195] : memref<1x128xf32, #tpu.memory_space<vmem>>, vector<1x128xf32>
    %c0_196 = arith.constant 0 : index
    %c0_197 = arith.constant 0 : index
    %603 = vector.load %arg11[%c0_196, %c0_197] : memref<64x128xf32, #tpu.memory_space<vmem>>, vector<64x128xf32>
    %c0_198 = arith.constant 0 : index
    %c0_199 = arith.constant 0 : index
    %604 = vector.load %arg12[%c0_198, %c0_199] : memref<32x128xf32, #tpu.memory_space<vmem>>, vector<32x128xf32>
    %c0_200 = arith.constant 0 : index
    %c0_201 = arith.constant 0 : index
    %605 = vector.load %arg13[%c0_200, %c0_201] : memref<1x128xf32, #tpu.memory_space<vmem>>, vector<1x128xf32>
    %cst_202 = arith.constant 0.000000e+00 : f32
    %606 = vector.broadcast %cst_202 : f32 to vector<2x32xf32>
    %607 = vector.extract_strided_slice %600 {offsets = [0, 0], sizes = [32, 128], strides = [1, 1]} : vector<64x128xf32> to vector<32x128xf32>
    %cst_203 = arith.constant dense<0.000000e+00> : vector<2x128xf32>
    %608 = tpu.matmul %59, %607, %cst_203 {dimension_numbers = #tpu.dot_dimension_numbers<[1], [0], [0], [1], [0, 0, 1, 1], [], []>} : vector<2x32xf32>, vector<32x128xf32>, vector<2x128xf32> -> vector<2x128xf32>
    %609 = vector.broadcast %602 : vector<1x128xf32> to vector<2x128xf32>
    %610 = arith.addf %609, %608 : vector<2x128xf32>
    %611 = vector.extract_strided_slice %600 {offsets = [32, 0], sizes = [32, 128], strides = [1, 1]} : vector<64x128xf32> to vector<32x128xf32>
    %cst_204 = arith.constant dense<0.000000e+00> : vector<2x128xf32>
    %612 = tpu.matmul %599, %611, %cst_204 {dimension_numbers = #tpu.dot_dimension_numbers<[1], [0], [0], [1], [0, 0, 1, 1], [], []>} : vector<2x32xf32>, vector<32x128xf32>, vector<2x128xf32> -> vector<2x128xf32>
    %613 = arith.addf %610, %612 : vector<2x128xf32>
    %cst_205 = arith.constant dense<0.000000e+00> : vector<2x128xf32>
    %614 = tpu.matmul %606, %601, %cst_205 {dimension_numbers = #tpu.dot_dimension_numbers<[1], [0], [0], [1], [0, 0, 1, 1], [], []>} : vector<2x32xf32>, vector<32x128xf32>, vector<2x128xf32> -> vector<2x128xf32>
    %615 = arith.addf %613, %614 : vector<2x128xf32>
    %616 = vector.extract_strided_slice %615 {offsets = [0, 0], sizes = [2, 32], strides = [1, 1]} : vector<2x128xf32> to vector<2x32xf32>
    %cst_206 = arith.constant 0.000000e+00 : f32
    %617 = vector.broadcast %cst_206 : f32 to vector<2x32xf32>
    %618 = arith.subf %617, %616 : vector<2x32xf32>
    %619 = math.exp %618 : vector<2x32xf32>
    %cst_207 = arith.constant 1.000000e+00 : f32
    %620 = vector.broadcast %cst_207 : f32 to vector<2x32xf32>
    %621 = arith.addf %620, %619 : vector<2x32xf32>
    %cst_208 = arith.constant 1.000000e+00 : f32
    %622 = vector.broadcast %cst_208 : f32 to vector<2x32xf32>
    %623 = arith.divf %622, %621 : vector<2x32xf32>
    %624 = vector.extract_strided_slice %615 {offsets = [0, 32], sizes = [2, 32], strides = [1, 1]} : vector<2x128xf32> to vector<2x32xf32>
    %cst_209 = arith.constant 0.000000e+00 : f32
    %625 = vector.broadcast %cst_209 : f32 to vector<2x32xf32>
    %626 = arith.subf %625, %624 : vector<2x32xf32>
    %627 = math.exp %626 : vector<2x32xf32>
    %cst_210 = arith.constant 1.000000e+00 : f32
    %628 = vector.broadcast %cst_210 : f32 to vector<2x32xf32>
    %629 = arith.addf %628, %627 : vector<2x32xf32>
    %cst_211 = arith.constant 1.000000e+00 : f32
    %630 = vector.broadcast %cst_211 : f32 to vector<2x32xf32>
    %631 = arith.divf %630, %629 : vector<2x32xf32>
    %632 = vector.extract_strided_slice %615 {offsets = [0, 64], sizes = [2, 32], strides = [1, 1]} : vector<2x128xf32> to vector<2x32xf32>
    %633 = math.tanh %632 : vector<2x32xf32>
    %634 = vector.extract_strided_slice %615 {offsets = [0, 96], sizes = [2, 32], strides = [1, 1]} : vector<2x128xf32> to vector<2x32xf32>
    %cst_212 = arith.constant 0.000000e+00 : f32
    %635 = vector.broadcast %cst_212 : f32 to vector<2x32xf32>
    %636 = arith.subf %635, %634 : vector<2x32xf32>
    %637 = math.exp %636 : vector<2x32xf32>
    %cst_213 = arith.constant 1.000000e+00 : f32
    %638 = vector.broadcast %cst_213 : f32 to vector<2x32xf32>
    %639 = arith.addf %638, %637 : vector<2x32xf32>
    %cst_214 = arith.constant 1.000000e+00 : f32
    %640 = vector.broadcast %cst_214 : f32 to vector<2x32xf32>
    %641 = arith.divf %640, %639 : vector<2x32xf32>
    %642 = arith.mulf %631, %606 : vector<2x32xf32>
    %643 = arith.mulf %623, %633 : vector<2x32xf32>
    %644 = arith.addf %642, %643 : vector<2x32xf32>
    %645 = math.tanh %644 : vector<2x32xf32>
    %646 = arith.mulf %641, %645 : vector<2x32xf32>
    %647 = vector.extract_strided_slice %603 {offsets = [0, 0], sizes = [32, 128], strides = [1, 1]} : vector<64x128xf32> to vector<32x128xf32>
    %cst_215 = arith.constant dense<0.000000e+00> : vector<2x128xf32>
    %648 = tpu.matmul %563, %647, %cst_215 {dimension_numbers = #tpu.dot_dimension_numbers<[1], [0], [0], [1], [0, 0, 1, 1], [], []>} : vector<2x32xf32>, vector<32x128xf32>, vector<2x128xf32> -> vector<2x128xf32>
    %649 = vector.broadcast %605 : vector<1x128xf32> to vector<2x128xf32>
    %650 = arith.addf %649, %648 : vector<2x128xf32>
    %651 = vector.extract_strided_slice %603 {offsets = [32, 0], sizes = [32, 128], strides = [1, 1]} : vector<64x128xf32> to vector<32x128xf32>
    %cst_216 = arith.constant dense<0.000000e+00> : vector<2x128xf32>
    %652 = tpu.matmul %95, %651, %cst_216 {dimension_numbers = #tpu.dot_dimension_numbers<[1], [0], [0], [1], [0, 0, 1, 1], [], []>} : vector<2x32xf32>, vector<32x128xf32>, vector<2x128xf32> -> vector<2x128xf32>
    %653 = arith.addf %650, %652 : vector<2x128xf32>
    %cst_217 = arith.constant dense<0.000000e+00> : vector<2x128xf32>
    %654 = tpu.matmul %606, %604, %cst_217 {dimension_numbers = #tpu.dot_dimension_numbers<[1], [0], [0], [1], [0, 0, 1, 1], [], []>} : vector<2x32xf32>, vector<32x128xf32>, vector<2x128xf32> -> vector<2x128xf32>
    %655 = arith.addf %653, %654 : vector<2x128xf32>
    %656 = vector.extract_strided_slice %655 {offsets = [0, 0], sizes = [2, 32], strides = [1, 1]} : vector<2x128xf32> to vector<2x32xf32>
    %cst_218 = arith.constant 0.000000e+00 : f32
    %657 = vector.broadcast %cst_218 : f32 to vector<2x32xf32>
    %658 = arith.subf %657, %656 : vector<2x32xf32>
    %659 = math.exp %658 : vector<2x32xf32>
    %cst_219 = arith.constant 1.000000e+00 : f32
    %660 = vector.broadcast %cst_219 : f32 to vector<2x32xf32>
    %661 = arith.addf %660, %659 : vector<2x32xf32>
    %cst_220 = arith.constant 1.000000e+00 : f32
    %662 = vector.broadcast %cst_220 : f32 to vector<2x32xf32>
    %663 = arith.divf %662, %661 : vector<2x32xf32>
    %664 = vector.extract_strided_slice %655 {offsets = [0, 32], sizes = [2, 32], strides = [1, 1]} : vector<2x128xf32> to vector<2x32xf32>
    %cst_221 = arith.constant 0.000000e+00 : f32
    %665 = vector.broadcast %cst_221 : f32 to vector<2x32xf32>
    %666 = arith.subf %665, %664 : vector<2x32xf32>
    %667 = math.exp %666 : vector<2x32xf32>
    %cst_222 = arith.constant 1.000000e+00 : f32
    %668 = vector.broadcast %cst_222 : f32 to vector<2x32xf32>
    %669 = arith.addf %668, %667 : vector<2x32xf32>
    %cst_223 = arith.constant 1.000000e+00 : f32
    %670 = vector.broadcast %cst_223 : f32 to vector<2x32xf32>
    %671 = arith.divf %670, %669 : vector<2x32xf32>
    %672 = vector.extract_strided_slice %655 {offsets = [0, 64], sizes = [2, 32], strides = [1, 1]} : vector<2x128xf32> to vector<2x32xf32>
    %673 = math.tanh %672 : vector<2x32xf32>
    %674 = vector.extract_strided_slice %655 {offsets = [0, 96], sizes = [2, 32], strides = [1, 1]} : vector<2x128xf32> to vector<2x32xf32>
    %cst_224 = arith.constant 0.000000e+00 : f32
    %675 = vector.broadcast %cst_224 : f32 to vector<2x32xf32>
    %676 = arith.subf %675, %674 : vector<2x32xf32>
    %677 = math.exp %676 : vector<2x32xf32>
    %cst_225 = arith.constant 1.000000e+00 : f32
    %678 = vector.broadcast %cst_225 : f32 to vector<2x32xf32>
    %679 = arith.addf %678, %677 : vector<2x32xf32>
    %cst_226 = arith.constant 1.000000e+00 : f32
    %680 = vector.broadcast %cst_226 : f32 to vector<2x32xf32>
    %681 = arith.divf %680, %679 : vector<2x32xf32>
    %682 = arith.mulf %671, %606 : vector<2x32xf32>
    %683 = arith.mulf %663, %673 : vector<2x32xf32>
    %684 = arith.addf %682, %683 : vector<2x32xf32>
    %685 = math.tanh %684 : vector<2x32xf32>
    %686 = arith.mulf %681, %685 : vector<2x32xf32>
    %687 = vector.extract_strided_slice %600 {offsets = [0, 0], sizes = [32, 128], strides = [1, 1]} : vector<64x128xf32> to vector<32x128xf32>
    %cst_227 = arith.constant dense<0.000000e+00> : vector<2x128xf32>
    %688 = tpu.matmul %131, %687, %cst_227 {dimension_numbers = #tpu.dot_dimension_numbers<[1], [0], [0], [1], [0, 0, 1, 1], [], []>} : vector<2x32xf32>, vector<32x128xf32>, vector<2x128xf32> -> vector<2x128xf32>
    %689 = vector.broadcast %602 : vector<1x128xf32> to vector<2x128xf32>
    %690 = arith.addf %689, %688 : vector<2x128xf32>
    %691 = vector.extract_strided_slice %600 {offsets = [32, 0], sizes = [32, 128], strides = [1, 1]} : vector<64x128xf32> to vector<32x128xf32>
    %cst_228 = arith.constant dense<0.000000e+00> : vector<2x128xf32>
    %692 = tpu.matmul %527, %691, %cst_228 {dimension_numbers = #tpu.dot_dimension_numbers<[1], [0], [0], [1], [0, 0, 1, 1], [], []>} : vector<2x32xf32>, vector<32x128xf32>, vector<2x128xf32> -> vector<2x128xf32>
    %693 = arith.addf %690, %692 : vector<2x128xf32>
    %cst_229 = arith.constant dense<0.000000e+00> : vector<2x128xf32>
    %694 = tpu.matmul %646, %601, %cst_229 {dimension_numbers = #tpu.dot_dimension_numbers<[1], [0], [0], [1], [0, 0, 1, 1], [], []>} : vector<2x32xf32>, vector<32x128xf32>, vector<2x128xf32> -> vector<2x128xf32>
    %695 = arith.addf %693, %694 : vector<2x128xf32>
    %696 = vector.extract_strided_slice %695 {offsets = [0, 0], sizes = [2, 32], strides = [1, 1]} : vector<2x128xf32> to vector<2x32xf32>
    %cst_230 = arith.constant 0.000000e+00 : f32
    %697 = vector.broadcast %cst_230 : f32 to vector<2x32xf32>
    %698 = arith.subf %697, %696 : vector<2x32xf32>
    %699 = math.exp %698 : vector<2x32xf32>
    %cst_231 = arith.constant 1.000000e+00 : f32
    %700 = vector.broadcast %cst_231 : f32 to vector<2x32xf32>
    %701 = arith.addf %700, %699 : vector<2x32xf32>
    %cst_232 = arith.constant 1.000000e+00 : f32
    %702 = vector.broadcast %cst_232 : f32 to vector<2x32xf32>
    %703 = arith.divf %702, %701 : vector<2x32xf32>
    %704 = vector.extract_strided_slice %695 {offsets = [0, 32], sizes = [2, 32], strides = [1, 1]} : vector<2x128xf32> to vector<2x32xf32>
    %cst_233 = arith.constant 0.000000e+00 : f32
    %705 = vector.broadcast %cst_233 : f32 to vector<2x32xf32>
    %706 = arith.subf %705, %704 : vector<2x32xf32>
    %707 = math.exp %706 : vector<2x32xf32>
    %cst_234 = arith.constant 1.000000e+00 : f32
    %708 = vector.broadcast %cst_234 : f32 to vector<2x32xf32>
    %709 = arith.addf %708, %707 : vector<2x32xf32>
    %cst_235 = arith.constant 1.000000e+00 : f32
    %710 = vector.broadcast %cst_235 : f32 to vector<2x32xf32>
    %711 = arith.divf %710, %709 : vector<2x32xf32>
    %712 = vector.extract_strided_slice %695 {offsets = [0, 64], sizes = [2, 32], strides = [1, 1]} : vector<2x128xf32> to vector<2x32xf32>
    %713 = math.tanh %712 : vector<2x32xf32>
    %714 = vector.extract_strided_slice %695 {offsets = [0, 96], sizes = [2, 32], strides = [1, 1]} : vector<2x128xf32> to vector<2x32xf32>
    %cst_236 = arith.constant 0.000000e+00 : f32
    %715 = vector.broadcast %cst_236 : f32 to vector<2x32xf32>
    %716 = arith.subf %715, %714 : vector<2x32xf32>
    %717 = math.exp %716 : vector<2x32xf32>
    %cst_237 = arith.constant 1.000000e+00 : f32
    %718 = vector.broadcast %cst_237 : f32 to vector<2x32xf32>
    %719 = arith.addf %718, %717 : vector<2x32xf32>
    %cst_238 = arith.constant 1.000000e+00 : f32
    %720 = vector.broadcast %cst_238 : f32 to vector<2x32xf32>
    %721 = arith.divf %720, %719 : vector<2x32xf32>
    %722 = arith.mulf %711, %644 : vector<2x32xf32>
    %723 = arith.mulf %703, %713 : vector<2x32xf32>
    %724 = arith.addf %722, %723 : vector<2x32xf32>
    %725 = math.tanh %724 : vector<2x32xf32>
    %726 = arith.mulf %721, %725 : vector<2x32xf32>
    %727 = vector.extract_strided_slice %603 {offsets = [0, 0], sizes = [32, 128], strides = [1, 1]} : vector<64x128xf32> to vector<32x128xf32>
    %cst_239 = arith.constant dense<0.000000e+00> : vector<2x128xf32>
    %728 = tpu.matmul %491, %727, %cst_239 {dimension_numbers = #tpu.dot_dimension_numbers<[1], [0], [0], [1], [0, 0, 1, 1], [], []>} : vector<2x32xf32>, vector<32x128xf32>, vector<2x128xf32> -> vector<2x128xf32>
    %729 = vector.broadcast %605 : vector<1x128xf32> to vector<2x128xf32>
    %730 = arith.addf %729, %728 : vector<2x128xf32>
    %731 = vector.extract_strided_slice %603 {offsets = [32, 0], sizes = [32, 128], strides = [1, 1]} : vector<64x128xf32> to vector<32x128xf32>
    %cst_240 = arith.constant dense<0.000000e+00> : vector<2x128xf32>
    %732 = tpu.matmul %167, %731, %cst_240 {dimension_numbers = #tpu.dot_dimension_numbers<[1], [0], [0], [1], [0, 0, 1, 1], [], []>} : vector<2x32xf32>, vector<32x128xf32>, vector<2x128xf32> -> vector<2x128xf32>
    %733 = arith.addf %730, %732 : vector<2x128xf32>
    %cst_241 = arith.constant dense<0.000000e+00> : vector<2x128xf32>
    %734 = tpu.matmul %686, %604, %cst_241 {dimension_numbers = #tpu.dot_dimension_numbers<[1], [0], [0], [1], [0, 0, 1, 1], [], []>} : vector<2x32xf32>, vector<32x128xf32>, vector<2x128xf32> -> vector<2x128xf32>
    %735 = arith.addf %733, %734 : vector<2x128xf32>
    %736 = vector.extract_strided_slice %735 {offsets = [0, 0], sizes = [2, 32], strides = [1, 1]} : vector<2x128xf32> to vector<2x32xf32>
    %cst_242 = arith.constant 0.000000e+00 : f32
    %737 = vector.broadcast %cst_242 : f32 to vector<2x32xf32>
    %738 = arith.subf %737, %736 : vector<2x32xf32>
    %739 = math.exp %738 : vector<2x32xf32>
    %cst_243 = arith.constant 1.000000e+00 : f32
    %740 = vector.broadcast %cst_243 : f32 to vector<2x32xf32>
    %741 = arith.addf %740, %739 : vector<2x32xf32>
    %cst_244 = arith.constant 1.000000e+00 : f32
    %742 = vector.broadcast %cst_244 : f32 to vector<2x32xf32>
    %743 = arith.divf %742, %741 : vector<2x32xf32>
    %744 = vector.extract_strided_slice %735 {offsets = [0, 32], sizes = [2, 32], strides = [1, 1]} : vector<2x128xf32> to vector<2x32xf32>
    %cst_245 = arith.constant 0.000000e+00 : f32
    %745 = vector.broadcast %cst_245 : f32 to vector<2x32xf32>
    %746 = arith.subf %745, %744 : vector<2x32xf32>
    %747 = math.exp %746 : vector<2x32xf32>
    %cst_246 = arith.constant 1.000000e+00 : f32
    %748 = vector.broadcast %cst_246 : f32 to vector<2x32xf32>
    %749 = arith.addf %748, %747 : vector<2x32xf32>
    %cst_247 = arith.constant 1.000000e+00 : f32
    %750 = vector.broadcast %cst_247 : f32 to vector<2x32xf32>
    %751 = arith.divf %750, %749 : vector<2x32xf32>
    %752 = vector.extract_strided_slice %735 {offsets = [0, 64], sizes = [2, 32], strides = [1, 1]} : vector<2x128xf32> to vector<2x32xf32>
    %753 = math.tanh %752 : vector<2x32xf32>
    %754 = vector.extract_strided_slice %735 {offsets = [0, 96], sizes = [2, 32], strides = [1, 1]} : vector<2x128xf32> to vector<2x32xf32>
    %cst_248 = arith.constant 0.000000e+00 : f32
    %755 = vector.broadcast %cst_248 : f32 to vector<2x32xf32>
    %756 = arith.subf %755, %754 : vector<2x32xf32>
    %757 = math.exp %756 : vector<2x32xf32>
    %cst_249 = arith.constant 1.000000e+00 : f32
    %758 = vector.broadcast %cst_249 : f32 to vector<2x32xf32>
    %759 = arith.addf %758, %757 : vector<2x32xf32>
    %cst_250 = arith.constant 1.000000e+00 : f32
    %760 = vector.broadcast %cst_250 : f32 to vector<2x32xf32>
    %761 = arith.divf %760, %759 : vector<2x32xf32>
    %762 = arith.mulf %751, %684 : vector<2x32xf32>
    %763 = arith.mulf %743, %753 : vector<2x32xf32>
    %764 = arith.addf %762, %763 : vector<2x32xf32>
    %765 = math.tanh %764 : vector<2x32xf32>
    %766 = arith.mulf %761, %765 : vector<2x32xf32>
    %767 = vector.extract_strided_slice %600 {offsets = [0, 0], sizes = [32, 128], strides = [1, 1]} : vector<64x128xf32> to vector<32x128xf32>
    %cst_251 = arith.constant dense<0.000000e+00> : vector<2x128xf32>
    %768 = tpu.matmul %203, %767, %cst_251 {dimension_numbers = #tpu.dot_dimension_numbers<[1], [0], [0], [1], [0, 0, 1, 1], [], []>} : vector<2x32xf32>, vector<32x128xf32>, vector<2x128xf32> -> vector<2x128xf32>
    %769 = vector.broadcast %602 : vector<1x128xf32> to vector<2x128xf32>
    %770 = arith.addf %769, %768 : vector<2x128xf32>
    %771 = vector.extract_strided_slice %600 {offsets = [32, 0], sizes = [32, 128], strides = [1, 1]} : vector<64x128xf32> to vector<32x128xf32>
    %cst_252 = arith.constant dense<0.000000e+00> : vector<2x128xf32>
    %772 = tpu.matmul %455, %771, %cst_252 {dimension_numbers = #tpu.dot_dimension_numbers<[1], [0], [0], [1], [0, 0, 1, 1], [], []>} : vector<2x32xf32>, vector<32x128xf32>, vector<2x128xf32> -> vector<2x128xf32>
    %773 = arith.addf %770, %772 : vector<2x128xf32>
    %cst_253 = arith.constant dense<0.000000e+00> : vector<2x128xf32>
    %774 = tpu.matmul %726, %601, %cst_253 {dimension_numbers = #tpu.dot_dimension_numbers<[1], [0], [0], [1], [0, 0, 1, 1], [], []>} : vector<2x32xf32>, vector<32x128xf32>, vector<2x128xf32> -> vector<2x128xf32>
    %775 = arith.addf %773, %774 : vector<2x128xf32>
    %776 = vector.extract_strided_slice %775 {offsets = [0, 0], sizes = [2, 32], strides = [1, 1]} : vector<2x128xf32> to vector<2x32xf32>
    %cst_254 = arith.constant 0.000000e+00 : f32
    %777 = vector.broadcast %cst_254 : f32 to vector<2x32xf32>
    %778 = arith.subf %777, %776 : vector<2x32xf32>
    %779 = math.exp %778 : vector<2x32xf32>
    %cst_255 = arith.constant 1.000000e+00 : f32
    %780 = vector.broadcast %cst_255 : f32 to vector<2x32xf32>
    %781 = arith.addf %780, %779 : vector<2x32xf32>
    %cst_256 = arith.constant 1.000000e+00 : f32
    %782 = vector.broadcast %cst_256 : f32 to vector<2x32xf32>
    %783 = arith.divf %782, %781 : vector<2x32xf32>
    %784 = vector.extract_strided_slice %775 {offsets = [0, 32], sizes = [2, 32], strides = [1, 1]} : vector<2x128xf32> to vector<2x32xf32>
    %cst_257 = arith.constant 0.000000e+00 : f32
    %785 = vector.broadcast %cst_257 : f32 to vector<2x32xf32>
    %786 = arith.subf %785, %784 : vector<2x32xf32>
    %787 = math.exp %786 : vector<2x32xf32>
    %cst_258 = arith.constant 1.000000e+00 : f32
    %788 = vector.broadcast %cst_258 : f32 to vector<2x32xf32>
    %789 = arith.addf %788, %787 : vector<2x32xf32>
    %cst_259 = arith.constant 1.000000e+00 : f32
    %790 = vector.broadcast %cst_259 : f32 to vector<2x32xf32>
    %791 = arith.divf %790, %789 : vector<2x32xf32>
    %792 = vector.extract_strided_slice %775 {offsets = [0, 64], sizes = [2, 32], strides = [1, 1]} : vector<2x128xf32> to vector<2x32xf32>
    %793 = math.tanh %792 : vector<2x32xf32>
    %794 = vector.extract_strided_slice %775 {offsets = [0, 96], sizes = [2, 32], strides = [1, 1]} : vector<2x128xf32> to vector<2x32xf32>
    %cst_260 = arith.constant 0.000000e+00 : f32
    %795 = vector.broadcast %cst_260 : f32 to vector<2x32xf32>
    %796 = arith.subf %795, %794 : vector<2x32xf32>
    %797 = math.exp %796 : vector<2x32xf32>
    %cst_261 = arith.constant 1.000000e+00 : f32
    %798 = vector.broadcast %cst_261 : f32 to vector<2x32xf32>
    %799 = arith.addf %798, %797 : vector<2x32xf32>
    %cst_262 = arith.constant 1.000000e+00 : f32
    %800 = vector.broadcast %cst_262 : f32 to vector<2x32xf32>
    %801 = arith.divf %800, %799 : vector<2x32xf32>
    %802 = arith.mulf %791, %724 : vector<2x32xf32>
    %803 = arith.mulf %783, %793 : vector<2x32xf32>
    %804 = arith.addf %802, %803 : vector<2x32xf32>
    %805 = math.tanh %804 : vector<2x32xf32>
    %806 = arith.mulf %801, %805 : vector<2x32xf32>
    %807 = vector.extract_strided_slice %603 {offsets = [0, 0], sizes = [32, 128], strides = [1, 1]} : vector<64x128xf32> to vector<32x128xf32>
    %cst_263 = arith.constant dense<0.000000e+00> : vector<2x128xf32>
    %808 = tpu.matmul %419, %807, %cst_263 {dimension_numbers = #tpu.dot_dimension_numbers<[1], [0], [0], [1], [0, 0, 1, 1], [], []>} : vector<2x32xf32>, vector<32x128xf32>, vector<2x128xf32> -> vector<2x128xf32>
    %809 = vector.broadcast %605 : vector<1x128xf32> to vector<2x128xf32>
    %810 = arith.addf %809, %808 : vector<2x128xf32>
    %811 = vector.extract_strided_slice %603 {offsets = [32, 0], sizes = [32, 128], strides = [1, 1]} : vector<64x128xf32> to vector<32x128xf32>
    %cst_264 = arith.constant dense<0.000000e+00> : vector<2x128xf32>
    %812 = tpu.matmul %239, %811, %cst_264 {dimension_numbers = #tpu.dot_dimension_numbers<[1], [0], [0], [1], [0, 0, 1, 1], [], []>} : vector<2x32xf32>, vector<32x128xf32>, vector<2x128xf32> -> vector<2x128xf32>
    %813 = arith.addf %810, %812 : vector<2x128xf32>
    %cst_265 = arith.constant dense<0.000000e+00> : vector<2x128xf32>
    %814 = tpu.matmul %766, %604, %cst_265 {dimension_numbers = #tpu.dot_dimension_numbers<[1], [0], [0], [1], [0, 0, 1, 1], [], []>} : vector<2x32xf32>, vector<32x128xf32>, vector<2x128xf32> -> vector<2x128xf32>
    %815 = arith.addf %813, %814 : vector<2x128xf32>
    %816 = vector.extract_strided_slice %815 {offsets = [0, 0], sizes = [2, 32], strides = [1, 1]} : vector<2x128xf32> to vector<2x32xf32>
    %cst_266 = arith.constant 0.000000e+00 : f32
    %817 = vector.broadcast %cst_266 : f32 to vector<2x32xf32>
    %818 = arith.subf %817, %816 : vector<2x32xf32>
    %819 = math.exp %818 : vector<2x32xf32>
    %cst_267 = arith.constant 1.000000e+00 : f32
    %820 = vector.broadcast %cst_267 : f32 to vector<2x32xf32>
    %821 = arith.addf %820, %819 : vector<2x32xf32>
    %cst_268 = arith.constant 1.000000e+00 : f32
    %822 = vector.broadcast %cst_268 : f32 to vector<2x32xf32>
    %823 = arith.divf %822, %821 : vector<2x32xf32>
    %824 = vector.extract_strided_slice %815 {offsets = [0, 32], sizes = [2, 32], strides = [1, 1]} : vector<2x128xf32> to vector<2x32xf32>
    %cst_269 = arith.constant 0.000000e+00 : f32
    %825 = vector.broadcast %cst_269 : f32 to vector<2x32xf32>
    %826 = arith.subf %825, %824 : vector<2x32xf32>
    %827 = math.exp %826 : vector<2x32xf32>
    %cst_270 = arith.constant 1.000000e+00 : f32
    %828 = vector.broadcast %cst_270 : f32 to vector<2x32xf32>
    %829 = arith.addf %828, %827 : vector<2x32xf32>
    %cst_271 = arith.constant 1.000000e+00 : f32
    %830 = vector.broadcast %cst_271 : f32 to vector<2x32xf32>
    %831 = arith.divf %830, %829 : vector<2x32xf32>
    %832 = vector.extract_strided_slice %815 {offsets = [0, 64], sizes = [2, 32], strides = [1, 1]} : vector<2x128xf32> to vector<2x32xf32>
    %833 = math.tanh %832 : vector<2x32xf32>
    %834 = vector.extract_strided_slice %815 {offsets = [0, 96], sizes = [2, 32], strides = [1, 1]} : vector<2x128xf32> to vector<2x32xf32>
    %cst_272 = arith.constant 0.000000e+00 : f32
    %835 = vector.broadcast %cst_272 : f32 to vector<2x32xf32>
    %836 = arith.subf %835, %834 : vector<2x32xf32>
    %837 = math.exp %836 : vector<2x32xf32>
    %cst_273 = arith.constant 1.000000e+00 : f32
    %838 = vector.broadcast %cst_273 : f32 to vector<2x32xf32>
    %839 = arith.addf %838, %837 : vector<2x32xf32>
    %cst_274 = arith.constant 1.000000e+00 : f32
    %840 = vector.broadcast %cst_274 : f32 to vector<2x32xf32>
    %841 = arith.divf %840, %839 : vector<2x32xf32>
    %842 = arith.mulf %831, %764 : vector<2x32xf32>
    %843 = arith.mulf %823, %833 : vector<2x32xf32>
    %844 = arith.addf %842, %843 : vector<2x32xf32>
    %845 = math.tanh %844 : vector<2x32xf32>
    %846 = arith.mulf %841, %845 : vector<2x32xf32>
    %847 = vector.extract_strided_slice %600 {offsets = [0, 0], sizes = [32, 128], strides = [1, 1]} : vector<64x128xf32> to vector<32x128xf32>
    %cst_275 = arith.constant dense<0.000000e+00> : vector<2x128xf32>
    %848 = tpu.matmul %275, %847, %cst_275 {dimension_numbers = #tpu.dot_dimension_numbers<[1], [0], [0], [1], [0, 0, 1, 1], [], []>} : vector<2x32xf32>, vector<32x128xf32>, vector<2x128xf32> -> vector<2x128xf32>
    %849 = vector.broadcast %602 : vector<1x128xf32> to vector<2x128xf32>
    %850 = arith.addf %849, %848 : vector<2x128xf32>
    %851 = vector.extract_strided_slice %600 {offsets = [32, 0], sizes = [32, 128], strides = [1, 1]} : vector<64x128xf32> to vector<32x128xf32>
    %cst_276 = arith.constant dense<0.000000e+00> : vector<2x128xf32>
    %852 = tpu.matmul %383, %851, %cst_276 {dimension_numbers = #tpu.dot_dimension_numbers<[1], [0], [0], [1], [0, 0, 1, 1], [], []>} : vector<2x32xf32>, vector<32x128xf32>, vector<2x128xf32> -> vector<2x128xf32>
    %853 = arith.addf %850, %852 : vector<2x128xf32>
    %cst_277 = arith.constant dense<0.000000e+00> : vector<2x128xf32>
    %854 = tpu.matmul %806, %601, %cst_277 {dimension_numbers = #tpu.dot_dimension_numbers<[1], [0], [0], [1], [0, 0, 1, 1], [], []>} : vector<2x32xf32>, vector<32x128xf32>, vector<2x128xf32> -> vector<2x128xf32>
    %855 = arith.addf %853, %854 : vector<2x128xf32>
    %856 = vector.extract_strided_slice %855 {offsets = [0, 0], sizes = [2, 32], strides = [1, 1]} : vector<2x128xf32> to vector<2x32xf32>
    %cst_278 = arith.constant 0.000000e+00 : f32
    %857 = vector.broadcast %cst_278 : f32 to vector<2x32xf32>
    %858 = arith.subf %857, %856 : vector<2x32xf32>
    %859 = math.exp %858 : vector<2x32xf32>
    %cst_279 = arith.constant 1.000000e+00 : f32
    %860 = vector.broadcast %cst_279 : f32 to vector<2x32xf32>
    %861 = arith.addf %860, %859 : vector<2x32xf32>
    %cst_280 = arith.constant 1.000000e+00 : f32
    %862 = vector.broadcast %cst_280 : f32 to vector<2x32xf32>
    %863 = arith.divf %862, %861 : vector<2x32xf32>
    %864 = vector.extract_strided_slice %855 {offsets = [0, 32], sizes = [2, 32], strides = [1, 1]} : vector<2x128xf32> to vector<2x32xf32>
    %cst_281 = arith.constant 0.000000e+00 : f32
    %865 = vector.broadcast %cst_281 : f32 to vector<2x32xf32>
    %866 = arith.subf %865, %864 : vector<2x32xf32>
    %867 = math.exp %866 : vector<2x32xf32>
    %cst_282 = arith.constant 1.000000e+00 : f32
    %868 = vector.broadcast %cst_282 : f32 to vector<2x32xf32>
    %869 = arith.addf %868, %867 : vector<2x32xf32>
    %cst_283 = arith.constant 1.000000e+00 : f32
    %870 = vector.broadcast %cst_283 : f32 to vector<2x32xf32>
    %871 = arith.divf %870, %869 : vector<2x32xf32>
    %872 = vector.extract_strided_slice %855 {offsets = [0, 64], sizes = [2, 32], strides = [1, 1]} : vector<2x128xf32> to vector<2x32xf32>
    %873 = math.tanh %872 : vector<2x32xf32>
    %874 = vector.extract_strided_slice %855 {offsets = [0, 96], sizes = [2, 32], strides = [1, 1]} : vector<2x128xf32> to vector<2x32xf32>
    %cst_284 = arith.constant 0.000000e+00 : f32
    %875 = vector.broadcast %cst_284 : f32 to vector<2x32xf32>
    %876 = arith.subf %875, %874 : vector<2x32xf32>
    %877 = math.exp %876 : vector<2x32xf32>
    %cst_285 = arith.constant 1.000000e+00 : f32
    %878 = vector.broadcast %cst_285 : f32 to vector<2x32xf32>
    %879 = arith.addf %878, %877 : vector<2x32xf32>
    %cst_286 = arith.constant 1.000000e+00 : f32
    %880 = vector.broadcast %cst_286 : f32 to vector<2x32xf32>
    %881 = arith.divf %880, %879 : vector<2x32xf32>
    %882 = arith.mulf %871, %804 : vector<2x32xf32>
    %883 = arith.mulf %863, %873 : vector<2x32xf32>
    %884 = arith.addf %882, %883 : vector<2x32xf32>
    %885 = math.tanh %884 : vector<2x32xf32>
    %886 = arith.mulf %881, %885 : vector<2x32xf32>
    %887 = vector.extract_strided_slice %603 {offsets = [0, 0], sizes = [32, 128], strides = [1, 1]} : vector<64x128xf32> to vector<32x128xf32>
    %cst_287 = arith.constant dense<0.000000e+00> : vector<2x128xf32>
    %888 = tpu.matmul %347, %887, %cst_287 {dimension_numbers = #tpu.dot_dimension_numbers<[1], [0], [0], [1], [0, 0, 1, 1], [], []>} : vector<2x32xf32>, vector<32x128xf32>, vector<2x128xf32> -> vector<2x128xf32>
    %889 = vector.broadcast %605 : vector<1x128xf32> to vector<2x128xf32>
    %890 = arith.addf %889, %888 : vector<2x128xf32>
    %891 = vector.extract_strided_slice %603 {offsets = [32, 0], sizes = [32, 128], strides = [1, 1]} : vector<64x128xf32> to vector<32x128xf32>
    %cst_288 = arith.constant dense<0.000000e+00> : vector<2x128xf32>
    %892 = tpu.matmul %311, %891, %cst_288 {dimension_numbers = #tpu.dot_dimension_numbers<[1], [0], [0], [1], [0, 0, 1, 1], [], []>} : vector<2x32xf32>, vector<32x128xf32>, vector<2x128xf32> -> vector<2x128xf32>
    %893 = arith.addf %890, %892 : vector<2x128xf32>
    %cst_289 = arith.constant dense<0.000000e+00> : vector<2x128xf32>
    %894 = tpu.matmul %846, %604, %cst_289 {dimension_numbers = #tpu.dot_dimension_numbers<[1], [0], [0], [1], [0, 0, 1, 1], [], []>} : vector<2x32xf32>, vector<32x128xf32>, vector<2x128xf32> -> vector<2x128xf32>
    %895 = arith.addf %893, %894 : vector<2x128xf32>
    %896 = vector.extract_strided_slice %895 {offsets = [0, 0], sizes = [2, 32], strides = [1, 1]} : vector<2x128xf32> to vector<2x32xf32>
    %cst_290 = arith.constant 0.000000e+00 : f32
    %897 = vector.broadcast %cst_290 : f32 to vector<2x32xf32>
    %898 = arith.subf %897, %896 : vector<2x32xf32>
    %899 = math.exp %898 : vector<2x32xf32>
    %cst_291 = arith.constant 1.000000e+00 : f32
    %900 = vector.broadcast %cst_291 : f32 to vector<2x32xf32>
    %901 = arith.addf %900, %899 : vector<2x32xf32>
    %cst_292 = arith.constant 1.000000e+00 : f32
    %902 = vector.broadcast %cst_292 : f32 to vector<2x32xf32>
    %903 = arith.divf %902, %901 : vector<2x32xf32>
    %904 = vector.extract_strided_slice %895 {offsets = [0, 32], sizes = [2, 32], strides = [1, 1]} : vector<2x128xf32> to vector<2x32xf32>
    %cst_293 = arith.constant 0.000000e+00 : f32
    %905 = vector.broadcast %cst_293 : f32 to vector<2x32xf32>
    %906 = arith.subf %905, %904 : vector<2x32xf32>
    %907 = math.exp %906 : vector<2x32xf32>
    %cst_294 = arith.constant 1.000000e+00 : f32
    %908 = vector.broadcast %cst_294 : f32 to vector<2x32xf32>
    %909 = arith.addf %908, %907 : vector<2x32xf32>
    %cst_295 = arith.constant 1.000000e+00 : f32
    %910 = vector.broadcast %cst_295 : f32 to vector<2x32xf32>
    %911 = arith.divf %910, %909 : vector<2x32xf32>
    %912 = vector.extract_strided_slice %895 {offsets = [0, 64], sizes = [2, 32], strides = [1, 1]} : vector<2x128xf32> to vector<2x32xf32>
    %913 = math.tanh %912 : vector<2x32xf32>
    %914 = vector.extract_strided_slice %895 {offsets = [0, 96], sizes = [2, 32], strides = [1, 1]} : vector<2x128xf32> to vector<2x32xf32>
    %cst_296 = arith.constant 0.000000e+00 : f32
    %915 = vector.broadcast %cst_296 : f32 to vector<2x32xf32>
    %916 = arith.subf %915, %914 : vector<2x32xf32>
    %917 = math.exp %916 : vector<2x32xf32>
    %cst_297 = arith.constant 1.000000e+00 : f32
    %918 = vector.broadcast %cst_297 : f32 to vector<2x32xf32>
    %919 = arith.addf %918, %917 : vector<2x32xf32>
    %cst_298 = arith.constant 1.000000e+00 : f32
    %920 = vector.broadcast %cst_298 : f32 to vector<2x32xf32>
    %921 = arith.divf %920, %919 : vector<2x32xf32>
    %922 = arith.mulf %911, %844 : vector<2x32xf32>
    %923 = arith.mulf %903, %913 : vector<2x32xf32>
    %924 = arith.addf %922, %923 : vector<2x32xf32>
    %925 = math.tanh %924 : vector<2x32xf32>
    %926 = arith.mulf %921, %925 : vector<2x32xf32>
    %927 = vector.extract_strided_slice %600 {offsets = [0, 0], sizes = [32, 128], strides = [1, 1]} : vector<64x128xf32> to vector<32x128xf32>
    %cst_299 = arith.constant dense<0.000000e+00> : vector<2x128xf32>
    %928 = tpu.matmul %347, %927, %cst_299 {dimension_numbers = #tpu.dot_dimension_numbers<[1], [0], [0], [1], [0, 0, 1, 1], [], []>} : vector<2x32xf32>, vector<32x128xf32>, vector<2x128xf32> -> vector<2x128xf32>
    %929 = vector.broadcast %602 : vector<1x128xf32> to vector<2x128xf32>
    %930 = arith.addf %929, %928 : vector<2x128xf32>
    %931 = vector.extract_strided_slice %600 {offsets = [32, 0], sizes = [32, 128], strides = [1, 1]} : vector<64x128xf32> to vector<32x128xf32>
    %cst_300 = arith.constant dense<0.000000e+00> : vector<2x128xf32>
    %932 = tpu.matmul %311, %931, %cst_300 {dimension_numbers = #tpu.dot_dimension_numbers<[1], [0], [0], [1], [0, 0, 1, 1], [], []>} : vector<2x32xf32>, vector<32x128xf32>, vector<2x128xf32> -> vector<2x128xf32>
    %933 = arith.addf %930, %932 : vector<2x128xf32>
    %cst_301 = arith.constant dense<0.000000e+00> : vector<2x128xf32>
    %934 = tpu.matmul %886, %601, %cst_301 {dimension_numbers = #tpu.dot_dimension_numbers<[1], [0], [0], [1], [0, 0, 1, 1], [], []>} : vector<2x32xf32>, vector<32x128xf32>, vector<2x128xf32> -> vector<2x128xf32>
    %935 = arith.addf %933, %934 : vector<2x128xf32>
    %936 = vector.extract_strided_slice %935 {offsets = [0, 0], sizes = [2, 32], strides = [1, 1]} : vector<2x128xf32> to vector<2x32xf32>
    %cst_302 = arith.constant 0.000000e+00 : f32
    %937 = vector.broadcast %cst_302 : f32 to vector<2x32xf32>
    %938 = arith.subf %937, %936 : vector<2x32xf32>
    %939 = math.exp %938 : vector<2x32xf32>
    %cst_303 = arith.constant 1.000000e+00 : f32
    %940 = vector.broadcast %cst_303 : f32 to vector<2x32xf32>
    %941 = arith.addf %940, %939 : vector<2x32xf32>
    %cst_304 = arith.constant 1.000000e+00 : f32
    %942 = vector.broadcast %cst_304 : f32 to vector<2x32xf32>
    %943 = arith.divf %942, %941 : vector<2x32xf32>
    %944 = vector.extract_strided_slice %935 {offsets = [0, 32], sizes = [2, 32], strides = [1, 1]} : vector<2x128xf32> to vector<2x32xf32>
    %cst_305 = arith.constant 0.000000e+00 : f32
    %945 = vector.broadcast %cst_305 : f32 to vector<2x32xf32>
    %946 = arith.subf %945, %944 : vector<2x32xf32>
    %947 = math.exp %946 : vector<2x32xf32>
    %cst_306 = arith.constant 1.000000e+00 : f32
    %948 = vector.broadcast %cst_306 : f32 to vector<2x32xf32>
    %949 = arith.addf %948, %947 : vector<2x32xf32>
    %cst_307 = arith.constant 1.000000e+00 : f32
    %950 = vector.broadcast %cst_307 : f32 to vector<2x32xf32>
    %951 = arith.divf %950, %949 : vector<2x32xf32>
    %952 = vector.extract_strided_slice %935 {offsets = [0, 64], sizes = [2, 32], strides = [1, 1]} : vector<2x128xf32> to vector<2x32xf32>
    %953 = math.tanh %952 : vector<2x32xf32>
    %954 = vector.extract_strided_slice %935 {offsets = [0, 96], sizes = [2, 32], strides = [1, 1]} : vector<2x128xf32> to vector<2x32xf32>
    %cst_308 = arith.constant 0.000000e+00 : f32
    %955 = vector.broadcast %cst_308 : f32 to vector<2x32xf32>
    %956 = arith.subf %955, %954 : vector<2x32xf32>
    %957 = math.exp %956 : vector<2x32xf32>
    %cst_309 = arith.constant 1.000000e+00 : f32
    %958 = vector.broadcast %cst_309 : f32 to vector<2x32xf32>
    %959 = arith.addf %958, %957 : vector<2x32xf32>
    %cst_310 = arith.constant 1.000000e+00 : f32
    %960 = vector.broadcast %cst_310 : f32 to vector<2x32xf32>
    %961 = arith.divf %960, %959 : vector<2x32xf32>
    %962 = arith.mulf %951, %884 : vector<2x32xf32>
    %963 = arith.mulf %943, %953 : vector<2x32xf32>
    %964 = arith.addf %962, %963 : vector<2x32xf32>
    %965 = math.tanh %964 : vector<2x32xf32>
    %966 = arith.mulf %961, %965 : vector<2x32xf32>
    %967 = vector.extract_strided_slice %603 {offsets = [0, 0], sizes = [32, 128], strides = [1, 1]} : vector<64x128xf32> to vector<32x128xf32>
    %cst_311 = arith.constant dense<0.000000e+00> : vector<2x128xf32>
    %968 = tpu.matmul %275, %967, %cst_311 {dimension_numbers = #tpu.dot_dimension_numbers<[1], [0], [0], [1], [0, 0, 1, 1], [], []>} : vector<2x32xf32>, vector<32x128xf32>, vector<2x128xf32> -> vector<2x128xf32>
    %969 = vector.broadcast %605 : vector<1x128xf32> to vector<2x128xf32>
    %970 = arith.addf %969, %968 : vector<2x128xf32>
    %971 = vector.extract_strided_slice %603 {offsets = [32, 0], sizes = [32, 128], strides = [1, 1]} : vector<64x128xf32> to vector<32x128xf32>
    %cst_312 = arith.constant dense<0.000000e+00> : vector<2x128xf32>
    %972 = tpu.matmul %383, %971, %cst_312 {dimension_numbers = #tpu.dot_dimension_numbers<[1], [0], [0], [1], [0, 0, 1, 1], [], []>} : vector<2x32xf32>, vector<32x128xf32>, vector<2x128xf32> -> vector<2x128xf32>
    %973 = arith.addf %970, %972 : vector<2x128xf32>
    %cst_313 = arith.constant dense<0.000000e+00> : vector<2x128xf32>
    %974 = tpu.matmul %926, %604, %cst_313 {dimension_numbers = #tpu.dot_dimension_numbers<[1], [0], [0], [1], [0, 0, 1, 1], [], []>} : vector<2x32xf32>, vector<32x128xf32>, vector<2x128xf32> -> vector<2x128xf32>
    %975 = arith.addf %973, %974 : vector<2x128xf32>
    %976 = vector.extract_strided_slice %975 {offsets = [0, 0], sizes = [2, 32], strides = [1, 1]} : vector<2x128xf32> to vector<2x32xf32>
    %cst_314 = arith.constant 0.000000e+00 : f32
    %977 = vector.broadcast %cst_314 : f32 to vector<2x32xf32>
    %978 = arith.subf %977, %976 : vector<2x32xf32>
    %979 = math.exp %978 : vector<2x32xf32>
    %cst_315 = arith.constant 1.000000e+00 : f32
    %980 = vector.broadcast %cst_315 : f32 to vector<2x32xf32>
    %981 = arith.addf %980, %979 : vector<2x32xf32>
    %cst_316 = arith.constant 1.000000e+00 : f32
    %982 = vector.broadcast %cst_316 : f32 to vector<2x32xf32>
    %983 = arith.divf %982, %981 : vector<2x32xf32>
    %984 = vector.extract_strided_slice %975 {offsets = [0, 32], sizes = [2, 32], strides = [1, 1]} : vector<2x128xf32> to vector<2x32xf32>
    %cst_317 = arith.constant 0.000000e+00 : f32
    %985 = vector.broadcast %cst_317 : f32 to vector<2x32xf32>
    %986 = arith.subf %985, %984 : vector<2x32xf32>
    %987 = math.exp %986 : vector<2x32xf32>
    %cst_318 = arith.constant 1.000000e+00 : f32
    %988 = vector.broadcast %cst_318 : f32 to vector<2x32xf32>
    %989 = arith.addf %988, %987 : vector<2x32xf32>
    %cst_319 = arith.constant 1.000000e+00 : f32
    %990 = vector.broadcast %cst_319 : f32 to vector<2x32xf32>
    %991 = arith.divf %990, %989 : vector<2x32xf32>
    %992 = vector.extract_strided_slice %975 {offsets = [0, 64], sizes = [2, 32], strides = [1, 1]} : vector<2x128xf32> to vector<2x32xf32>
    %993 = math.tanh %992 : vector<2x32xf32>
    %994 = vector.extract_strided_slice %975 {offsets = [0, 96], sizes = [2, 32], strides = [1, 1]} : vector<2x128xf32> to vector<2x32xf32>
    %cst_320 = arith.constant 0.000000e+00 : f32
    %995 = vector.broadcast %cst_320 : f32 to vector<2x32xf32>
    %996 = arith.subf %995, %994 : vector<2x32xf32>
    %997 = math.exp %996 : vector<2x32xf32>
    %cst_321 = arith.constant 1.000000e+00 : f32
    %998 = vector.broadcast %cst_321 : f32 to vector<2x32xf32>
    %999 = arith.addf %998, %997 : vector<2x32xf32>
    %cst_322 = arith.constant 1.000000e+00 : f32
    %1000 = vector.broadcast %cst_322 : f32 to vector<2x32xf32>
    %1001 = arith.divf %1000, %999 : vector<2x32xf32>
    %1002 = arith.mulf %991, %924 : vector<2x32xf32>
    %1003 = arith.mulf %983, %993 : vector<2x32xf32>
    %1004 = arith.addf %1002, %1003 : vector<2x32xf32>
    %1005 = math.tanh %1004 : vector<2x32xf32>
    %1006 = arith.mulf %1001, %1005 : vector<2x32xf32>
    %1007 = vector.extract_strided_slice %600 {offsets = [0, 0], sizes = [32, 128], strides = [1, 1]} : vector<64x128xf32> to vector<32x128xf32>
    %cst_323 = arith.constant dense<0.000000e+00> : vector<2x128xf32>
    %1008 = tpu.matmul %419, %1007, %cst_323 {dimension_numbers = #tpu.dot_dimension_numbers<[1], [0], [0], [1], [0, 0, 1, 1], [], []>} : vector<2x32xf32>, vector<32x128xf32>, vector<2x128xf32> -> vector<2x128xf32>
    %1009 = vector.broadcast %602 : vector<1x128xf32> to vector<2x128xf32>
    %1010 = arith.addf %1009, %1008 : vector<2x128xf32>
    %1011 = vector.extract_strided_slice %600 {offsets = [32, 0], sizes = [32, 128], strides = [1, 1]} : vector<64x128xf32> to vector<32x128xf32>
    %cst_324 = arith.constant dense<0.000000e+00> : vector<2x128xf32>
    %1012 = tpu.matmul %239, %1011, %cst_324 {dimension_numbers = #tpu.dot_dimension_numbers<[1], [0], [0], [1], [0, 0, 1, 1], [], []>} : vector<2x32xf32>, vector<32x128xf32>, vector<2x128xf32> -> vector<2x128xf32>
    %1013 = arith.addf %1010, %1012 : vector<2x128xf32>
    %cst_325 = arith.constant dense<0.000000e+00> : vector<2x128xf32>
    %1014 = tpu.matmul %966, %601, %cst_325 {dimension_numbers = #tpu.dot_dimension_numbers<[1], [0], [0], [1], [0, 0, 1, 1], [], []>} : vector<2x32xf32>, vector<32x128xf32>, vector<2x128xf32> -> vector<2x128xf32>
    %1015 = arith.addf %1013, %1014 : vector<2x128xf32>
    %1016 = vector.extract_strided_slice %1015 {offsets = [0, 0], sizes = [2, 32], strides = [1, 1]} : vector<2x128xf32> to vector<2x32xf32>
    %cst_326 = arith.constant 0.000000e+00 : f32
    %1017 = vector.broadcast %cst_326 : f32 to vector<2x32xf32>
    %1018 = arith.subf %1017, %1016 : vector<2x32xf32>
    %1019 = math.exp %1018 : vector<2x32xf32>
    %cst_327 = arith.constant 1.000000e+00 : f32
    %1020 = vector.broadcast %cst_327 : f32 to vector<2x32xf32>
    %1021 = arith.addf %1020, %1019 : vector<2x32xf32>
    %cst_328 = arith.constant 1.000000e+00 : f32
    %1022 = vector.broadcast %cst_328 : f32 to vector<2x32xf32>
    %1023 = arith.divf %1022, %1021 : vector<2x32xf32>
    %1024 = vector.extract_strided_slice %1015 {offsets = [0, 32], sizes = [2, 32], strides = [1, 1]} : vector<2x128xf32> to vector<2x32xf32>
    %cst_329 = arith.constant 0.000000e+00 : f32
    %1025 = vector.broadcast %cst_329 : f32 to vector<2x32xf32>
    %1026 = arith.subf %1025, %1024 : vector<2x32xf32>
    %1027 = math.exp %1026 : vector<2x32xf32>
    %cst_330 = arith.constant 1.000000e+00 : f32
    %1028 = vector.broadcast %cst_330 : f32 to vector<2x32xf32>
    %1029 = arith.addf %1028, %1027 : vector<2x32xf32>
    %cst_331 = arith.constant 1.000000e+00 : f32
    %1030 = vector.broadcast %cst_331 : f32 to vector<2x32xf32>
    %1031 = arith.divf %1030, %1029 : vector<2x32xf32>
    %1032 = vector.extract_strided_slice %1015 {offsets = [0, 64], sizes = [2, 32], strides = [1, 1]} : vector<2x128xf32> to vector<2x32xf32>
    %1033 = math.tanh %1032 : vector<2x32xf32>
    %1034 = vector.extract_strided_slice %1015 {offsets = [0, 96], sizes = [2, 32], strides = [1, 1]} : vector<2x128xf32> to vector<2x32xf32>
    %cst_332 = arith.constant 0.000000e+00 : f32
    %1035 = vector.broadcast %cst_332 : f32 to vector<2x32xf32>
    %1036 = arith.subf %1035, %1034 : vector<2x32xf32>
    %1037 = math.exp %1036 : vector<2x32xf32>
    %cst_333 = arith.constant 1.000000e+00 : f32
    %1038 = vector.broadcast %cst_333 : f32 to vector<2x32xf32>
    %1039 = arith.addf %1038, %1037 : vector<2x32xf32>
    %cst_334 = arith.constant 1.000000e+00 : f32
    %1040 = vector.broadcast %cst_334 : f32 to vector<2x32xf32>
    %1041 = arith.divf %1040, %1039 : vector<2x32xf32>
    %1042 = arith.mulf %1031, %964 : vector<2x32xf32>
    %1043 = arith.mulf %1023, %1033 : vector<2x32xf32>
    %1044 = arith.addf %1042, %1043 : vector<2x32xf32>
    %1045 = math.tanh %1044 : vector<2x32xf32>
    %1046 = arith.mulf %1041, %1045 : vector<2x32xf32>
    %1047 = vector.extract_strided_slice %603 {offsets = [0, 0], sizes = [32, 128], strides = [1, 1]} : vector<64x128xf32> to vector<32x128xf32>
    %cst_335 = arith.constant dense<0.000000e+00> : vector<2x128xf32>
    %1048 = tpu.matmul %203, %1047, %cst_335 {dimension_numbers = #tpu.dot_dimension_numbers<[1], [0], [0], [1], [0, 0, 1, 1], [], []>} : vector<2x32xf32>, vector<32x128xf32>, vector<2x128xf32> -> vector<2x128xf32>
    %1049 = vector.broadcast %605 : vector<1x128xf32> to vector<2x128xf32>
    %1050 = arith.addf %1049, %1048 : vector<2x128xf32>
    %1051 = vector.extract_strided_slice %603 {offsets = [32, 0], sizes = [32, 128], strides = [1, 1]} : vector<64x128xf32> to vector<32x128xf32>
    %cst_336 = arith.constant dense<0.000000e+00> : vector<2x128xf32>
    %1052 = tpu.matmul %455, %1051, %cst_336 {dimension_numbers = #tpu.dot_dimension_numbers<[1], [0], [0], [1], [0, 0, 1, 1], [], []>} : vector<2x32xf32>, vector<32x128xf32>, vector<2x128xf32> -> vector<2x128xf32>
    %1053 = arith.addf %1050, %1052 : vector<2x128xf32>
    %cst_337 = arith.constant dense<0.000000e+00> : vector<2x128xf32>
    %1054 = tpu.matmul %1006, %604, %cst_337 {dimension_numbers = #tpu.dot_dimension_numbers<[1], [0], [0], [1], [0, 0, 1, 1], [], []>} : vector<2x32xf32>, vector<32x128xf32>, vector<2x128xf32> -> vector<2x128xf32>
    %1055 = arith.addf %1053, %1054 : vector<2x128xf32>
    %1056 = vector.extract_strided_slice %1055 {offsets = [0, 0], sizes = [2, 32], strides = [1, 1]} : vector<2x128xf32> to vector<2x32xf32>
    %cst_338 = arith.constant 0.000000e+00 : f32
    %1057 = vector.broadcast %cst_338 : f32 to vector<2x32xf32>
    %1058 = arith.subf %1057, %1056 : vector<2x32xf32>
    %1059 = math.exp %1058 : vector<2x32xf32>
    %cst_339 = arith.constant 1.000000e+00 : f32
    %1060 = vector.broadcast %cst_339 : f32 to vector<2x32xf32>
    %1061 = arith.addf %1060, %1059 : vector<2x32xf32>
    %cst_340 = arith.constant 1.000000e+00 : f32
    %1062 = vector.broadcast %cst_340 : f32 to vector<2x32xf32>
    %1063 = arith.divf %1062, %1061 : vector<2x32xf32>
    %1064 = vector.extract_strided_slice %1055 {offsets = [0, 32], sizes = [2, 32], strides = [1, 1]} : vector<2x128xf32> to vector<2x32xf32>
    %cst_341 = arith.constant 0.000000e+00 : f32
    %1065 = vector.broadcast %cst_341 : f32 to vector<2x32xf32>
    %1066 = arith.subf %1065, %1064 : vector<2x32xf32>
    %1067 = math.exp %1066 : vector<2x32xf32>
    %cst_342 = arith.constant 1.000000e+00 : f32
    %1068 = vector.broadcast %cst_342 : f32 to vector<2x32xf32>
    %1069 = arith.addf %1068, %1067 : vector<2x32xf32>
    %cst_343 = arith.constant 1.000000e+00 : f32
    %1070 = vector.broadcast %cst_343 : f32 to vector<2x32xf32>
    %1071 = arith.divf %1070, %1069 : vector<2x32xf32>
    %1072 = vector.extract_strided_slice %1055 {offsets = [0, 64], sizes = [2, 32], strides = [1, 1]} : vector<2x128xf32> to vector<2x32xf32>
    %1073 = math.tanh %1072 : vector<2x32xf32>
    %1074 = vector.extract_strided_slice %1055 {offsets = [0, 96], sizes = [2, 32], strides = [1, 1]} : vector<2x128xf32> to vector<2x32xf32>
    %cst_344 = arith.constant 0.000000e+00 : f32
    %1075 = vector.broadcast %cst_344 : f32 to vector<2x32xf32>
    %1076 = arith.subf %1075, %1074 : vector<2x32xf32>
    %1077 = math.exp %1076 : vector<2x32xf32>
    %cst_345 = arith.constant 1.000000e+00 : f32
    %1078 = vector.broadcast %cst_345 : f32 to vector<2x32xf32>
    %1079 = arith.addf %1078, %1077 : vector<2x32xf32>
    %cst_346 = arith.constant 1.000000e+00 : f32
    %1080 = vector.broadcast %cst_346 : f32 to vector<2x32xf32>
    %1081 = arith.divf %1080, %1079 : vector<2x32xf32>
    %1082 = arith.mulf %1071, %1004 : vector<2x32xf32>
    %1083 = arith.mulf %1063, %1073 : vector<2x32xf32>
    %1084 = arith.addf %1082, %1083 : vector<2x32xf32>
    %1085 = math.tanh %1084 : vector<2x32xf32>
    %1086 = arith.mulf %1081, %1085 : vector<2x32xf32>
    %1087 = vector.extract_strided_slice %600 {offsets = [0, 0], sizes = [32, 128], strides = [1, 1]} : vector<64x128xf32> to vector<32x128xf32>
    %cst_347 = arith.constant dense<0.000000e+00> : vector<2x128xf32>
    %1088 = tpu.matmul %491, %1087, %cst_347 {dimension_numbers = #tpu.dot_dimension_numbers<[1], [0], [0], [1], [0, 0, 1, 1], [], []>} : vector<2x32xf32>, vector<32x128xf32>, vector<2x128xf32> -> vector<2x128xf32>
    %1089 = vector.broadcast %602 : vector<1x128xf32> to vector<2x128xf32>
    %1090 = arith.addf %1089, %1088 : vector<2x128xf32>
    %1091 = vector.extract_strided_slice %600 {offsets = [32, 0], sizes = [32, 128], strides = [1, 1]} : vector<64x128xf32> to vector<32x128xf32>
    %cst_348 = arith.constant dense<0.000000e+00> : vector<2x128xf32>
    %1092 = tpu.matmul %167, %1091, %cst_348 {dimension_numbers = #tpu.dot_dimension_numbers<[1], [0], [0], [1], [0, 0, 1, 1], [], []>} : vector<2x32xf32>, vector<32x128xf32>, vector<2x128xf32> -> vector<2x128xf32>
    %1093 = arith.addf %1090, %1092 : vector<2x128xf32>
    %cst_349 = arith.constant dense<0.000000e+00> : vector<2x128xf32>
    %1094 = tpu.matmul %1046, %601, %cst_349 {dimension_numbers = #tpu.dot_dimension_numbers<[1], [0], [0], [1], [0, 0, 1, 1], [], []>} : vector<2x32xf32>, vector<32x128xf32>, vector<2x128xf32> -> vector<2x128xf32>
    %1095 = arith.addf %1093, %1094 : vector<2x128xf32>
    %1096 = vector.extract_strided_slice %1095 {offsets = [0, 0], sizes = [2, 32], strides = [1, 1]} : vector<2x128xf32> to vector<2x32xf32>
    %cst_350 = arith.constant 0.000000e+00 : f32
    %1097 = vector.broadcast %cst_350 : f32 to vector<2x32xf32>
    %1098 = arith.subf %1097, %1096 : vector<2x32xf32>
    %1099 = math.exp %1098 : vector<2x32xf32>
    %cst_351 = arith.constant 1.000000e+00 : f32
    %1100 = vector.broadcast %cst_351 : f32 to vector<2x32xf32>
    %1101 = arith.addf %1100, %1099 : vector<2x32xf32>
    %cst_352 = arith.constant 1.000000e+00 : f32
    %1102 = vector.broadcast %cst_352 : f32 to vector<2x32xf32>
    %1103 = arith.divf %1102, %1101 : vector<2x32xf32>
    %1104 = vector.extract_strided_slice %1095 {offsets = [0, 32], sizes = [2, 32], strides = [1, 1]} : vector<2x128xf32> to vector<2x32xf32>
    %cst_353 = arith.constant 0.000000e+00 : f32
    %1105 = vector.broadcast %cst_353 : f32 to vector<2x32xf32>
    %1106 = arith.subf %1105, %1104 : vector<2x32xf32>
    %1107 = math.exp %1106 : vector<2x32xf32>
    %cst_354 = arith.constant 1.000000e+00 : f32
    %1108 = vector.broadcast %cst_354 : f32 to vector<2x32xf32>
    %1109 = arith.addf %1108, %1107 : vector<2x32xf32>
    %cst_355 = arith.constant 1.000000e+00 : f32
    %1110 = vector.broadcast %cst_355 : f32 to vector<2x32xf32>
    %1111 = arith.divf %1110, %1109 : vector<2x32xf32>
    %1112 = vector.extract_strided_slice %1095 {offsets = [0, 64], sizes = [2, 32], strides = [1, 1]} : vector<2x128xf32> to vector<2x32xf32>
    %1113 = math.tanh %1112 : vector<2x32xf32>
    %1114 = vector.extract_strided_slice %1095 {offsets = [0, 96], sizes = [2, 32], strides = [1, 1]} : vector<2x128xf32> to vector<2x32xf32>
    %cst_356 = arith.constant 0.000000e+00 : f32
    %1115 = vector.broadcast %cst_356 : f32 to vector<2x32xf32>
    %1116 = arith.subf %1115, %1114 : vector<2x32xf32>
    %1117 = math.exp %1116 : vector<2x32xf32>
    %cst_357 = arith.constant 1.000000e+00 : f32
    %1118 = vector.broadcast %cst_357 : f32 to vector<2x32xf32>
    %1119 = arith.addf %1118, %1117 : vector<2x32xf32>
    %cst_358 = arith.constant 1.000000e+00 : f32
    %1120 = vector.broadcast %cst_358 : f32 to vector<2x32xf32>
    %1121 = arith.divf %1120, %1119 : vector<2x32xf32>
    %1122 = arith.mulf %1111, %1044 : vector<2x32xf32>
    %1123 = arith.mulf %1103, %1113 : vector<2x32xf32>
    %1124 = arith.addf %1122, %1123 : vector<2x32xf32>
    %1125 = math.tanh %1124 : vector<2x32xf32>
    %1126 = arith.mulf %1121, %1125 : vector<2x32xf32>
    %1127 = vector.extract_strided_slice %603 {offsets = [0, 0], sizes = [32, 128], strides = [1, 1]} : vector<64x128xf32> to vector<32x128xf32>
    %cst_359 = arith.constant dense<0.000000e+00> : vector<2x128xf32>
    %1128 = tpu.matmul %131, %1127, %cst_359 {dimension_numbers = #tpu.dot_dimension_numbers<[1], [0], [0], [1], [0, 0, 1, 1], [], []>} : vector<2x32xf32>, vector<32x128xf32>, vector<2x128xf32> -> vector<2x128xf32>
    %1129 = vector.broadcast %605 : vector<1x128xf32> to vector<2x128xf32>
    %1130 = arith.addf %1129, %1128 : vector<2x128xf32>
    %1131 = vector.extract_strided_slice %603 {offsets = [32, 0], sizes = [32, 128], strides = [1, 1]} : vector<64x128xf32> to vector<32x128xf32>
    %cst_360 = arith.constant dense<0.000000e+00> : vector<2x128xf32>
    %1132 = tpu.matmul %527, %1131, %cst_360 {dimension_numbers = #tpu.dot_dimension_numbers<[1], [0], [0], [1], [0, 0, 1, 1], [], []>} : vector<2x32xf32>, vector<32x128xf32>, vector<2x128xf32> -> vector<2x128xf32>
    %1133 = arith.addf %1130, %1132 : vector<2x128xf32>
    %cst_361 = arith.constant dense<0.000000e+00> : vector<2x128xf32>
    %1134 = tpu.matmul %1086, %604, %cst_361 {dimension_numbers = #tpu.dot_dimension_numbers<[1], [0], [0], [1], [0, 0, 1, 1], [], []>} : vector<2x32xf32>, vector<32x128xf32>, vector<2x128xf32> -> vector<2x128xf32>
    %1135 = arith.addf %1133, %1134 : vector<2x128xf32>
    %1136 = vector.extract_strided_slice %1135 {offsets = [0, 0], sizes = [2, 32], strides = [1, 1]} : vector<2x128xf32> to vector<2x32xf32>
    %cst_362 = arith.constant 0.000000e+00 : f32
    %1137 = vector.broadcast %cst_362 : f32 to vector<2x32xf32>
    %1138 = arith.subf %1137, %1136 : vector<2x32xf32>
    %1139 = math.exp %1138 : vector<2x32xf32>
    %cst_363 = arith.constant 1.000000e+00 : f32
    %1140 = vector.broadcast %cst_363 : f32 to vector<2x32xf32>
    %1141 = arith.addf %1140, %1139 : vector<2x32xf32>
    %cst_364 = arith.constant 1.000000e+00 : f32
    %1142 = vector.broadcast %cst_364 : f32 to vector<2x32xf32>
    %1143 = arith.divf %1142, %1141 : vector<2x32xf32>
    %1144 = vector.extract_strided_slice %1135 {offsets = [0, 32], sizes = [2, 32], strides = [1, 1]} : vector<2x128xf32> to vector<2x32xf32>
    %cst_365 = arith.constant 0.000000e+00 : f32
    %1145 = vector.broadcast %cst_365 : f32 to vector<2x32xf32>
    %1146 = arith.subf %1145, %1144 : vector<2x32xf32>
    %1147 = math.exp %1146 : vector<2x32xf32>
    %cst_366 = arith.constant 1.000000e+00 : f32
    %1148 = vector.broadcast %cst_366 : f32 to vector<2x32xf32>
    %1149 = arith.addf %1148, %1147 : vector<2x32xf32>
    %cst_367 = arith.constant 1.000000e+00 : f32
    %1150 = vector.broadcast %cst_367 : f32 to vector<2x32xf32>
    %1151 = arith.divf %1150, %1149 : vector<2x32xf32>
    %1152 = vector.extract_strided_slice %1135 {offsets = [0, 64], sizes = [2, 32], strides = [1, 1]} : vector<2x128xf32> to vector<2x32xf32>
    %1153 = math.tanh %1152 : vector<2x32xf32>
    %1154 = vector.extract_strided_slice %1135 {offsets = [0, 96], sizes = [2, 32], strides = [1, 1]} : vector<2x128xf32> to vector<2x32xf32>
    %cst_368 = arith.constant 0.000000e+00 : f32
    %1155 = vector.broadcast %cst_368 : f32 to vector<2x32xf32>
    %1156 = arith.subf %1155, %1154 : vector<2x32xf32>
    %1157 = math.exp %1156 : vector<2x32xf32>
    %cst_369 = arith.constant 1.000000e+00 : f32
    %1158 = vector.broadcast %cst_369 : f32 to vector<2x32xf32>
    %1159 = arith.addf %1158, %1157 : vector<2x32xf32>
    %cst_370 = arith.constant 1.000000e+00 : f32
    %1160 = vector.broadcast %cst_370 : f32 to vector<2x32xf32>
    %1161 = arith.divf %1160, %1159 : vector<2x32xf32>
    %1162 = arith.mulf %1151, %1084 : vector<2x32xf32>
    %1163 = arith.mulf %1143, %1153 : vector<2x32xf32>
    %1164 = arith.addf %1162, %1163 : vector<2x32xf32>
    %1165 = math.tanh %1164 : vector<2x32xf32>
    %1166 = arith.mulf %1161, %1165 : vector<2x32xf32>
    %1167 = vector.extract_strided_slice %600 {offsets = [0, 0], sizes = [32, 128], strides = [1, 1]} : vector<64x128xf32> to vector<32x128xf32>
    %cst_371 = arith.constant dense<0.000000e+00> : vector<2x128xf32>
    %1168 = tpu.matmul %563, %1167, %cst_371 {dimension_numbers = #tpu.dot_dimension_numbers<[1], [0], [0], [1], [0, 0, 1, 1], [], []>} : vector<2x32xf32>, vector<32x128xf32>, vector<2x128xf32> -> vector<2x128xf32>
    %1169 = vector.broadcast %602 : vector<1x128xf32> to vector<2x128xf32>
    %1170 = arith.addf %1169, %1168 : vector<2x128xf32>
    %1171 = vector.extract_strided_slice %600 {offsets = [32, 0], sizes = [32, 128], strides = [1, 1]} : vector<64x128xf32> to vector<32x128xf32>
    %cst_372 = arith.constant dense<0.000000e+00> : vector<2x128xf32>
    %1172 = tpu.matmul %95, %1171, %cst_372 {dimension_numbers = #tpu.dot_dimension_numbers<[1], [0], [0], [1], [0, 0, 1, 1], [], []>} : vector<2x32xf32>, vector<32x128xf32>, vector<2x128xf32> -> vector<2x128xf32>
    %1173 = arith.addf %1170, %1172 : vector<2x128xf32>
    %cst_373 = arith.constant dense<0.000000e+00> : vector<2x128xf32>
    %1174 = tpu.matmul %1126, %601, %cst_373 {dimension_numbers = #tpu.dot_dimension_numbers<[1], [0], [0], [1], [0, 0, 1, 1], [], []>} : vector<2x32xf32>, vector<32x128xf32>, vector<2x128xf32> -> vector<2x128xf32>
    %1175 = arith.addf %1173, %1174 : vector<2x128xf32>
    %1176 = vector.extract_strided_slice %1175 {offsets = [0, 0], sizes = [2, 32], strides = [1, 1]} : vector<2x128xf32> to vector<2x32xf32>
    %cst_374 = arith.constant 0.000000e+00 : f32
    %1177 = vector.broadcast %cst_374 : f32 to vector<2x32xf32>
    %1178 = arith.subf %1177, %1176 : vector<2x32xf32>
    %1179 = math.exp %1178 : vector<2x32xf32>
    %cst_375 = arith.constant 1.000000e+00 : f32
    %1180 = vector.broadcast %cst_375 : f32 to vector<2x32xf32>
    %1181 = arith.addf %1180, %1179 : vector<2x32xf32>
    %cst_376 = arith.constant 1.000000e+00 : f32
    %1182 = vector.broadcast %cst_376 : f32 to vector<2x32xf32>
    %1183 = arith.divf %1182, %1181 : vector<2x32xf32>
    %1184 = vector.extract_strided_slice %1175 {offsets = [0, 32], sizes = [2, 32], strides = [1, 1]} : vector<2x128xf32> to vector<2x32xf32>
    %cst_377 = arith.constant 0.000000e+00 : f32
    %1185 = vector.broadcast %cst_377 : f32 to vector<2x32xf32>
    %1186 = arith.subf %1185, %1184 : vector<2x32xf32>
    %1187 = math.exp %1186 : vector<2x32xf32>
    %cst_378 = arith.constant 1.000000e+00 : f32
    %1188 = vector.broadcast %cst_378 : f32 to vector<2x32xf32>
    %1189 = arith.addf %1188, %1187 : vector<2x32xf32>
    %cst_379 = arith.constant 1.000000e+00 : f32
    %1190 = vector.broadcast %cst_379 : f32 to vector<2x32xf32>
    %1191 = arith.divf %1190, %1189 : vector<2x32xf32>
    %1192 = vector.extract_strided_slice %1175 {offsets = [0, 64], sizes = [2, 32], strides = [1, 1]} : vector<2x128xf32> to vector<2x32xf32>
    %1193 = math.tanh %1192 : vector<2x32xf32>
    %1194 = vector.extract_strided_slice %1175 {offsets = [0, 96], sizes = [2, 32], strides = [1, 1]} : vector<2x128xf32> to vector<2x32xf32>
    %cst_380 = arith.constant 0.000000e+00 : f32
    %1195 = vector.broadcast %cst_380 : f32 to vector<2x32xf32>
    %1196 = arith.subf %1195, %1194 : vector<2x32xf32>
    %1197 = math.exp %1196 : vector<2x32xf32>
    %cst_381 = arith.constant 1.000000e+00 : f32
    %1198 = vector.broadcast %cst_381 : f32 to vector<2x32xf32>
    %1199 = arith.addf %1198, %1197 : vector<2x32xf32>
    %cst_382 = arith.constant 1.000000e+00 : f32
    %1200 = vector.broadcast %cst_382 : f32 to vector<2x32xf32>
    %1201 = arith.divf %1200, %1199 : vector<2x32xf32>
    %1202 = arith.mulf %1191, %1124 : vector<2x32xf32>
    %1203 = arith.mulf %1183, %1193 : vector<2x32xf32>
    %1204 = arith.addf %1202, %1203 : vector<2x32xf32>
    %1205 = math.tanh %1204 : vector<2x32xf32>
    %1206 = arith.mulf %1201, %1205 : vector<2x32xf32>
    %1207 = vector.extract_strided_slice %603 {offsets = [0, 0], sizes = [32, 128], strides = [1, 1]} : vector<64x128xf32> to vector<32x128xf32>
    %cst_383 = arith.constant dense<0.000000e+00> : vector<2x128xf32>
    %1208 = tpu.matmul %59, %1207, %cst_383 {dimension_numbers = #tpu.dot_dimension_numbers<[1], [0], [0], [1], [0, 0, 1, 1], [], []>} : vector<2x32xf32>, vector<32x128xf32>, vector<2x128xf32> -> vector<2x128xf32>
    %1209 = vector.broadcast %605 : vector<1x128xf32> to vector<2x128xf32>
    %1210 = arith.addf %1209, %1208 : vector<2x128xf32>
    %1211 = vector.extract_strided_slice %603 {offsets = [32, 0], sizes = [32, 128], strides = [1, 1]} : vector<64x128xf32> to vector<32x128xf32>
    %cst_384 = arith.constant dense<0.000000e+00> : vector<2x128xf32>
    %1212 = tpu.matmul %599, %1211, %cst_384 {dimension_numbers = #tpu.dot_dimension_numbers<[1], [0], [0], [1], [0, 0, 1, 1], [], []>} : vector<2x32xf32>, vector<32x128xf32>, vector<2x128xf32> -> vector<2x128xf32>
    %1213 = arith.addf %1210, %1212 : vector<2x128xf32>
    %cst_385 = arith.constant dense<0.000000e+00> : vector<2x128xf32>
    %1214 = tpu.matmul %1166, %604, %cst_385 {dimension_numbers = #tpu.dot_dimension_numbers<[1], [0], [0], [1], [0, 0, 1, 1], [], []>} : vector<2x32xf32>, vector<32x128xf32>, vector<2x128xf32> -> vector<2x128xf32>
    %1215 = arith.addf %1213, %1214 : vector<2x128xf32>
    %1216 = vector.extract_strided_slice %1215 {offsets = [0, 0], sizes = [2, 32], strides = [1, 1]} : vector<2x128xf32> to vector<2x32xf32>
    %cst_386 = arith.constant 0.000000e+00 : f32
    %1217 = vector.broadcast %cst_386 : f32 to vector<2x32xf32>
    %1218 = arith.subf %1217, %1216 : vector<2x32xf32>
    %1219 = math.exp %1218 : vector<2x32xf32>
    %cst_387 = arith.constant 1.000000e+00 : f32
    %1220 = vector.broadcast %cst_387 : f32 to vector<2x32xf32>
    %1221 = arith.addf %1220, %1219 : vector<2x32xf32>
    %cst_388 = arith.constant 1.000000e+00 : f32
    %1222 = vector.broadcast %cst_388 : f32 to vector<2x32xf32>
    %1223 = arith.divf %1222, %1221 : vector<2x32xf32>
    %1224 = vector.extract_strided_slice %1215 {offsets = [0, 32], sizes = [2, 32], strides = [1, 1]} : vector<2x128xf32> to vector<2x32xf32>
    %cst_389 = arith.constant 0.000000e+00 : f32
    %1225 = vector.broadcast %cst_389 : f32 to vector<2x32xf32>
    %1226 = arith.subf %1225, %1224 : vector<2x32xf32>
    %1227 = math.exp %1226 : vector<2x32xf32>
    %cst_390 = arith.constant 1.000000e+00 : f32
    %1228 = vector.broadcast %cst_390 : f32 to vector<2x32xf32>
    %1229 = arith.addf %1228, %1227 : vector<2x32xf32>
    %cst_391 = arith.constant 1.000000e+00 : f32
    %1230 = vector.broadcast %cst_391 : f32 to vector<2x32xf32>
    %1231 = arith.divf %1230, %1229 : vector<2x32xf32>
    %1232 = vector.extract_strided_slice %1215 {offsets = [0, 64], sizes = [2, 32], strides = [1, 1]} : vector<2x128xf32> to vector<2x32xf32>
    %1233 = math.tanh %1232 : vector<2x32xf32>
    %1234 = vector.extract_strided_slice %1215 {offsets = [0, 96], sizes = [2, 32], strides = [1, 1]} : vector<2x128xf32> to vector<2x32xf32>
    %cst_392 = arith.constant 0.000000e+00 : f32
    %1235 = vector.broadcast %cst_392 : f32 to vector<2x32xf32>
    %1236 = arith.subf %1235, %1234 : vector<2x32xf32>
    %1237 = math.exp %1236 : vector<2x32xf32>
    %cst_393 = arith.constant 1.000000e+00 : f32
    %1238 = vector.broadcast %cst_393 : f32 to vector<2x32xf32>
    %1239 = arith.addf %1238, %1237 : vector<2x32xf32>
    %cst_394 = arith.constant 1.000000e+00 : f32
    %1240 = vector.broadcast %cst_394 : f32 to vector<2x32xf32>
    %1241 = arith.divf %1240, %1239 : vector<2x32xf32>
    %1242 = arith.mulf %1231, %1164 : vector<2x32xf32>
    %1243 = arith.mulf %1223, %1233 : vector<2x32xf32>
    %1244 = arith.addf %1242, %1243 : vector<2x32xf32>
    %1245 = math.tanh %1244 : vector<2x32xf32>
    %1246 = arith.mulf %1241, %1245 : vector<2x32xf32>
    %c0_395 = arith.constant 0 : index
    %c0_396 = arith.constant 0 : index
    %1247 = vector.load %arg15[%c0_395, %c0_396] : memref<1x256xf32, #tpu.memory_space<vmem>>, vector<1x256xf32>
    %c0_397 = arith.constant 0 : index
    %c0_398 = arith.constant 0 : index
    %1248 = vector.load %arg14[%c0_397, %c0_398] : memref<512x256xf32, #tpu.memory_space<vmem>>, vector<32x256xf32>
    %cst_399 = arith.constant dense<0.000000e+00> : vector<2x256xf32>
    %1249 = tpu.matmul %646, %1248, %cst_399 {dimension_numbers = #tpu.dot_dimension_numbers<[1], [0], [0], [1], [0, 0, 1, 1], [], []>} : vector<2x32xf32>, vector<32x256xf32>, vector<2x256xf32> -> vector<2x256xf32>
    %1250 = vector.broadcast %1247 : vector<1x256xf32> to vector<2x256xf32>
    %1251 = arith.addf %1250, %1249 : vector<2x256xf32>
    %c32 = arith.constant 32 : index
    %c0_400 = arith.constant 0 : index
    %1252 = vector.load %arg14[%c32, %c0_400] : memref<512x256xf32, #tpu.memory_space<vmem>>, vector<32x256xf32>
    %cst_401 = arith.constant dense<0.000000e+00> : vector<2x256xf32>
    %1253 = tpu.matmul %1246, %1252, %cst_401 {dimension_numbers = #tpu.dot_dimension_numbers<[1], [0], [0], [1], [0, 0, 1, 1], [], []>} : vector<2x32xf32>, vector<32x256xf32>, vector<2x256xf32> -> vector<2x256xf32>
    %1254 = arith.addf %1251, %1253 : vector<2x256xf32>
    %c64 = arith.constant 64 : index
    %c0_402 = arith.constant 0 : index
    %1255 = vector.load %arg14[%c64, %c0_402] : memref<512x256xf32, #tpu.memory_space<vmem>>, vector<32x256xf32>
    %cst_403 = arith.constant dense<0.000000e+00> : vector<2x256xf32>
    %1256 = tpu.matmul %726, %1255, %cst_403 {dimension_numbers = #tpu.dot_dimension_numbers<[1], [0], [0], [1], [0, 0, 1, 1], [], []>} : vector<2x32xf32>, vector<32x256xf32>, vector<2x256xf32> -> vector<2x256xf32>
    %1257 = arith.addf %1254, %1256 : vector<2x256xf32>
    %c96 = arith.constant 96 : index
    %c0_404 = arith.constant 0 : index
    %1258 = vector.load %arg14[%c96, %c0_404] : memref<512x256xf32, #tpu.memory_space<vmem>>, vector<32x256xf32>
    %cst_405 = arith.constant dense<0.000000e+00> : vector<2x256xf32>
    %1259 = tpu.matmul %1166, %1258, %cst_405 {dimension_numbers = #tpu.dot_dimension_numbers<[1], [0], [0], [1], [0, 0, 1, 1], [], []>} : vector<2x32xf32>, vector<32x256xf32>, vector<2x256xf32> -> vector<2x256xf32>
    %1260 = arith.addf %1257, %1259 : vector<2x256xf32>
    %c128 = arith.constant 128 : index
    %c0_406 = arith.constant 0 : index
    %1261 = vector.load %arg14[%c128, %c0_406] : memref<512x256xf32, #tpu.memory_space<vmem>>, vector<32x256xf32>
    %cst_407 = arith.constant dense<0.000000e+00> : vector<2x256xf32>
    %1262 = tpu.matmul %806, %1261, %cst_407 {dimension_numbers = #tpu.dot_dimension_numbers<[1], [0], [0], [1], [0, 0, 1, 1], [], []>} : vector<2x32xf32>, vector<32x256xf32>, vector<2x256xf32> -> vector<2x256xf32>
    %1263 = arith.addf %1260, %1262 : vector<2x256xf32>
    %c160 = arith.constant 160 : index
    %c0_408 = arith.constant 0 : index
    %1264 = vector.load %arg14[%c160, %c0_408] : memref<512x256xf32, #tpu.memory_space<vmem>>, vector<32x256xf32>
    %cst_409 = arith.constant dense<0.000000e+00> : vector<2x256xf32>
    %1265 = tpu.matmul %1086, %1264, %cst_409 {dimension_numbers = #tpu.dot_dimension_numbers<[1], [0], [0], [1], [0, 0, 1, 1], [], []>} : vector<2x32xf32>, vector<32x256xf32>, vector<2x256xf32> -> vector<2x256xf32>
    %1266 = arith.addf %1263, %1265 : vector<2x256xf32>
    %c192 = arith.constant 192 : index
    %c0_410 = arith.constant 0 : index
    %1267 = vector.load %arg14[%c192, %c0_410] : memref<512x256xf32, #tpu.memory_space<vmem>>, vector<32x256xf32>
    %cst_411 = arith.constant dense<0.000000e+00> : vector<2x256xf32>
    %1268 = tpu.matmul %886, %1267, %cst_411 {dimension_numbers = #tpu.dot_dimension_numbers<[1], [0], [0], [1], [0, 0, 1, 1], [], []>} : vector<2x32xf32>, vector<32x256xf32>, vector<2x256xf32> -> vector<2x256xf32>
    %1269 = arith.addf %1266, %1268 : vector<2x256xf32>
    %c224 = arith.constant 224 : index
    %c0_412 = arith.constant 0 : index
    %1270 = vector.load %arg14[%c224, %c0_412] : memref<512x256xf32, #tpu.memory_space<vmem>>, vector<32x256xf32>
    %cst_413 = arith.constant dense<0.000000e+00> : vector<2x256xf32>
    %1271 = tpu.matmul %1006, %1270, %cst_413 {dimension_numbers = #tpu.dot_dimension_numbers<[1], [0], [0], [1], [0, 0, 1, 1], [], []>} : vector<2x32xf32>, vector<32x256xf32>, vector<2x256xf32> -> vector<2x256xf32>
    %1272 = arith.addf %1269, %1271 : vector<2x256xf32>
    %c256 = arith.constant 256 : index
    %c0_414 = arith.constant 0 : index
    %1273 = vector.load %arg14[%c256, %c0_414] : memref<512x256xf32, #tpu.memory_space<vmem>>, vector<32x256xf32>
    %cst_415 = arith.constant dense<0.000000e+00> : vector<2x256xf32>
    %1274 = tpu.matmul %966, %1273, %cst_415 {dimension_numbers = #tpu.dot_dimension_numbers<[1], [0], [0], [1], [0, 0, 1, 1], [], []>} : vector<2x32xf32>, vector<32x256xf32>, vector<2x256xf32> -> vector<2x256xf32>
    %1275 = arith.addf %1272, %1274 : vector<2x256xf32>
    %c288 = arith.constant 288 : index
    %c0_416 = arith.constant 0 : index
    %1276 = vector.load %arg14[%c288, %c0_416] : memref<512x256xf32, #tpu.memory_space<vmem>>, vector<32x256xf32>
    %cst_417 = arith.constant dense<0.000000e+00> : vector<2x256xf32>
    %1277 = tpu.matmul %926, %1276, %cst_417 {dimension_numbers = #tpu.dot_dimension_numbers<[1], [0], [0], [1], [0, 0, 1, 1], [], []>} : vector<2x32xf32>, vector<32x256xf32>, vector<2x256xf32> -> vector<2x256xf32>
    %1278 = arith.addf %1275, %1277 : vector<2x256xf32>
    %c320 = arith.constant 320 : index
    %c0_418 = arith.constant 0 : index
    %1279 = vector.load %arg14[%c320, %c0_418] : memref<512x256xf32, #tpu.memory_space<vmem>>, vector<32x256xf32>
    %cst_419 = arith.constant dense<0.000000e+00> : vector<2x256xf32>
    %1280 = tpu.matmul %1046, %1279, %cst_419 {dimension_numbers = #tpu.dot_dimension_numbers<[1], [0], [0], [1], [0, 0, 1, 1], [], []>} : vector<2x32xf32>, vector<32x256xf32>, vector<2x256xf32> -> vector<2x256xf32>
    %1281 = arith.addf %1278, %1280 : vector<2x256xf32>
    %c352 = arith.constant 352 : index
    %c0_420 = arith.constant 0 : index
    %1282 = vector.load %arg14[%c352, %c0_420] : memref<512x256xf32, #tpu.memory_space<vmem>>, vector<32x256xf32>
    %cst_421 = arith.constant dense<0.000000e+00> : vector<2x256xf32>
    %1283 = tpu.matmul %846, %1282, %cst_421 {dimension_numbers = #tpu.dot_dimension_numbers<[1], [0], [0], [1], [0, 0, 1, 1], [], []>} : vector<2x32xf32>, vector<32x256xf32>, vector<2x256xf32> -> vector<2x256xf32>
    %1284 = arith.addf %1281, %1283 : vector<2x256xf32>
    %c384 = arith.constant 384 : index
    %c0_422 = arith.constant 0 : index
    %1285 = vector.load %arg14[%c384, %c0_422] : memref<512x256xf32, #tpu.memory_space<vmem>>, vector<32x256xf32>
    %cst_423 = arith.constant dense<0.000000e+00> : vector<2x256xf32>
    %1286 = tpu.matmul %1126, %1285, %cst_423 {dimension_numbers = #tpu.dot_dimension_numbers<[1], [0], [0], [1], [0, 0, 1, 1], [], []>} : vector<2x32xf32>, vector<32x256xf32>, vector<2x256xf32> -> vector<2x256xf32>
    %1287 = arith.addf %1284, %1286 : vector<2x256xf32>
    %c416 = arith.constant 416 : index
    %c0_424 = arith.constant 0 : index
    %1288 = vector.load %arg14[%c416, %c0_424] : memref<512x256xf32, #tpu.memory_space<vmem>>, vector<32x256xf32>
    %cst_425 = arith.constant dense<0.000000e+00> : vector<2x256xf32>
    %1289 = tpu.matmul %766, %1288, %cst_425 {dimension_numbers = #tpu.dot_dimension_numbers<[1], [0], [0], [1], [0, 0, 1, 1], [], []>} : vector<2x32xf32>, vector<32x256xf32>, vector<2x256xf32> -> vector<2x256xf32>
    %1290 = arith.addf %1287, %1289 : vector<2x256xf32>
    %c448 = arith.constant 448 : index
    %c0_426 = arith.constant 0 : index
    %1291 = vector.load %arg14[%c448, %c0_426] : memref<512x256xf32, #tpu.memory_space<vmem>>, vector<32x256xf32>
    %cst_427 = arith.constant dense<0.000000e+00> : vector<2x256xf32>
    %1292 = tpu.matmul %1206, %1291, %cst_427 {dimension_numbers = #tpu.dot_dimension_numbers<[1], [0], [0], [1], [0, 0, 1, 1], [], []>} : vector<2x32xf32>, vector<32x256xf32>, vector<2x256xf32> -> vector<2x256xf32>
    %1293 = arith.addf %1290, %1292 : vector<2x256xf32>
    %c480 = arith.constant 480 : index
    %c0_428 = arith.constant 0 : index
    %1294 = vector.load %arg14[%c480, %c0_428] : memref<512x256xf32, #tpu.memory_space<vmem>>, vector<32x256xf32>
    %cst_429 = arith.constant dense<0.000000e+00> : vector<2x256xf32>
    %1295 = tpu.matmul %686, %1294, %cst_429 {dimension_numbers = #tpu.dot_dimension_numbers<[1], [0], [0], [1], [0, 0, 1, 1], [], []>} : vector<2x32xf32>, vector<32x256xf32>, vector<2x256xf32> -> vector<2x256xf32>
    %1296 = arith.addf %1293, %1295 : vector<2x256xf32>
    %cst_430 = arith.constant 0.000000e+00 : f32
    %1297 = vector.broadcast %cst_430 : f32 to vector<2x256xf32>
    %1298 = arith.maximumf %1296, %1297 : vector<2x256xf32>
    %c0_431 = arith.constant 0 : index
    %c0_432 = arith.constant 0 : index
    %1299 = vector.load %arg16[%c0_431, %c0_432] : memref<256x8xf32, #tpu.memory_space<vmem>>, vector<256x8xf32>
    %cst_433 = arith.constant dense<0.000000e+00> : vector<2x8xf32>
    %1300 = tpu.matmul %1298, %1299, %cst_433 {dimension_numbers = #tpu.dot_dimension_numbers<[1], [0], [0], [1], [0, 0, 1, 1], [], []>} : vector<2x256xf32>, vector<256x8xf32>, vector<2x8xf32> -> vector<2x8xf32>
    %c0_434 = arith.constant 0 : index
    %c0_435 = arith.constant 0 : index
    %1301 = vector.load %arg17[%c0_434, %c0_435] : memref<1x8xf32, #tpu.memory_space<vmem>>, vector<1x8xf32>
    %1302 = vector.broadcast %1301 : vector<1x8xf32> to vector<2x8xf32>
    %1303 = arith.addf %1300, %1302 : vector<2x8xf32>
    %cst_436 = arith.constant 0.000000e+00 : f32
    %1304 = vector.broadcast %cst_436 : f32 to vector<2x8xf32>
    %1305 = arith.maximumf %1303, %1304 : vector<2x8xf32>
    %c0_437 = arith.constant 0 : index
    %c0_438 = arith.constant 0 : index
    %1306 = vector.load %arg18[%c0_437, %c0_438] : memref<2x8xf32, #tpu.memory_space<vmem>>, vector<2x8xf32>
    tpu.vector_store %arg18[%c0_437, %c0_438], %1305 {strides = array<i32>} : memref<2x8xf32, #tpu.memory_space<vmem>>, vector<2x8xf32>,
    return
  }
  func.func @transform_0(%arg0: i32) -> (i32, i32, i32) {
    %c0_i32 = arith.constant 0 : i32
    %c0_i32_0 = arith.constant 0 : i32
    %c0_i32_1 = arith.constant 0 : i32
    %c0_i32_2 = arith.constant 0 : i32
    return %c0_i32, %c0_i32_0, %c0_i32_1 : i32, i32, i32
  }
  func.func @transform_1(%arg0: i32) -> (i32, i32) {
    %c0_i32 = arith.constant 0 : i32
    %c0_i32_0 = arith.constant 0 : i32
    %c0_i32_1 = arith.constant 0 : i32
    return %c0_i32, %c0_i32_0 : i32, i32
  }
  func.func @transform_2(%arg0: i32) -> (i32, i32) {
    %c0_i32 = arith.constant 0 : i32
    %c0_i32_0 = arith.constant 0 : i32
    %c0_i32_1 = arith.constant 0 : i32
    return %c0_i32, %c0_i32_0 : i32, i32
  }
  func.func @transform_3(%arg0: i32) -> (i32, i32) {
    %c0_i32 = arith.constant 0 : i32
    %c0_i32_0 = arith.constant 0 : i32
    %c0_i32_1 = arith.constant 0 : i32
    return %c0_i32, %c0_i32_0 : i32, i32
  }
  func.func @transform_4(%arg0: i32) -> (i32, i32) {
    %c0_i32 = arith.constant 0 : i32
    %c0_i32_0 = arith.constant 0 : i32
    %c0_i32_1 = arith.constant 0 : i32
    return %c0_i32, %c0_i32_0 : i32, i32
  }
  func.func @transform_5(%arg0: i32) -> (i32, i32) {
    %c0_i32 = arith.constant 0 : i32
    %c0_i32_0 = arith.constant 0 : i32
    %c0_i32_1 = arith.constant 0 : i32
    return %c0_i32, %c0_i32_0 : i32, i32
  }
  func.func @transform_6(%arg0: i32) -> (i32, i32) {
    %c0_i32 = arith.constant 0 : i32
    %c0_i32_0 = arith.constant 0 : i32
    %c0_i32_1 = arith.constant 0 : i32
    return %c0_i32, %c0_i32_0 : i32, i32
  }
  func.func @transform_7(%arg0: i32) -> (i32, i32) {
    %c0_i32 = arith.constant 0 : i32
    %c0_i32_0 = arith.constant 0 : i32
    %c0_i32_1 = arith.constant 0 : i32
    return %c0_i32, %c0_i32_0 : i32, i32
  }
  func.func @transform_8(%arg0: i32) -> (i32, i32) {
    %c0_i32 = arith.constant 0 : i32
    %c0_i32_0 = arith.constant 0 : i32
    %c0_i32_1 = arith.constant 0 : i32
    return %c0_i32, %c0_i32_0 : i32, i32
  }
  func.func @transform_9(%arg0: i32) -> (i32, i32) {
    %c0_i32 = arith.constant 0 : i32
    %c0_i32_0 = arith.constant 0 : i32
    %c0_i32_1 = arith.constant 0 : i32
    return %c0_i32, %c0_i32_0 : i32, i32
  }
  func.func @transform_10(%arg0: i32) -> (i32, i32) {
    %c0_i32 = arith.constant 0 : i32
    %c0_i32_0 = arith.constant 0 : i32
    %c0_i32_1 = arith.constant 0 : i32
    return %c0_i32, %c0_i32_0 : i32, i32
  }
  func.func @transform_11(%arg0: i32) -> (i32, i32) {
    %c0_i32 = arith.constant 0 : i32
    %c0_i32_0 = arith.constant 0 : i32
    %c0_i32_1 = arith.constant 0 : i32
    return %c0_i32, %c0_i32_0 : i32, i32
  }
  func.func @transform_12(%arg0: i32) -> (i32, i32) {
    %c0_i32 = arith.constant 0 : i32
    %c0_i32_0 = arith.constant 0 : i32
    %c0_i32_1 = arith.constant 0 : i32
    return %c0_i32, %c0_i32_0 : i32, i32
  }
  func.func @transform_13(%arg0: i32) -> (i32, i32) {
    %c0_i32 = arith.constant 0 : i32
    %c0_i32_0 = arith.constant 0 : i32
    %c0_i32_1 = arith.constant 0 : i32
    return %c0_i32, %c0_i32_0 : i32, i32
  }
  func.func @transform_14(%arg0: i32) -> (i32, i32) {
    %c0_i32 = arith.constant 0 : i32
    %c0_i32_0 = arith.constant 0 : i32
    %c0_i32_1 = arith.constant 0 : i32
    return %c0_i32, %c0_i32_0 : i32, i32
  }
  func.func @transform_15(%arg0: i32) -> (i32, i32) {
    %c0_i32 = arith.constant 0 : i32
    %c0_i32_0 = arith.constant 0 : i32
    %c0_i32_1 = arith.constant 0 : i32
    return %c0_i32, %c0_i32_0 : i32, i32
  }
  func.func @transform_16(%arg0: i32) -> (i32, i32) {
    %c0_i32 = arith.constant 0 : i32
    %c0_i32_0 = arith.constant 0 : i32
    %c0_i32_1 = arith.constant 0 : i32
    return %c0_i32, %c0_i32_0 : i32, i32
  }
  func.func @transform_17(%arg0: i32) -> (i32, i32) {
    %c0_i32 = arith.constant 0 : i32
    %c0_i32_0 = arith.constant 0 : i32
    %c0_i32_1 = arith.constant 0 : i32
    return %c0_i32, %c0_i32_0 : i32, i32
  }
}

</mosaic_0001>

<bundles_post_ra>
// kernel: tpu_custom_call.1
= control target key start
LH: loop header
LB: loop body
LE: loop exit
PB: predicated region body
PF: predicated region fallthrough
CT: control target
= control target key end

     0   :  { %s12460_s0 = inlined_call_operand.hbm [shape: f32[2,8,32], index: 0, kind: input, shape index: {}]   ;;  %s12461_s1 = inlined_call_operand.vmem [shape: f32[32,128], index: 1, kind: input, shape index: {}]   ;;  %s12462_s2 = inlined_call_operand.vmem [shape: f32[32,128], index: 2, kind: input, shape index: {}]   ;;  %s12463_s3 = inlined_call_operand.hbm [shape: f32[1,128], index: 3, kind: input, shape index: {}]   ;;  %s12464_s4 = inlined_call_operand.vmem [shape: f32[32,128], index: 4, kind: input, shape index: {}]   ;;  %s12465_s5 = inlined_call_operand.vmem [shape: f32[32,128], index: 5, kind: input, shape index: {}]   ;;  %s12466_s6 = inlined_call_operand.hbm [shape: f32[1,128], index: 6, kind: input, shape index: {}]   ;;  %s12467_s7 = inlined_call_operand.vmem [shape: f32[64,128], index: 7, kind: input, shape index: {}]   ;;  %s12468_s8 = inlined_call_operand.vmem [shape: f32[32,128], index: 8, kind: input, shape index: {}]   ;;  %s12469_s9 = inlined_call_operand.hbm [shape: f32[1,128], index: 9, kind: input, shape index: {}]   ;;  %s12470_s10 = inlined_call_operand.vmem [shape: f32[64,128], index: 10, kind: input, shape index: {}]   ;;  %s12471_s11 = inlined_call_operand.hbm [shape: f32[32,128], index: 11, kind: input, shape index: {}]   ;;  %s12472_s12 = inlined_call_operand.vmem [shape: f32[1,128], index: 12, kind: input, shape index: {}]   ;;  %s12473_s13 = inlined_call_operand.hbm [shape: f32[512,256], index: 13, kind: input, shape index: {}]   ;;  %s12474_s14 = inlined_call_operand.vmem [shape: f32[1,256], index: 14, kind: input, shape index: {}]   ;;  %s12475_s15 = inlined_call_operand.vmem [shape: f32[256,8], index: 15, kind: input, shape index: {}]   ;;  %s12476_s16 = inlined_call_operand.vmem [shape: f32[1,8], index: 16, kind: input, shape index: {}]   ;;  %s12477_s17 = inlined_call_operand.hbm [shape: f32[2,8], index: 17, kind: output, shape index: {}]  }
   0x1   :  { %12480 = sst [smem:[#allocation19_spill]] %s12460_s0 }
   0x2   :  { %12481 = sst [smem:[#allocation20_spill]] %s12461_s1 }
   0x3   :  { %22 = vsyncpa [#allocation3], 0 }
   0x4   :  { %23 = vsyncpa [#allocation6], 0 }
   0x5   :  { %24 = vsyncpa [#allocation9], 0 }
   0x6   :  { %25 = vsyncpa [#allocation12], 0 }
   0x7   :  { %26 = vsyncpa [#allocation4], 0  ;;  %s10948_s24 = smov [#allocation5]   ;;  %s10949_s26 = smov [#allocation8]  }
   0x8   :  { %s49_s25 = sshll.u32 %s10948_s24, 4  ;;  %s77_s27 = sshll.u32 %s10949_s26, 4  ;;  %s50_s25 = int_to_ptr.vmem [resolvable:$true] %s49_s25  ;;  %s78_s27 = int_to_ptr.vmem [resolvable:$true] %s77_s27 }
   0x9   :  { %s10784_s0 = scalar_lea.hbm %s12463_s3, 16 }
   0xa   :  { %p10785_p0 = scmp.ne.s32.totalorder %s12463_s3, %s10784_s0  ;;  %p10788_p1 = scmp.lt.u32.totalorder %s10784_s0, %s12463_s3 }
   0xc   :  { %p10790_p2 = pnand %p10788_p1, %p10785_p0 }
   0xe   :  { %10793 = shalt.err (!%p10790_p2)
}
   0xf   :  { %s10794_s20 = scalar_lea.vmem %s50_s25, 16  ;;  %s10798_s21 = scalar_lea.vmem %s50_s25, 32 }
  0x10   :  { %p10795_p3 = scmp.ne.s32.totalorder %s50_s25, %s10794_s20  ;;  %p10799_p4 = scmp.lt.s32.totalorder %s50_s25, %s50_s25 }
  0x11   :  { %p10800_p5 = scmp.lt.s32.totalorder %s10798_s21, %s10794_s20 }
  0x13   :  { %p10801_p6 = por %p10800_p5, %p10799_p4 }
  0x15   :  { %p10802_p7 = pnand %p10801_p6, %p10795_p3 }
  0x17   :  { %10805 = shalt.err (!%p10802_p7)
}
  0x18   :  { %52 = dma.hbm_to_vmem [thread:$0]  %s12463_s3, 16, %s50_s25, [#allocation6]  }
  0x19   :  { %s10806_s28 = scalar_lea.hbm %s12469_s9, 16 }
  0x1a   :  { %p10807_p8 = scmp.ne.s32.totalorder %s12469_s9, %s10806_s28  ;;  %p10810_p9 = scmp.lt.u32.totalorder %s10806_s28, %s12469_s9 }
  0x1c   :  { %p10812_p10 = pnand %p10810_p9, %p10807_p8 }
  0x1e   :  { %10815 = shalt.err (!%p10812_p10)
}
  0x1f   :  { %s10816_s19 = scalar_lea.vmem %s78_s27, 16  ;;  %s10820_s1 = scalar_lea.vmem %s78_s27, 32 }
  0x20   :  { %p10817_p11 = scmp.ne.s32.totalorder %s78_s27, %s10816_s19  ;;  %p10821_p12 = scmp.lt.s32.totalorder %s78_s27, %s78_s27 }
  0x21   :  { %p10822_p13 = scmp.lt.s32.totalorder %s10820_s1, %s10816_s19 }
  0x23   :  { %p10823_p0 = por %p10822_p13, %p10821_p12 }
  0x25   :  { %p10824_p1 = pnand %p10823_p0, %p10817_p11 }
  0x27   :  { %10827 = shalt.err (!%p10824_p1)
}
  0x28   :  { %80 = dma.hbm_to_vmem [thread:$0]  %s12469_s9, 16, %s78_s27, [#allocation9]  }
  0x29   :  { %s10950_s20 = smov [#allocation2]   ;;  %s12482_s24 = sld [smem:[#allocation19_spill]] }
  0x2a   :  { %s32_s21 = sshll.u32 %s10950_s20, 4  ;;  %s33_s21 = int_to_ptr.vmem [resolvable:$true] %s32_s21 }
  0x2f   :  { %s10828_s26 = scalar_lea.hbm %s12482_s24, 256 }
  0x30   :  { %p10829_p2 = scmp.ne.s32.totalorder %s12482_s24, %s10828_s26  ;;  %p10832_p3 = scmp.lt.u32.totalorder %s10828_s26, %s12482_s24 }
  0x32   :  { %p10834_p4 = pnand %p10832_p3, %p10829_p2 }
  0x34   :  { %10837 = shalt.err (!%p10834_p4)
}
  0x35   :  { %s10838_s18 = scalar_lea.vmem %s33_s21, 256  ;;  %p10843_p6 = scmp.lt.s32.totalorder %s33_s21, %s33_s21 }
  0x36   :  { %p10839_p5 = scmp.ne.s32.totalorder %s33_s21, %s10838_s18  ;;  %p10844_p7 = scmp.lt.s32.totalorder %s10838_s18, %s10838_s18 }
  0x38   :  { %p10845_p8 = por %p10844_p7, %p10843_p6 }
  0x3a   :  { %p10846_p9 = pnand %p10845_p8, %p10839_p5 }
  0x3c   :  { %10849 = shalt.err (!%p10846_p9)
}
  0x3d   :  { %s10951_s9 = smov 128   ;;  %s10952_s27 = smov 8  }
  0x3e   :  { %38 = dma.hbm_to_vmem [thread:$0]  %s12482_s24, 256, %s33_s21, [#allocation3], %s10951_s9, %s10951_s9, %s10952_s27  }
  0x3f   :  { %s10953_s3 = smov [#allocation7]   ;;  %s10954_s20 = smov [#allocation10]  }
  0x40   :  { %s63_s25 = sshll.u32 %s10953_s3, 4  ;;  %s88_s22 = sshll.u32 %s10954_s20, 4  ;;  %s64_s25 = int_to_ptr.vmem [resolvable:$true] %s63_s25  ;;  %s89_s22 = int_to_ptr.vmem [resolvable:$true] %s88_s22 }
  0x41   :  { %s10850_s28 = scalar_lea.hbm %s12466_s6, 16 }
  0x42   :  { %p10851_p10 = scmp.ne.s32.totalorder %s12466_s6, %s10850_s28  ;;  %p10854_p11 = scmp.lt.u32.totalorder %s10850_s28, %s12466_s6 }
  0x44   :  { %p10856_p12 = pnand %p10854_p11, %p10851_p10 }
  0x46   :  { %10859 = shalt.err (!%p10856_p12)
}
  0x47   :  { %s10860_s21 = scalar_lea.vmem %s64_s25, 16  ;;  %s10864_s24 = scalar_lea.vmem %s64_s25, 32 }
  0x48   :  { %p10861_p13 = scmp.ne.s32.totalorder %s64_s25, %s10860_s21  ;;  %p10865_p0 = scmp.lt.s32.totalorder %s64_s25, %s64_s25 }
  0x49   :  { %p10866_p1 = scmp.lt.s32.totalorder %s10864_s24, %s10860_s21 }
  0x4b   :  { %p10867_p2 = por %p10866_p1, %p10865_p0 }
  0x4d   :  { %p10868_p3 = pnand %p10867_p2, %p10861_p13 }
  0x4f   :  { %10871 = shalt.err (!%p10868_p3)
}
  0x50   :  { %66 = dma.hbm_to_vmem [thread:$0]  %s12466_s6, 16, %s64_s25, [#allocation6]  }
  0x51   :  { %s10872_s23 = scalar_lea.hbm %s12471_s11, 512 }
  0x52   :  { %p10873_p4 = scmp.ne.s32.totalorder %s12471_s11, %s10872_s23  ;;  %p10876_p5 = scmp.lt.u32.totalorder %s10872_s23, %s12471_s11 }
  0x54   :  { %p10878_p6 = pnand %p10876_p5, %p10873_p4 }
  0x56   :  { %10881 = shalt.err (!%p10878_p6)
}
  0x57   :  { %s10882_s30 = scalar_lea.vmem %s89_s22, 512  ;;  %p10887_p8 = scmp.lt.s32.totalorder %s89_s22, %s89_s22 }
  0x58   :  { %p10883_p7 = scmp.ne.s32.totalorder %s89_s22, %s10882_s30  ;;  %p10888_p9 = scmp.lt.s32.totalorder %s10882_s30, %s10882_s30 }
  0x5a   :  { %p10889_p10 = por %p10888_p9, %p10887_p8 }
  0x5c   :  { %p10890_p11 = pnand %p10889_p10, %p10883_p7 }
  0x5e   :  { %10893 = shalt.err (!%p10890_p11)
}
  0x5f   :  { %94 = dma.hbm_to_vmem [thread:$0]  %s12471_s11, 512, %s89_s22, [#allocation9], %s10951_s9, %s10951_s9, %s10952_s27  }
  0x60   :  { %s10955_s18 = smov [#allocation11]   ;;  %s10894_s1 = scalar_lea.hbm %s12473_s13, 16384 }
  0x61   :  { %s102_s21 = sshll.u32 %s10955_s18, 4  ;;  %p10895_p12 = scmp.ne.s32.totalorder %s12473_s13, %s10894_s1  ;;  %s103_s21 = int_to_ptr.vmem [resolvable:$true] %s102_s21 }
  0x62   :  { %p10898_p13 = scmp.lt.u32.totalorder %s10894_s1, %s12473_s13 }
  0x64   :  { %p10900_p0 = pnand %p10898_p13, %p10895_p12 }
  0x66   :  { %10903 = shalt.err (!%p10900_p0)
}
  0x67   :  { %s10904_s28 = scalar_lea.vmem %s103_s21, 16384  ;;  %p10909_p2 = scmp.lt.s32.totalorder %s103_s21, %s103_s21 }
  0x68   :  { %p10905_p1 = scmp.ne.s32.totalorder %s103_s21, %s10904_s28  ;;  %p10910_p3 = scmp.lt.s32.totalorder %s10904_s28, %s10904_s28 }
  0x6a   :  { %p10911_p4 = por %p10910_p3, %p10909_p2 }
  0x6c   :  { %p10912_p5 = pnand %p10911_p4, %p10905_p1 }
  0x6e   :  { %10915 = shalt.err (!%p10912_p5)
}
  0x6f   :  { %s10956_s11 = smov 256   ;;  %s10957_s9 = smov 16  }
  0x70   :  { %108 = dma.hbm_to_vmem [thread:$0]  %s12473_s13, 16384, %s103_s21, [#allocation12], %s10956_s11, %s10956_s11, %s10957_s9  }
  0x71   :  { %10938 = dma.done.wait [#allocation3], 256  }
  0x72   :  { %10939 = vsyncadd [#allocation3], 4294967040 }
  0x73   :  { %10940 = dma.done.wait [#allocation6], 32  }
  0x74   :  { %10941 = vsyncadd [#allocation6], 4294967264 }
  0x75   :  { %10942 = dma.done.wait [#allocation9], 528  }
  0x76   :  { %10943 = vsyncadd [#allocation9], 4294966768 }
  0x77   :  { %10944 = dma.done.wait [#allocation12], 16384  }
  0x78   :  { %10945 = vsyncadd [#allocation12], 4294950912  ;;  %v10958_v0 = vmov 0.0|0.0   ;;  %vm10959_vm0 = vmmov 0   ;;  %v10960_v1 = vmov 0.0   ;;  %s12483_s0 = sld [smem:[#allocation20_spill]] }
  0x79   :  { %9708 = vmatprep.subr.bf16.mxu1 %v10958_v0  ;;  %8836 = vmatprep.mubr.msk.f32.mxu1 %vm10959_vm0, %v10960_v1  ;;  %v11152_v7 = vld [vmem:[#allocation2 + $0x8] sm:$0xff]  ;;  %v11160_v10 = vld [vmem:[#allocation2] sm:$0xff]  ;;  %vm156_vm1 = vcmask 1041409   ;;  %vm158_vm2 = vcmask 261120   ;;  %v141_v15 = vld [vmem:[%s12462_s2 + $0x10] sm:$0xff]  ;;  %s10962_s3 = smov 32  }
  0x7a   :  { %9780 = vmatprep.subr.bf16.mxu0 %v10958_v0  ;;  %8968 = vmatprep.mubr.msk.f32.mxu0 %vm10959_vm0, %v10960_v1  ;;  %v155_v9 = vrot.slane %v11152_v7, 7  ;;  %v139_v11 = vld [vmem:[%s12462_s2] sm:$0xff]  ;;  %v140_v12 = vld [vmem:[%s12462_s2 + $0x8] sm:$0xff]  ;;  %v142_v16 = vld [vmem:[%s12462_s2 + $0x18] sm:$0xff]  ;;  %v336_v24 = vrot.slane %v11160_v10, 7  ;;  %v337_v25 = vrot.slane %v11152_v7, 6 }
  0x7b   :  { %v11174_v14 = vpack.c.bf16 %v140_v12, %v139_v11  ;;  %v11188_v17 = vpack.c.bf16 %v142_v16, %v141_v15  ;;  %v144_v18 = vld [vmem:[%s12464_s4] sm:$0xff]  ;;  %v145_v19 = vld [vmem:[%s12464_s4 + $0x8] sm:$0xff]  ;;  %v146_v21 = vld [vmem:[%s12464_s4 + $0x10] sm:$0xff]  ;;  %v688_v16 = vrot.slane %v11160_v10, 6  ;;  %s10963_s2 = smov [#allocation13]   ;;  %vm8276_vm3 = vcmask 58368  }
  0x7c   :  { %v11172_v13 = vsel %vm156_vm1, %v155_v9, %v11160_v10  ;;  %v11200_v20 = vpack.c.bf16 %v145_v19, %v144_v18  ;;  %v147_v22 = vld [vmem:[%s12464_s4 + $0x18] sm:$0xff]  ;;  %v148_v26 = vld [vmem:[%s12465_s5] sm:$0xff]  ;;  %v149_v27 = vld [vmem:[%s12465_s5 + $0x8] sm:$0xff]  ;;  %v11226_v28 = vsel %vm156_vm1, %v337_v25, %v336_v24  ;;  %v689_v18 = vrot.slane %v11152_v7, 5 }
  0x7d   :  { %v11211_v23 = vpack.c.bf16 %v147_v22, %v146_v21  ;;  %v11228_v29 = vpack.c.bf16 %v149_v27, %v148_v26  ;;  %v150_v30 = vld [vmem:[%s12465_s5 + $0x10] sm:$0xff]  ;;  %v151_v31 = vld [vmem:[%s12465_s5 + $0x18] sm:$0xff]  ;;  %s10961_s5 = smov 64  }
  0x7e   :  { %v135_v2 = vld [vmem:[%s12483_s0] sm:$0xff]  ;;  %v136_v3 = vld [vmem:[%s12483_s0 + $0x8] sm:$0xff]  ;;  %v137_v4 = vld [vmem:[%s12483_s0 + $0x10] sm:$0xff]  ;;  %v11240_v32 = vpack.c.bf16 %v151_v31, %v150_v30  ;;  %v11299_v19 = vsel %vm156_vm1, %v689_v18, %v688_v16 }
  0x7f   :  { %v11147_v5 = vpack.c.bf16 %v136_v3, %v135_v2  ;;  %v138_v6 = vld [vmem:[%s12483_s0 + $0x18] sm:$0xff]  ;;  %v11254_v33 = vld [vmem:[#allocation5] ss:$0 sm:$0xff]  ;;  %v11258_v38 = vld [vmem:[#allocation7] ss:$0 sm:$0xff]  ;;  %v513_v2 = vrot.slane %v11160_v10, 1 }
  0x80   :  { %v11155_v8 = vpack.c.bf16 %v138_v6, %v137_v4 }
  0x81   :  { %9710 = vmatpush3.bf16.msra.mxu1 %v11147_v5  ;;  %9782 = vmatpush3.bf16.msra.mxu0 %v11147_v5  ;;  %v11274_v3 = vsel %vm156_vm1, %v11152_v7, %v513_v2 }
  0x82   :  { %9711 = vmatprep.subr.bf16.mxu1 %v10958_v0  ;;  %9783 = vmatprep.subr.bf16.mxu0 %v10958_v0 }
  0x85   :  { %9713 = vmatpush3.bf16.msra.mxu1 %v11155_v8  ;;  %9785 = vmatpush3.bf16.msra.mxu0 %v11155_v8 }
  0x86   :  { %9714 = vmatprep.subr.bf16.mxu1 %v10958_v0  ;;  %9786 = vmatprep.subr.bf16.mxu0 %v10958_v0 }
  0x88   :  { %8837 = vmatmul.mubr.msk.f32.vlgmr.msra.gmra.mrb[0].mxu1 %vm158_vm2, %v11172_v13 }
  0x89   :  { %9716 = vmatpush3.bf16.msra.mxu1 %v11174_v14  ;;  %8847 = vmatprep.mubr.msk.f32.mxu1 %vm10959_vm0, %v10960_v1 }
  0x8a   :  { %9717 = vmatprep.subr.bf16.mxu1 %v10958_v0 }
  0x8d   :  { %9719 = vmatpush3.bf16.msra.mxu1 %v11188_v17 }
  0x8e   :  { %9720 = vmatprep.subr.bf16.mxu1 %v10958_v0 }
  0x90   :  { %8848 = vmatmul.mubr.f32.vlgmr.msra.gmra.mrb[0].mxu1 %v10960_v1 }
  0x91   :  { %9722 = vmatpush3.bf16.msra.mxu1 %v11200_v20  ;;  %8858 = vmatprep.mubr.msk.f32.mxu1 %vm10959_vm0, %v10960_v1 }
  0x92   :  { %9723 = vmatprep.subr.bf16.mxu1 %v10958_v0 }
  0x95   :  { %9725 = vmatpush3.bf16.msra.mxu1 %v11211_v23 }
  0x96   :  { %9726 = vmatprep.subr.bf16.mxu1 %v10958_v0 }
  0x98   :  { %8859 = vmatmul.mubr.msk.f32.vlgmr.msra.gmra.mrb[2].mxu1 %vm158_vm2, %v11226_v28 }
  0x99   :  { %9728 = vmatpush3.bf16.msra.mxu1 %v11228_v29  ;;  %8869 = vmatprep.mubr.msk.f32.mxu1 %vm10959_vm0, %v10960_v1 }
  0x9a   :  { %9729 = vmatprep.subr.bf16.mxu1 %v10958_v0 }
  0x9d   :  { %9731 = vmatpush3.bf16.msra.mxu1 %v11240_v32 }
  0x9e   :  { %9732 = vmatprep.subr.bf16.mxu1 %v10958_v0 }
  0xa0   :  { %8870 = vmatmul.mubr.f32.vlgmr.msra.gmra.mrb[2].mxu1 %v10960_v1 }
  0xa1   :  { %9734 = vmatpush3.bf16.msra.mxu1 %v11147_v5  ;;  %8880 = vmatprep.mubr.msk.f32.mxu1 %vm10959_vm0, %v10960_v1 }
  0xa2   :  { %9735 = vmatprep.subr.bf16.mxu1 %v10958_v0 }
  0xa5   :  { %9737 = vmatpush3.bf16.msra.mxu1 %v11155_v8 }
  0xa6   :  { %9738 = vmatprep.subr.bf16.mxu1 %v10958_v0 }
  0xa8   :  { %8881 = vmatmul.mubr.msk.f32.vlgmr.msra.gmra.mrb[4].mxu1 %vm158_vm2, %v11274_v3 }
  0xa9   :  { %9740 = vmatpush3.bf16.msra.mxu1 %v11174_v14  ;;  %8891 = vmatprep.mubr.msk.f32.mxu1 %vm10959_vm0, %v10960_v1 }
  0xaa   :  { %9741 = vmatprep.subr.bf16.mxu1 %v10958_v0 }
  0xad   :  { %9743 = vmatpush3.bf16.msra.mxu1 %v11188_v17 }
  0xae   :  { %9744 = vmatprep.subr.bf16.mxu1 %v10958_v0 }
 0x163   :  { %v307_v34 = vpop.f32.mrb[0].mxu1 }
 0x164   :  { %v10348_v35 = vadd.f32 %v11254_v33, %v307_v34  ;;  %v8849_v36 = vpop.f32.mrb[1].mxu1 }
 0x166   :  { %10524 = vtanh.f32 %v10348_v35  ;;  %v312_v43 = vsub.f32 0.0, %v10348_v35 }
 0x168   :  { %v313_v44 = vmul.f32 1.442695, %v312_v43 }
 0x170   :  { %v10525_v37 = vpop.eup %10524 }
 0x171   :  { %321 = vrot.lane.b32.xlu0 %v10525_v37, %s10961_s5 }
 0x173   :  { %v484_v39 = vpop.f32.mrb[2].mxu1 }
 0x174   :  { %v10349_v40 = vadd.f32 %v11258_v38, %v484_v39  ;;  %v8871_v41 = vpop.f32.mrb[3].mxu1 }
 0x176   :  { %10526 = vtanh.f32 %v10349_v40  ;;  %v489_v45 = vsub.f32 0.0, %v10349_v40 }
 0x177   :  { %10528 = vpow2.f32 %v313_v44 }
 0x178   :  { %v490_v47 = vmul.f32 1.442695, %v489_v45 }
 0x17a   :  { %10530 = vpow2.f32 %v490_v47 }
 0x180   :  { %v10527_v42 = vpop.eup %10526 }
 0x181   :  { %498 = vrot.lane.b32.xlu1 %v10527_v42, %s10961_s5  ;;  %v10529_v46 = vpop.eup %10528 }
 0x182   :  { %v315_v48 = vadd.f32 1.0, %v10529_v46 }
 0x184   :  { %10532 = vrcp.f32 %v315_v48  ;;  %v10531_v49 = vpop.eup %10530 }
 0x185   :  { %v492_v53 = vadd.f32 1.0, %v10531_v49 }
 0x187   :  { %10534 = vrcp.f32 %v492_v53 }
 0x18e   :  { %v10533_v50 = vpop.eup %10532 }
 0x18f   :  { %v319_v57 = vmul.f32 0.0, %v10533_v50 }
 0x191   :  { %v10535_v54 = vpop.eup %10534 }
 0x192   :  { %v496_v61 = vmul.f32 0.0, %v10535_v54 }
 0x1e3   :  { %v322_v51 = vpop.permute.xlu0 %321 }
 0x1e4   :  { %v324_v52 = vmul.f32 %v10533_v50, %v322_v51 }
 0x1e6   :  { %326 = vrot.lane.b32.xlu0 %v324_v52, %s10962_s3 }
 0x1f3   :  { %v499_v55 = vpop.permute.xlu1 %498 }
 0x1f4   :  { %v501_v56 = vmul.f32 %v10535_v54, %v499_v55 }
 0x1f6   :  { %503 = vrot.lane.b32.xlu0 %v501_v56, %s10962_s3 }
 0x258   :  { %v327_v58 = vpop.permute.xlu0 %326 }
 0x259   :  { %v11264_v59 = vadd.f32 %v327_v58, %v319_v57  ;;  %v864_v57 = vrot.slane %v11160_v10, 2  ;;  %v865_v58 = vrot.slane %v11152_v7, 1 }
 0x25b   :  { %10536 = vtanh.f32 %v11264_v59 }
 0x265   :  { %v10537_v60 = vpop.eup %10536 }
 0x266   :  { %332 = vrot.lane.b32.xlu1 %v10537_v60, %s10961_s5 }
 0x268   :  { %v504_v62 = vpop.permute.xlu0 %503 }
 0x269   :  { %v11268_v63 = vadd.f32 %v504_v62, %v496_v61 }
 0x26b   :  { %10538 = vtanh.f32 %v11268_v63 }
 0x275   :  { %v10539_v4 = vpop.eup %10538 }
 0x276   :  { %509 = vrot.lane.b32.xlu0 %v10539_v4, %s10961_s5 }
 0x2d8   :  { %v333_v6 = vpop.permute.xlu1 %332 }
 0x2d9   :  { %v335_v9 = vmul.f32 %v10533_v50, %v333_v6  ;;  %v1040_v6 = vrot.slane %v11160_v10, 5 }
 0x2db   :  { %589 = vrot.lane.b32.xlu1 %v335_v9, %s10962_s3  ;;  %v1041_v9 = vrot.slane %v11152_v7, 4 }
 0x2e8   :  { %v510_v11 = vpop.permute.xlu0 %509 }
 0x2e9   :  { %v512_v12 = vmul.f32 %v10535_v54, %v510_v11  ;;  %v11363_v11 = vsel %vm156_vm1, %v1041_v9, %v1040_v6 }
 0x2eb   :  { %765 = vrot.lane.b32.xlu1 %v512_v12, %s10962_s3 }
 0x34d   :  { %v11287_v15 = vpop.permute.xlu1 %589 }
 0x34e   :  { %8892 = vmatmul.mubr.msk.f32.vlgmr.msra.gmra.mrb[4].mxu1 %vm158_vm2, %v11287_v15 }
 0x34f   :  { %9746 = vmatpush3.bf16.msra.mxu1 %v11200_v20  ;;  %8902 = vmatprep.mubr.msk.f32.mxu1 %vm10959_vm0, %v10960_v1 }
 0x350   :  { %9747 = vmatprep.subr.bf16.mxu1 %v10958_v0 }
 0x353   :  { %9749 = vmatpush3.bf16.msra.mxu1 %v11211_v23 }
 0x354   :  { %9750 = vmatprep.subr.bf16.mxu1 %v10958_v0 }
 0x356   :  { %8903 = vmatmul.mubr.msk.f32.vlgmr.msra.gmra.mrb[6].mxu1 %vm158_vm2, %v11299_v19 }
 0x357   :  { %9752 = vmatpush3.bf16.msra.mxu1 %v11228_v29  ;;  %8913 = vmatprep.mubr.msk.f32.mxu1 %vm10959_vm0, %v10960_v1 }
 0x358   :  { %9753 = vmatprep.subr.bf16.mxu1 %v10958_v0 }
 0x35b   :  { %9755 = vmatpush3.bf16.msra.mxu1 %v11240_v32 }
 0x35c   :  { %9756 = vmatprep.subr.bf16.mxu1 %v10958_v0 }
 0x35d   :  { %v11310_v21 = vpop.permute.xlu1 %765 }
 0x35e   :  { %8914 = vmatmul.mubr.msk.f32.vlgmr.msra.gmra.mrb[6].mxu1 %vm158_vm2, %v11310_v21 }
 0x35f   :  { %9758 = vmatpush3.bf16.msra.mxu1 %v11147_v5  ;;  %8924 = vmatprep.mubr.msk.f32.mxu1 %vm10959_vm0, %v10960_v1 }
 0x360   :  { %9759 = vmatprep.subr.bf16.mxu1 %v10958_v0 }
 0x363   :  { %9761 = vmatpush3.bf16.msra.mxu1 %v11155_v8 }
 0x364   :  { %9762 = vmatprep.subr.bf16.mxu1 %v10958_v0 }
 0x421   :  { %v659_v22 = vpop.f32.mrb[4].mxu1 }
 0x422   :  { %v10350_v24 = vadd.f32 %v11254_v33, %v659_v22  ;;  %v8893_v25 = vpop.f32.mrb[5].mxu1 }
 0x424   :  { %10540 = vtanh.f32 %v10350_v24  ;;  %v664_v35 = vsub.f32 0.0, %v10350_v24 }
 0x426   :  { %v665_v36 = vmul.f32 1.442695, %v664_v35 }
 0x42e   :  { %v10541_v26 = vpop.eup %10540 }
 0x42f   :  { %673 = vrot.lane.b32.xlu0 %v10541_v26, %s10961_s5 }
 0x431   :  { %v835_v27 = vpop.f32.mrb[6].mxu1 }
 0x432   :  { %v10351_v30 = vadd.f32 %v11258_v38, %v835_v27  ;;  %v8915_v31 = vpop.f32.mrb[7].mxu1 }
 0x434   :  { %10542 = vtanh.f32 %v10351_v30  ;;  %v840_v37 = vsub.f32 0.0, %v10351_v30 }
 0x435   :  { %10544 = vpow2.f32 %v665_v36 }
 0x436   :  { %v841_v40 = vmul.f32 1.442695, %v840_v37 }
 0x438   :  { %10546 = vpow2.f32 %v841_v40 }
 0x43e   :  { %v10543_v34 = vpop.eup %10542 }
 0x43f   :  { %849 = vrot.lane.b32.xlu0 %v10543_v34, %s10961_s5  ;;  %v10545_v39 = vpop.eup %10544 }
 0x440   :  { %v667_v41 = vadd.f32 1.0, %v10545_v39 }
 0x442   :  { %10548 = vrcp.f32 %v667_v41  ;;  %v10547_v42 = vpop.eup %10546 }
 0x443   :  { %v843_v46 = vadd.f32 1.0, %v10547_v42 }
 0x445   :  { %10550 = vrcp.f32 %v843_v46 }
 0x44c   :  { %v10549_v43 = vpop.eup %10548 }
 0x44d   :  { %v671_v50 = vmul.f32 %v10549_v43, %v11264_v59  ;;  %v11338_v59 = vsel %vm156_vm1, %v865_v58, %v864_v57  ;;  %v1216_v57 = vrot.slane %v11160_v10, 3  ;;  %v1217_v58 = vrot.slane %v11152_v7, 2 }
 0x44e   :  { %8925 = vmatmul.mubr.msk.f32.vlgmr.msra.gmra.mrb[8].mxu1 %vm158_vm2, %v11338_v59 }
 0x44f   :  { %v10551_v47 = vpop.eup %10550  ;;  %9764 = vmatpush3.bf16.msra.mxu1 %v11174_v14  ;;  %8935 = vmatprep.mubr.msk.f32.mxu1 %vm10959_vm0, %v10960_v1 }
 0x450   :  { %v847_v54 = vmul.f32 %v10551_v47, %v11268_v63  ;;  %9765 = vmatprep.subr.bf16.mxu1 %v10958_v0 }
 0x453   :  { %9767 = vmatpush3.bf16.msra.mxu1 %v11188_v17 }
 0x454   :  { %9768 = vmatprep.subr.bf16.mxu1 %v10958_v0 }
 0x4a1   :  { %v674_v44 = vpop.permute.xlu0 %673 }
 0x4a2   :  { %v676_v45 = vmul.f32 %v10549_v43, %v674_v44 }
 0x4a4   :  { %678 = vrot.lane.b32.xlu1 %v676_v45, %s10962_s3 }
 0x4b1   :  { %v850_v48 = vpop.permute.xlu0 %849 }
 0x4b2   :  { %v852_v49 = vmul.f32 %v10551_v47, %v850_v48 }
 0x4b4   :  { %854 = vrot.lane.b32.xlu0 %v852_v49, %s10962_s3 }
 0x516   :  { %v679_v51 = vpop.permute.xlu1 %678 }
 0x517   :  { %v11327_v52 = vadd.f32 %v679_v51, %v671_v50 }
 0x519   :  { %10552 = vtanh.f32 %v11327_v52 }
 0x523   :  { %v10553_v53 = vpop.eup %10552 }
 0x524   :  { %684 = vrot.lane.b32.xlu1 %v10553_v53, %s10961_s5 }
 0x526   :  { %v855_v55 = vpop.permute.xlu0 %854 }
 0x527   :  { %v11332_v56 = vadd.f32 %v855_v55, %v847_v54 }
 0x529   :  { %10554 = vtanh.f32 %v11332_v56 }
 0x533   :  { %v10555_v60 = vpop.eup %10554 }
 0x534   :  { %860 = vrot.lane.b32.xlu0 %v10555_v60, %s10961_s5  ;;  %v1392_v60 = vrot.slane %v11160_v10, 4 }
 0x596   :  { %v685_v61 = vpop.permute.xlu1 %684 }
 0x597   :  { %v687_v62 = vmul.f32 %v10549_v43, %v685_v61  ;;  %v1393_v61 = vrot.slane %v11152_v7, 3 }
 0x599   :  { %941 = vrot.lane.b32.xlu1 %v687_v62, %s10962_s3  ;;  %v1394_v62 = vsel %vm156_vm1, %v1393_v61, %v1392_v60 }
 0x5a6   :  { %v861_v63 = vpop.permute.xlu0 %860 }
 0x5a7   :  { %v863_v2 = vmul.f32 %v10551_v47, %v861_v63 }
 0x5a9   :  { %1117 = vrot.lane.b32.xlu1 %v863_v2, %s10962_s3 }
 0x60b   :  { %v11351_v4 = vpop.permute.xlu1 %941 }
 0x60c   :  { %8936 = vmatmul.mubr.msk.f32.vlgmr.msra.gmra.mrb[8].mxu1 %vm158_vm2, %v11351_v4 }
 0x60d   :  { %9770 = vmatpush3.bf16.msra.mxu1 %v11200_v20  ;;  %8946 = vmatprep.mubr.msk.f32.mxu1 %vm10959_vm0, %v10960_v1 }
 0x60e   :  { %9771 = vmatprep.subr.bf16.mxu1 %v10958_v0 }
 0x611   :  { %9773 = vmatpush3.bf16.msra.mxu1 %v11211_v23 }
 0x612   :  { %9774 = vmatprep.subr.bf16.mxu1 %v10958_v0 }
 0x614   :  { %8947 = vmatmul.mubr.msk.f32.vlgmr.msra.gmra.mrb[10].mxu1 %vm158_vm2, %v11363_v11 }
 0x615   :  { %9776 = vmatpush3.bf16.msra.mxu1 %v11228_v29  ;;  %8957 = vmatprep.mubr.msk.f32.mxu1 %vm10959_vm0, %v10960_v1 }
 0x616   :  { %9777 = vmatprep.subr.bf16.mxu1 %v10958_v0 }
 0x619   :  { %9779 = vmatpush3.bf16.msra.mxu1 %v11240_v32 }
 0x61a   :  { %9792 = vmatprep.subr.bf16.mxu1 %v10958_v0 }
 0x61b   :  { %v11374_v12 = vpop.permute.xlu1 %1117 }
 0x61c   :  { %8958 = vmatmul.mubr.msk.f32.vlgmr.msra.gmra.mrb[10].mxu1 %vm158_vm2, %v11374_v12 }
 0x61d   :  { %9794 = vmatpush3.bf16.msra.mxu1 %v11200_v20  ;;  %8990 = vmatprep.mubr.msk.f32.mxu1 %vm10959_vm0, %v10960_v1 }
 0x61e   :  { %9795 = vmatprep.subr.bf16.mxu1 %v10958_v0 }
 0x621   :  { %9797 = vmatpush3.bf16.msra.mxu1 %v11211_v23 }
 0x622   :  { %9798 = vmatprep.subr.bf16.mxu1 %v10958_v0 }
 0x624   :  { %8991 = vmatmul.mubr.msk.f32.vlgmr.msra.gmra.mrb[12].mxu1 %vm158_vm2, %v1394_v62 }
 0x625   :  { %9800 = vmatpush3.bf16.msra.mxu1 %v11228_v29  ;;  %9001 = vmatprep.mubr.msk.f32.mxu1 %vm10959_vm0, %v10960_v1 }
 0x626   :  { %9801 = vmatprep.subr.bf16.mxu1 %v10958_v0 }
 0x629   :  { %9803 = vmatpush3.bf16.msra.mxu1 %v11240_v32 }
 0x62a   :  { %9816 = vmatprep.subr.bf16.mxu1 %v10958_v0 }
 0x6df   :  { %v1011_v16 = vpop.f32.mrb[8].mxu1 }
 0x6e0   :  { %v10352_v18 = vadd.f32 %v11254_v33, %v1011_v16  ;;  %v8937_v22 = vpop.f32.mrb[9].mxu1 }
 0x6e2   :  { %10556 = vtanh.f32 %v10352_v18  ;;  %v1016_v31 = vsub.f32 0.0, %v10352_v18 }
 0x6e4   :  { %v1017_v34 = vmul.f32 1.442695, %v1016_v31 }
 0x6ec   :  { %v10557_v24 = vpop.eup %10556 }
 0x6ed   :  { %1025 = vrot.lane.b32.xlu0 %v10557_v24, %s10961_s5 }
 0x6ef   :  { %v1187_v25 = vpop.f32.mrb[10].mxu1 }
 0x6f0   :  { %v10353_v26 = vadd.f32 %v11258_v38, %v1187_v25  ;;  %v8959_v27 = vpop.f32.mrb[11].mxu1 }
 0x6f2   :  { %10558 = vtanh.f32 %v10353_v26  ;;  %v1192_v35 = vsub.f32 0.0, %v10353_v26 }
 0x6f3   :  { %10560 = vpow2.f32 %v1017_v34 }
 0x6f4   :  { %v1193_v37 = vmul.f32 1.442695, %v1192_v35 }
 0x6f6   :  { %10562 = vpow2.f32 %v1193_v37 }
 0x6fc   :  { %v10559_v30 = vpop.eup %10558 }
 0x6fd   :  { %1201 = vrot.lane.b32.xlu0 %v10559_v30, %s10961_s5  ;;  %v10561_v36 = vpop.eup %10560 }
 0x6fe   :  { %v1019_v39 = vadd.f32 1.0, %v10561_v36 }
 0x700   :  { %10564 = vrcp.f32 %v1019_v39  ;;  %v10563_v40 = vpop.eup %10562 }
 0x701   :  { %v1195_v44 = vadd.f32 1.0, %v10563_v40 }
 0x703   :  { %10566 = vrcp.f32 %v1195_v44 }
 0x70a   :  { %v10565_v41 = vpop.eup %10564 }
 0x70b   :  { %v1023_v48 = vmul.f32 %v10565_v41, %v11327_v52  ;;  %v1218_v52 = vsel %vm156_vm1, %v1217_v58, %v1216_v57 }
 0x70c   :  { %8969 = vmatmul.mubr.msk.f32.vlgmr.msra.gmra.mrb[0].mxu0 %vm158_vm2, %v1218_v52 }
 0x70d   :  { %v10567_v45 = vpop.eup %10566  ;;  %9788 = vmatpush3.bf16.msra.mxu0 %v11174_v14  ;;  %8979 = vmatprep.mubr.msk.f32.mxu0 %vm10959_vm0, %v10960_v1 }
 0x70e   :  { %v1199_v53 = vmul.f32 %v10567_v45, %v11332_v56  ;;  %9789 = vmatprep.subr.bf16.mxu0 %v10958_v0 }
 0x711   :  { %9791 = vmatpush3.bf16.msra.mxu0 %v11188_v17 }
 0x712   :  { %9804 = vmatprep.subr.bf16.mxu0 %v10958_v0 }
 0x75f   :  { %v1026_v42 = vpop.permute.xlu0 %1025 }
 0x760   :  { %v1028_v43 = vmul.f32 %v10565_v41, %v1026_v42 }
 0x762   :  { %1030 = vrot.lane.b32.xlu1 %v1028_v43, %s10962_s3 }
 0x76f   :  { %v1202_v46 = vpop.permute.xlu0 %1201 }
 0x770   :  { %v1204_v47 = vmul.f32 %v10567_v45, %v1202_v46 }
 0x772   :  { %1206 = vrot.lane.b32.xlu0 %v1204_v47, %s10962_s3 }
 0x7d4   :  { %v1031_v49 = vpop.permute.xlu1 %1030 }
 0x7d5   :  { %v11391_v50 = vadd.f32 %v1031_v49, %v1023_v48 }
 0x7d7   :  { %10568 = vtanh.f32 %v11391_v50 }
 0x7e1   :  { %v10569_v51 = vpop.eup %10568 }
 0x7e2   :  { %1036 = vrot.lane.b32.xlu1 %v10569_v51, %s10961_s5 }
 0x7e4   :  { %v1207_v54 = vpop.permute.xlu0 %1206 }
 0x7e5   :  { %v11396_v55 = vadd.f32 %v1207_v54, %v1199_v53 }
 0x7e7   :  { %10570 = vtanh.f32 %v11396_v55 }
 0x7f1   :  { %v10571_v56 = vpop.eup %10570 }
 0x7f2   :  { %1212 = vrot.lane.b32.xlu0 %v10571_v56, %s10961_s5 }
 0x854   :  { %v1037_v63 = vpop.permute.xlu1 %1036 }
 0x855   :  { %v1039_v2 = vmul.f32 %v10565_v41, %v1037_v63 }
 0x857   :  { %1293 = vrot.lane.b32.xlu1 %v1039_v2, %s10962_s3 }
 0x864   :  { %v1213_v7 = vpop.permute.xlu0 %1212 }
 0x865   :  { %v1215_v10 = vmul.f32 %v10567_v45, %v1213_v7 }
 0x867   :  { %1469 = vrot.lane.b32.xlu1 %v1215_v10, %s10962_s3 }
 0x8c9   :  { %v11422_v6 = vpop.permute.xlu1 %1293 }
 0x8ca   :  { %8980 = vmatmul.mubr.msk.f32.vlgmr.msra.gmra.mrb[0].mxu0 %vm158_vm2, %v11422_v6 }
 0x8cb   :  { %9806 = vmatpush3.bf16.msra.mxu0 %v11147_v5  ;;  %9012 = vmatprep.mubr.msk.f32.mxu0 %vm10959_vm0, %v10960_v1 }
 0x8cc   :  { %9807 = vmatprep.subr.bf16.mxu0 %v10958_v0 }
 0x8cf   :  { %9809 = vmatpush3.bf16.msra.mxu0 %v11155_v8 }
 0x8d0   :  { %9810 = vmatprep.subr.bf16.mxu0 %v10958_v0 }
 0x8d2   :  { %9013 = vmatmul.mubr.msk.f32.vlgmr.msra.gmra.mrb[2].mxu0 %vm158_vm2, %v1394_v62 }
 0x8d3   :  { %9812 = vmatpush3.bf16.msra.mxu0 %v11174_v14  ;;  %9023 = vmatprep.mubr.msk.f32.mxu0 %vm10959_vm0, %v10960_v1 }
 0x8d4   :  { %9813 = vmatprep.subr.bf16.mxu0 %v10958_v0 }
 0x8d7   :  { %9815 = vmatpush3.bf16.msra.mxu0 %v11188_v17 }
 0x8d8   :  { %9828 = vmatprep.subr.bf16.mxu0 %v10958_v0 }
 0x8d9   :  { %v11439_v9 = vpop.permute.xlu1 %1469 }
 0x8da   :  { %9002 = vmatmul.mubr.msk.f32.vlgmr.msra.gmra.mrb[12].mxu1 %vm158_vm2, %v11439_v9 }
 0x8db   :  { %9818 = vmatpush3.bf16.msra.mxu1 %v11200_v20  ;;  %9034 = vmatprep.mubr.msk.f32.mxu1 %vm10959_vm0, %v10960_v1 }
 0x8dc   :  { %9819 = vmatprep.subr.bf16.mxu1 %v10958_v0 }
 0x8df   :  { %9821 = vmatpush3.bf16.msra.mxu1 %v11211_v23 }
 0x8e0   :  { %9822 = vmatprep.subr.bf16.mxu1 %v10958_v0 }
 0x8e2   :  { %9035 = vmatmul.mubr.msk.f32.vlgmr.msra.gmra.mrb[14].mxu1 %vm158_vm2, %v1218_v52 }
 0x8e3   :  { %9824 = vmatpush3.bf16.msra.mxu1 %v11228_v29  ;;  %9045 = vmatprep.mubr.msk.f32.mxu1 %vm10959_vm0, %v10960_v1 }
 0x8e4   :  { %9825 = vmatprep.subr.bf16.mxu1 %v10958_v0 }
 0x8e7   :  { %9827 = vmatpush3.bf16.msra.mxu1 %v11240_v32 }
 0x8e8   :  { %9840 = vmatprep.subr.bf16.mxu1 %v10958_v0 }
 0x99d   :  { %v1363_v16 = vpop.f32.mrb[0].mxu0 }
 0x99e   :  { %v10354_v18 = vadd.f32 %v11254_v33, %v1363_v16  ;;  %v8981_v22 = vpop.f32.mrb[1].mxu0 }
 0x9a0   :  { %10572 = vtanh.f32 %v10354_v18  ;;  %v1368_v31 = vsub.f32 0.0, %v10354_v18 }
 0x9a2   :  { %v1369_v34 = vmul.f32 1.442695, %v1368_v31 }
 0x9aa   :  { %v10573_v24 = vpop.eup %10572 }
 0x9ab   :  { %1377 = vrot.lane.b32.xlu0 %v10573_v24, %s10961_s5 }
 0x9ad   :  { %v1539_v25 = vpop.f32.mrb[12].mxu1 }
 0x9ae   :  { %v10355_v26 = vadd.f32 %v11258_v38, %v1539_v25  ;;  %v9003_v27 = vpop.f32.mrb[13].mxu1 }
 0x9b0   :  { %10574 = vtanh.f32 %v10355_v26  ;;  %v1544_v35 = vsub.f32 0.0, %v10355_v26 }
 0x9b1   :  { %10576 = vpow2.f32 %v1369_v34 }
 0x9b2   :  { %v1545_v37 = vmul.f32 1.442695, %v1544_v35 }
 0x9b4   :  { %10578 = vpow2.f32 %v1545_v37 }
 0x9ba   :  { %v10575_v30 = vpop.eup %10574 }
 0x9bb   :  { %1553 = vrot.lane.b32.xlu0 %v10575_v30, %s10961_s5  ;;  %v10577_v36 = vpop.eup %10576 }
 0x9bc   :  { %v1371_v39 = vadd.f32 1.0, %v10577_v36 }
 0x9be   :  { %10580 = vrcp.f32 %v1371_v39  ;;  %v10579_v40 = vpop.eup %10578 }
 0x9bf   :  { %v1547_v44 = vadd.f32 1.0, %v10579_v40 }
 0x9c1   :  { %10582 = vrcp.f32 %v1547_v44 }
 0x9c8   :  { %v10581_v41 = vpop.eup %10580 }
 0x9c9   :  { %v1375_v48 = vmul.f32 %v10581_v41, %v11391_v50 }
 0x9cb   :  { %v10583_v45 = vpop.eup %10582 }
 0x9cc   :  { %v1551_v54 = vmul.f32 %v10583_v45, %v11396_v55 }
 0xa1d   :  { %v1378_v42 = vpop.permute.xlu0 %1377 }
 0xa1e   :  { %v1380_v43 = vmul.f32 %v10581_v41, %v1378_v42 }
 0xa20   :  { %1382 = vrot.lane.b32.xlu1 %v1380_v43, %s10962_s3 }
 0xa2d   :  { %v1554_v46 = vpop.permute.xlu0 %1553 }
 0xa2e   :  { %v1556_v47 = vmul.f32 %v10583_v45, %v1554_v46 }
 0xa30   :  { %1558 = vrot.lane.b32.xlu0 %v1556_v47, %s10962_s3 }
 0xa92   :  { %v1383_v49 = vpop.permute.xlu1 %1382 }
 0xa93   :  { %v11463_v51 = vadd.f32 %v1383_v49, %v1375_v48 }
 0xa95   :  { %10584 = vtanh.f32 %v11463_v51 }
 0xa9f   :  { %v10585_v53 = vpop.eup %10584 }
 0xaa0   :  { %1388 = vrot.lane.b32.xlu1 %v10585_v53, %s10961_s5 }
 0xaa2   :  { %v1559_v57 = vpop.permute.xlu0 %1558 }
 0xaa3   :  { %v11468_v58 = vadd.f32 %v1559_v57, %v1551_v54 }
 0xaa5   :  { %10586 = vtanh.f32 %v11468_v58 }
 0xaaf   :  { %v10587_v52 = vpop.eup %10586 }
 0xab0   :  { %1564 = vrot.lane.b32.xlu0 %v10587_v52, %s10961_s5 }
 0xb12   :  { %v1389_v56 = vpop.permute.xlu1 %1388 }
 0xb13   :  { %v1391_v50 = vmul.f32 %v10581_v41, %v1389_v56 }
 0xb15   :  { %1640 = vrot.lane.b32.xlu1 %v1391_v50, %s10962_s3 }
 0xb22   :  { %v1565_v60 = vpop.permute.xlu0 %1564 }
 0xb23   :  { %v1567_v61 = vmul.f32 %v10583_v45, %v1565_v60 }
 0xb25   :  { %1811 = vrot.lane.b32.xlu1 %v1567_v61, %s10962_s3 }
 0xb87   :  { %v11474_v62 = vpop.permute.xlu1 %1640 }
 0xb88   :  { %9024 = vmatmul.mubr.msk.f32.vlgmr.msra.gmra.mrb[2].mxu0 %vm158_vm2, %v11474_v62 }
 0xb89   :  { %9830 = vmatpush3.bf16.msra.mxu0 %v11147_v5  ;;  %9056 = vmatprep.mubr.msk.f32.mxu0 %vm10959_vm0, %v10960_v1 }
 0xb8a   :  { %9831 = vmatprep.subr.bf16.mxu0 %v10958_v0 }
 0xb8d   :  { %9833 = vmatpush3.bf16.msra.mxu0 %v11155_v8 }
 0xb8e   :  { %9834 = vmatprep.subr.bf16.mxu0 %v10958_v0 }
 0xb90   :  { %9057 = vmatmul.mubr.msk.f32.vlgmr.msra.gmra.mrb[4].mxu0 %vm158_vm2, %v11363_v11 }
 0xb91   :  { %9836 = vmatpush3.bf16.msra.mxu0 %v11174_v14  ;;  %9067 = vmatprep.mubr.msk.f32.mxu0 %vm10959_vm0, %v10960_v1 }
 0xb92   :  { %9837 = vmatprep.subr.bf16.mxu0 %v10958_v0 }
 0xb95   :  { %9839 = vmatpush3.bf16.msra.mxu0 %v11188_v17 }
 0xb96   :  { %9852 = vmatprep.subr.bf16.mxu0 %v10958_v0 }
 0xb97   :  { %v11492_v55 = vpop.permute.xlu1 %1811 }
 0xb98   :  { %9046 = vmatmul.mubr.msk.f32.vlgmr.msra.gmra.mrb[14].mxu1 %vm158_vm2, %v11492_v55 }
 0xb99   :  { %9842 = vmatpush3.bf16.msra.mxu1 %v11200_v20  ;;  %9078 = vmatprep.mubr.msk.f32.mxu1 %vm10959_vm0, %v10960_v1 }
 0xb9a   :  { %9843 = vmatprep.subr.bf16.mxu1 %v10958_v0 }
 0xb9d   :  { %9845 = vmatpush3.bf16.msra.mxu1 %v11211_v23 }
 0xb9e   :  { %9846 = vmatprep.subr.bf16.mxu1 %v10958_v0 }
 0xba0   :  { %9079 = vmatmul.mubr.msk.f32.vlgmr.msra.gmra.mrb[16].mxu1 %vm158_vm2, %v11338_v59 }
 0xba1   :  { %9848 = vmatpush3.bf16.msra.mxu1 %v11228_v29  ;;  %9089 = vmatprep.mubr.msk.f32.mxu1 %vm10959_vm0, %v10960_v1 }
 0xba2   :  { %9849 = vmatprep.subr.bf16.mxu1 %v10958_v0 }
 0xba5   :  { %9851 = vmatpush3.bf16.msra.mxu1 %v11240_v32 }
 0xba6   :  { %9864 = vmatprep.subr.bf16.mxu1 %v10958_v0 }
 0xc5b   :  { %v1710_v11 = vpop.f32.mrb[2].mxu0 }
 0xc5c   :  { %v10356_v63 = vadd.f32 %v11254_v33, %v1710_v11  ;;  %v9025_v2 = vpop.f32.mrb[3].mxu0 }
 0xc5e   :  { %10588 = vtanh.f32 %v10356_v63  ;;  %v1715_v22 = vsub.f32 0.0, %v10356_v63 }
 0xc60   :  { %v1716_v24 = vmul.f32 1.442695, %v1715_v22 }
 0xc68   :  { %v10589_v7 = vpop.eup %10588 }
 0xc69   :  { %1724 = vrot.lane.b32.xlu0 %v10589_v7, %s10961_s5 }
 0xc6b   :  { %v1881_v59 = vpop.f32.mrb[14].mxu1 }
 0xc6c   :  { %v10357_v10 = vadd.f32 %v11258_v38, %v1881_v59  ;;  %v9047_v16 = vpop.f32.mrb[15].mxu1 }
 0xc6e   :  { %10590 = vtanh.f32 %v10357_v10  ;;  %v1886_v25 = vsub.f32 0.0, %v10357_v10 }
 0xc6f   :  { %10592 = vpow2.f32 %v1716_v24 }
 0xc70   :  { %v1887_v27 = vmul.f32 1.442695, %v1886_v25 }
 0xc72   :  { %10594 = vpow2.f32 %v1887_v27 }
 0xc78   :  { %v10591_v18 = vpop.eup %10590 }
 0xc79   :  { %1895 = vrot.lane.b32.xlu0 %v10591_v18, %s10961_s5  ;;  %v10593_v26 = vpop.eup %10592 }
 0xc7a   :  { %v1718_v30 = vadd.f32 1.0, %v10593_v26 }
 0xc7c   :  { %10596 = vrcp.f32 %v1718_v30  ;;  %v10595_v31 = vpop.eup %10594 }
 0xc7d   :  { %v1889_v37 = vadd.f32 1.0, %v10595_v31 }
 0xc7f   :  { %10598 = vrcp.f32 %v1889_v37 }
 0xc86   :  { %v10597_v34 = vpop.eup %10596 }
 0xc87   :  { %v1722_v42 = vmul.f32 %v10597_v34, %v11463_v51 }
 0xc89   :  { %v10599_v39 = vpop.eup %10598 }
 0xc8a   :  { %v1893_v46 = vmul.f32 %v10599_v39, %v11468_v58 }
 0xcdb   :  { %v1725_v35 = vpop.permute.xlu0 %1724 }
 0xcdc   :  { %v1727_v36 = vmul.f32 %v10597_v34, %v1725_v35 }
 0xcde   :  { %1729 = vrot.lane.b32.xlu1 %v1727_v36, %s10962_s3 }
 0xceb   :  { %v1896_v40 = vpop.permute.xlu0 %1895 }
 0xcec   :  { %v1898_v41 = vmul.f32 %v10599_v39, %v1896_v40 }
 0xcee   :  { %1900 = vrot.lane.b32.xlu0 %v1898_v41, %s10962_s3 }
 0xd50   :  { %v1730_v43 = vpop.permute.xlu1 %1729 }
 0xd51   :  { %v11517_v44 = vadd.f32 %v1730_v43, %v1722_v42 }
 0xd53   :  { %10600 = vtanh.f32 %v11517_v44 }
 0xd5d   :  { %v10601_v45 = vpop.eup %10600 }
 0xd5e   :  { %1735 = vrot.lane.b32.xlu1 %v10601_v45, %s10961_s5 }
 0xd60   :  { %v1901_v47 = vpop.permute.xlu0 %1900 }
 0xd61   :  { %v11522_v48 = vadd.f32 %v1901_v47, %v1893_v46 }
 0xd63   :  { %10602 = vtanh.f32 %v11522_v48 }
 0xd6d   :  { %v10603_v49 = vpop.eup %10602 }
 0xd6e   :  { %1906 = vrot.lane.b32.xlu0 %v10603_v49, %s10961_s5 }
 0xdd0   :  { %v1736_v53 = vpop.permute.xlu1 %1735 }
 0xdd1   :  { %v1738_v51 = vmul.f32 %v10597_v34, %v1736_v53 }
 0xdd3   :  { %1982 = vrot.lane.b32.xlu1 %v1738_v51, %s10962_s3 }
 0xde0   :  { %v1907_v54 = vpop.permute.xlu0 %1906 }
 0xde1   :  { %v1909_v57 = vmul.f32 %v10599_v39, %v1907_v54 }
 0xde3   :  { %2153 = vrot.lane.b32.xlu1 %v1909_v57, %s10962_s3 }
 0xe45   :  { %v11528_v52 = vpop.permute.xlu1 %1982 }
 0xe46   :  { %9068 = vmatmul.mubr.msk.f32.vlgmr.msra.gmra.mrb[4].mxu0 %vm158_vm2, %v11528_v52 }
 0xe47   :  { %9854 = vmatpush3.bf16.msra.mxu0 %v11147_v5  ;;  %9100 = vmatprep.mubr.msk.f32.mxu0 %vm10959_vm0, %v10960_v1 }
 0xe48   :  { %9855 = vmatprep.subr.bf16.mxu0 %v10958_v0 }
 0xe4b   :  { %9857 = vmatpush3.bf16.msra.mxu0 %v11155_v8 }
 0xe4c   :  { %9858 = vmatprep.subr.bf16.mxu0 %v10958_v0 }
 0xe4e   :  { %9101 = vmatmul.mubr.msk.f32.vlgmr.msra.gmra.mrb[6].mxu0 %vm158_vm2, %v11299_v19 }
 0xe4f   :  { %9860 = vmatpush3.bf16.msra.mxu0 %v11174_v14  ;;  %9111 = vmatprep.mubr.msk.f32.mxu0 %vm10959_vm0, %v10960_v1 }
 0xe50   :  { %9861 = vmatprep.subr.bf16.mxu0 %v10958_v0 }
 0xe53   :  { %9863 = vmatpush3.bf16.msra.mxu0 %v11188_v17 }
 0xe54   :  { %9876 = vmatprep.subr.bf16.mxu0 %v10958_v0 }
 0xe55   :  { %v11546_v58 = vpop.permute.xlu1 %2153 }
 0xe56   :  { %9090 = vmatmul.mubr.msk.f32.vlgmr.msra.gmra.mrb[16].mxu1 %vm158_vm2, %v11546_v58 }
 0xe57   :  { %9866 = vmatpush3.bf16.msra.mxu1 %v11200_v20  ;;  %9122 = vmatprep.mubr.msk.f32.mxu1 %vm10959_vm0, %v10960_v1 }
 0xe58   :  { %9867 = vmatprep.subr.bf16.mxu1 %v10958_v0 }
 0xe5b   :  { %9869 = vmatpush3.bf16.msra.mxu1 %v11211_v23 }
 0xe5c   :  { %9870 = vmatprep.subr.bf16.mxu1 %v10958_v0 }
 0xe5e   :  { %9123 = vmatmul.mubr.msk.f32.vlgmr.msra.gmra.mrb[18].mxu1 %vm158_vm2, %v11274_v3 }
 0xe5f   :  { %9872 = vmatpush3.bf16.msra.mxu1 %v11228_v29  ;;  %9133 = vmatprep.mubr.msk.f32.mxu1 %vm10959_vm0, %v10960_v1 }
 0xe60   :  { %9873 = vmatprep.subr.bf16.mxu1 %v10958_v0 }
 0xe63   :  { %9875 = vmatpush3.bf16.msra.mxu1 %v11240_v32 }
 0xe64   :  { %9888 = vmatprep.subr.bf16.mxu1 %v10958_v0 }
 0xf19   :  { %v2052_v19 = vpop.f32.mrb[4].mxu0 }
 0xf1a   :  { %v10358_v56 = vadd.f32 %v11254_v33, %v2052_v19  ;;  %v9069_v50 = vpop.f32.mrb[5].mxu0 }
 0xf1c   :  { %10604 = vtanh.f32 %v10358_v56  ;;  %v2057_v2 = vsub.f32 0.0, %v10358_v56 }
 0xf1e   :  { %v2058_v7 = vmul.f32 1.442695, %v2057_v2 }
 0xf26   :  { %v10605_v60 = vpop.eup %10604 }
 0xf27   :  { %2066 = vrot.lane.b32.xlu0 %v10605_v60, %s10961_s5 }
 0xf29   :  { %v2223_v3 = vpop.f32.mrb[16].mxu1 }
 0xf2a   :  { %v10359_v61 = vadd.f32 %v11258_v38, %v2223_v3  ;;  %v9091_v11 = vpop.f32.mrb[17].mxu1 }
 0xf2c   :  { %10606 = vtanh.f32 %v10359_v61  ;;  %v2228_v59 = vsub.f32 0.0, %v10359_v61 }
 0xf2d   :  { %10608 = vpow2.f32 %v2058_v7 }
 0xf2e   :  { %v2229_v16 = vmul.f32 1.442695, %v2228_v59 }
 0xf30   :  { %10610 = vpow2.f32 %v2229_v16 }
 0xf36   :  { %v10607_v63 = vpop.eup %10606 }
 0xf37   :  { %2237 = vrot.lane.b32.xlu0 %v10607_v63, %s10961_s5  ;;  %v10609_v10 = vpop.eup %10608 }
 0xf38   :  { %v2060_v18 = vadd.f32 1.0, %v10609_v10 }
 0xf3a   :  { %10612 = vrcp.f32 %v2060_v18  ;;  %v10611_v22 = vpop.eup %10610 }
 0xf3b   :  { %v2231_v27 = vadd.f32 1.0, %v10611_v22 }
 0xf3d   :  { %10614 = vrcp.f32 %v2231_v27  ;;  %v2936_v27 = vld [vmem:[%s12467_s7] sm:$0xff] }
 0xf44   :  { %v10613_v24 = vpop.eup %10612 }
 0xf45   :  { %v2064_v35 = vmul.f32 %v10613_v24, %v11517_v44 }
 0xf47   :  { %v10615_v30 = vpop.eup %10614 }
 0xf48   :  { %v2235_v40 = vmul.f32 %v10615_v30, %v11522_v48 }
 0xf99   :  { %v2067_v25 = vpop.permute.xlu0 %2066 }
 0xf9a   :  { %v2069_v26 = vmul.f32 %v10613_v24, %v2067_v25 }
 0xf9c   :  { %2071 = vrot.lane.b32.xlu1 %v2069_v26, %s10962_s3 }
 0xfa9   :  { %v2238_v31 = vpop.permute.xlu0 %2237 }
 0xfaa   :  { %v2240_v34 = vmul.f32 %v10615_v30, %v2238_v31 }
 0xfac   :  { %2242 = vrot.lane.b32.xlu0 %v2240_v34, %s10962_s3  ;;  %v2938_v34 = vld [vmem:[%s12467_s7 + $0x10] sm:$0xff] }
0x100e   :  { %v2072_v36 = vpop.permute.xlu1 %2071 }
0x100f   :  { %v11571_v37 = vadd.f32 %v2072_v36, %v2064_v35  ;;  %v2939_v35 = vld [vmem:[%s12467_s7 + $0x18] sm:$0xff] }
0x1011   :  { %10616 = vtanh.f32 %v11571_v37 }
0x101b   :  { %v10617_v39 = vpop.eup %10616 }
0x101c   :  { %2077 = vrot.lane.b32.xlu1 %v10617_v39, %s10961_s5 }
0x101e   :  { %v2243_v41 = vpop.permute.xlu0 %2242 }
0x101f   :  { %v11576_v42 = vadd.f32 %v2243_v41, %v2235_v40  ;;  %v10780_v41 = vld [vmem:[#allocation5] ss:$0 sm:$0xff] }
0x1021   :  { %10618 = vtanh.f32 %v11576_v42 }
0x102b   :  { %v10619_v43 = vpop.eup %10618 }
0x102c   :  { %2248 = vrot.lane.b32.xlu0 %v10619_v43, %s10961_s5 }
0x108e   :  { %v2078_v45 = vpop.permute.xlu1 %2077 }
0x108f   :  { %v2080_v44 = vmul.f32 %v10613_v24, %v2078_v45 }
0x1091   :  { %2324 = vrot.lane.b32.xlu1 %v2080_v44, %s10962_s3 }
0x109e   :  { %v2249_v46 = vpop.permute.xlu0 %2248 }
0x109f   :  { %v2251_v47 = vmul.f32 %v10615_v30, %v2249_v46  ;;  %v2937_v30 = vld [vmem:[%s12467_s7 + $0x8] sm:$0xff]  ;;  %v10781_v46 = vld [vmem:[#allocation7] ss:$0 sm:$0xff] }
0x10a0   :  { %v11642_v31 = vpack.c.bf16 %v2937_v30, %v2936_v27  ;;  %v2942_v27 = vld [vmem:[%s12467_s7 + $0x30] sm:$0xff]  ;;  %v2943_v30 = vld [vmem:[%s12467_s7 + $0x38] sm:$0xff] }
0x10a1   :  { %2495 = vrot.lane.b32.xlu1 %v2251_v47, %s10962_s3 }
0x1103   :  { %v11582_v49 = vpop.permute.xlu1 %2324 }
0x1104   :  { %9112 = vmatmul.mubr.msk.f32.vlgmr.msra.gmra.mrb[6].mxu0 %vm158_vm2, %v11582_v49 }
0x1105   :  { %9878 = vmatpush3.bf16.msra.mxu0 %v11147_v5  ;;  %9144 = vmatprep.mubr.msk.f32.mxu0 %vm10959_vm0, %v10960_v1 }
0x1106   :  { %9879 = vmatprep.subr.bf16.mxu0 %v10958_v0 }
0x1109   :  { %9881 = vmatpush3.bf16.msra.mxu0 %v11155_v8 }
0x110a   :  { %9882 = vmatprep.subr.bf16.mxu0 %v10958_v0 }
0x110c   :  { %9145 = vmatmul.mubr.msk.f32.vlgmr.msra.gmra.mrb[8].mxu0 %vm158_vm2, %v11226_v28 }
0x110d   :  { %9884 = vmatpush3.bf16.msra.mxu0 %v11174_v14  ;;  %9155 = vmatprep.mubr.msk.f32.mxu0 %vm10959_vm0, %v10960_v1 }
0x110e   :  { %9885 = vmatprep.subr.bf16.mxu0 %v10958_v0 }
0x1111   :  { %9887 = vmatpush3.bf16.msra.mxu0 %v11188_v17 }
0x1112   :  { %9900 = vmatprep.subr.bf16.mxu0 %v10958_v0 }
0x1113   :  { %v11600_v5 = vpop.permute.xlu1 %2495 }
0x1114   :  { %9134 = vmatmul.mubr.msk.f32.vlgmr.msra.gmra.mrb[18].mxu1 %vm158_vm2, %v11600_v5 }
0x1115   :  { %9890 = vmatpush3.bf16.msra.mxu1 %v11200_v20  ;;  %9166 = vmatprep.mubr.msk.f32.mxu1 %vm10959_vm0, %v10960_v1 }
0x1116   :  { %9891 = vmatprep.subr.bf16.mxu1 %v10958_v0 }
0x1119   :  { %9893 = vmatpush3.bf16.msra.mxu1 %v11211_v23 }
0x111a   :  { %9894 = vmatprep.subr.bf16.mxu1 %v10958_v0 }
0x111c   :  { %9167 = vmatmul.mubr.msk.f32.vlgmr.msra.gmra.mrb[20].mxu1 %vm158_vm2, %v11172_v13 }
0x111d   :  { %9896 = vmatpush3.bf16.msra.mxu1 %v11228_v29  ;;  %9177 = vmatprep.mubr.msk.f32.mxu1 %vm10959_vm0, %v10960_v1 }
0x111e   :  { %9897 = vmatprep.subr.bf16.mxu1 %v10958_v0 }
0x1121   :  { %9899 = vmatpush3.bf16.msra.mxu1 %v11240_v32 }
0x1122   :  { %9918 = vmatprep.subr.bf16.mxu1 %v10958_v0 }
0x11d7   :  { %v2394_v8 = vpop.f32.mrb[6].mxu0 }
0x11d8   :  { %v10360_v14 = vadd.f32 %v11254_v33, %v2394_v8  ;;  %v9113_v17 = vpop.f32.mrb[7].mxu0 }
0x11da   :  { %10620 = vtanh.f32 %v10360_v14  ;;  %v2399_v48 = vsub.f32 0.0, %v10360_v14 }
0x11dc   :  { %v2400_v32 = vmul.f32 1.442695, %v2399_v48 }
0x11e4   :  { %v10621_v20 = vpop.eup %10620 }
0x11e5   :  { %2408 = vrot.lane.b32.xlu0 %v10621_v20, %s10961_s5 }
0x11e7   :  { %v2565_v13 = vpop.f32.mrb[18].mxu1 }
0x11e8   :  { %v10361_v23 = vadd.f32 %v11258_v38, %v2565_v13  ;;  %v9135_v28 = vpop.f32.mrb[19].mxu1 }
0x11ea   :  { %10622 = vtanh.f32 %v10361_v23  ;;  %v2570_v53 = vsub.f32 0.0, %v10361_v23 }
0x11eb   :  { %10624 = vpow2.f32 %v2400_v32 }
0x11ec   :  { %v2571_v54 = vmul.f32 1.442695, %v2570_v53 }
0x11ee   :  { %10626 = vpow2.f32 %v2571_v54 }
0x11f4   :  { %v10623_v29 = vpop.eup %10622 }
0x11f5   :  { %2579 = vrot.lane.b32.xlu0 %v10623_v29, %s10961_s5  ;;  %v10625_v51 = vpop.eup %10624 }
0x11f6   :  { %v2402_v33 = vadd.f32 1.0, %v10625_v51 }
0x11f8   :  { %10628 = vrcp.f32 %v2402_v33  ;;  %v10627_v57 = vpop.eup %10626 }
0x11f9   :  { %v2573_v60 = vadd.f32 1.0, %v10627_v57 }
0x11fb   :  { %10630 = vrcp.f32 %v2573_v60 }
0x1202   :  { %v10629_v19 = vpop.eup %10628 }
0x1203   :  { %v2406_v11 = vmul.f32 %v10629_v19, %v11571_v37  ;;  %v11655_v37 = vpack.c.bf16 %v2939_v35, %v2938_v34  ;;  %v11716_v35 = vpack.c.bf16 %v2943_v30, %v2942_v27 }
0x1205   :  { %v10631_v38 = vpop.eup %10630 }
0x1206   :  { %v2577_v59 = vmul.f32 %v10631_v38, %v11576_v42 }
0x1257   :  { %v2409_v56 = vpop.permute.xlu0 %2408 }
0x1258   :  { %v2411_v50 = vmul.f32 %v10629_v19, %v2409_v56 }
0x125a   :  { %2413 = vrot.lane.b32.xlu1 %v2411_v50, %s10962_s3 }
0x1267   :  { %v2580_v3 = vpop.permute.xlu0 %2579 }
0x1268   :  { %v2582_v61 = vmul.f32 %v10631_v38, %v2580_v3 }
0x126a   :  { %2584 = vrot.lane.b32.xlu0 %v2582_v61, %s10962_s3 }
0x12cc   :  { %v2414_v63 = vpop.permute.xlu1 %2413 }
0x12cd   :  { %v11625_v2 = vadd.f32 %v2414_v63, %v2406_v11  ;;  %v2949_v63 = vld [vmem:[%s12470_s10] sm:$0xff] }
0x12cf   :  { %10632 = vtanh.f32 %v11625_v2 }
0x12d9   :  { %v10633_v7 = vpop.eup %10632 }
0x12da   :  { %2419 = vrot.lane.b32.xlu1 %v10633_v7, %s10961_s5  ;;  %v2950_v7 = vld [vmem:[%s12470_s10 + $0x8] sm:$0xff] }
0x12dc   :  { %v2585_v10 = vpop.permute.xlu0 %2584 }
0x12dd   :  { %v11630_v16 = vadd.f32 %v2585_v10, %v2577_v59  ;;  %v11688_v59 = vpack.c.bf16 %v2950_v7, %v2949_v63  ;;  %v2952_v10 = vld [vmem:[%s12470_s10 + $0x18] sm:$0xff] }
0x12df   :  { %10634 = vtanh.f32 %v11630_v16 }
0x12e9   :  { %v10635_v18 = vpop.eup %10634 }
0x12ea   :  { %2590 = vrot.lane.b32.xlu0 %v10635_v18, %s10961_s5 }
0x134c   :  { %v2420_v22 = vpop.permute.xlu1 %2419 }
0x134d   :  { %v2422_v24 = vmul.f32 %v10629_v19, %v2420_v22  ;;  %v2940_v22 = vld [vmem:[%s12467_s7 + $0x20] sm:$0xff] }
0x134f   :  { %2666 = vrot.lane.b32.xlu1 %v2422_v24, %s10962_s3  ;;  %v2941_v24 = vld [vmem:[%s12467_s7 + $0x28] sm:$0xff] }
0x135c   :  { %v2591_v25 = vpop.permute.xlu0 %2590 }
0x135d   :  { %v2593_v26 = vmul.f32 %v10631_v38, %v2591_v25  ;;  %v11706_v25 = vpack.c.bf16 %v2941_v24, %v2940_v22 }
0x135f   :  { %2837 = vrot.lane.b32.xlu1 %v2593_v26, %s10962_s3 }
0x13c1   :  { %v11650_v36 = vpop.permute.xlu1 %2666 }
0x13c2   :  { %9156 = vmatmul.mubr.msk.f32.vlgmr.msra.gmra.mrb[8].mxu0 %vm158_vm2, %v11650_v36 }
0x13c3   :  { %9902 = vmatpush3.bf16.msra.mxu0 %v11642_v31  ;;  %9188 = vmatprep.mubr.msk.f32.mxu0 %vm10959_vm0, %v10960_v1 }
0x13c4   :  { %9903 = vmatprep.subr.bf16.mxu0 %v10958_v0 }
0x13c7   :  { %9905 = vmatpush3.bf16.msra.mxu0 %v11655_v37 }
0x13c8   :  { %9906 = vmatprep.subr.bf16.mxu0 %v10958_v0 }
0x13ca   :  { %9189 = vmatmul.mubr.msk.f32.vlgmr.msra.gmra.mrb[10].mxu0 %vm158_vm2, %v11287_v15 }
0x13cb   :  { %9199 = vmatprep.mubr.msk.f32.mxu0 %vm10959_vm0, %v10960_v1  ;;  %9908 = vmatpush3.bf16.msra.mxu0 %v11706_v25 }
0x13cc   :  { %9909 = vmatprep.subr.bf16.mxu0 %v10958_v0 }
0x13cf   :  { %9911 = vmatpush3.bf16.msra.mxu0 %v11716_v35 }
0x13d0   :  { %9912 = vmatprep.subr.bf16.mxu0 %v10958_v0 }
0x13d1   :  { %v11666_v39 = vpop.permute.xlu1 %2837 }
0x13d2   :  { %9178 = vmatmul.mubr.msk.f32.vlgmr.msra.gmra.mrb[20].mxu1 %vm158_vm2, %v11666_v39 }
0x13d3   :  { %9221 = vmatprep.mubr.msk.f32.mxu1 %vm10959_vm0, %v10960_v1  ;;  %9920 = vmatpush3.bf16.msra.mxu1 %v11688_v59 }
0x13d4   :  { %9921 = vmatprep.subr.bf16.mxu1 %v10958_v0 }
0x1495   :  { %v2736_v40 = vpop.f32.mrb[8].mxu0 }
0x1496   :  { %v10362_v42 = vadd.f32 %v10780_v41, %v2736_v40  ;;  %v9157_v43 = vpop.f32.mrb[9].mxu0 }
0x1497   :  { %v2954_v43 = vld [vmem:[%s12470_s10 + $0x28] sm:$0xff] }
0x1498   :  { %10636 = vtanh.f32 %v10362_v42  ;;  %v2741_v17 = vsub.f32 0.0, %v10362_v42  ;;  %v2953_v42 = vld [vmem:[%s12470_s10 + $0x20] sm:$0xff] }
0x149a   :  { %v2742_v20 = vmul.f32 1.442695, %v2741_v17  ;;  %v2958_v17 = vld [vmem:[#allocation10 + $0x8] sm:$0xff] }
0x14a2   :  { %v10637_v45 = vpop.eup %10636 }
0x14a3   :  { %2750 = vrot.lane.b32.xlu0 %v10637_v45, %s10961_s5  ;;  %v11728_v45 = vpack.c.bf16 %v2954_v43, %v2953_v42 }
0x14a5   :  { %v2907_v44 = vpop.f32.mrb[20].mxu1 }
0x14a6   :  { %v10363_v47 = vadd.f32 %v10781_v46, %v2907_v44  ;;  %v9179_v8 = vpop.f32.mrb[21].mxu1  ;;  %v2955_v44 = vld [vmem:[%s12470_s10 + $0x30] sm:$0xff]  ;;  %v2956_v46 = vld [vmem:[%s12470_s10 + $0x38] sm:$0xff] }
0x14a7   :  { %v11741_v8 = vpack.c.bf16 %v2956_v46, %v2955_v44 }
0x14a8   :  { %10638 = vtanh.f32 %v10363_v47  ;;  %v2912_v13 = vsub.f32 0.0, %v10363_v47 }
0x14a9   :  { %10640 = vpow2.f32 %v2742_v20 }
0x14aa   :  { %v2913_v28 = vmul.f32 1.442695, %v2912_v13  ;;  %v2959_v13 = vld [vmem:[#allocation10 + $0x10] sm:$0xff] }
0x14ac   :  { %10642 = vpow2.f32 %v2913_v28 }
0x14b2   :  { %v10639_v14 = vpop.eup %10638 }
0x14b3   :  { %2921 = vrot.lane.b32.xlu0 %v10639_v14, %s10961_s5  ;;  %v10641_v23 = vpop.eup %10640  ;;  %v2957_v14 = vld [vmem:[#allocation10] sm:$0xff] }
0x14b4   :  { %v2744_v29 = vadd.f32 1.0, %v10641_v23  ;;  %v11747_v20 = vpack.c.bf16 %v2958_v17, %v2957_v14  ;;  %v2960_v23 = vld [vmem:[#allocation10 + $0x18] sm:$0xff] }
0x14b5   :  { %v11753_v28 = vpack.c.bf16 %v2960_v23, %v2959_v13 }
0x14b6   :  { %10644 = vrcp.f32 %v2744_v29  ;;  %v10643_v48 = vpop.eup %10642  ;;  %v2944_v29 = vld [vmem:[%s12468_s8] sm:$0xff] }
0x14b7   :  { %v2915_v54 = vadd.f32 1.0, %v10643_v48  ;;  %v2945_v48 = vld [vmem:[%s12468_s8 + $0x8] sm:$0xff] }
0x14b9   :  { %10646 = vrcp.f32 %v2915_v54 }
0x14c0   :  { %v10645_v32 = vpop.eup %10644 }
0x14c1   :  { %v2748_v56 = vmul.f32 %v10645_v32, %v11625_v2  ;;  %v2951_v2 = vld [vmem:[%s12470_s10 + $0x10] sm:$0xff] }
0x14c3   :  { %v10647_v33 = vpop.eup %10646 }
0x14c4   :  { %v2919_v3 = vmul.f32 %v10647_v33, %v11630_v16  ;;  %v11694_v16 = vpack.c.bf16 %v2952_v10, %v2951_v2 }
0x14c6   :  { %9923 = vmatpush3.bf16.msra.mxu1 %v11694_v16 }
0x14c7   :  { %9924 = vmatprep.subr.bf16.mxu1 %v10958_v0 }
0x1515   :  { %v2751_v53 = vpop.permute.xlu0 %2750 }
0x1516   :  { %v2753_v51 = vmul.f32 %v10645_v32, %v2751_v53  ;;  %v2946_v53 = vld [vmem:[%s12468_s8 + $0x10] sm:$0xff] }
0x1518   :  { %2755 = vrot.lane.b32.xlu1 %v2753_v51, %s10962_s3  ;;  %v2947_v51 = vld [vmem:[%s12468_s8 + $0x18] sm:$0xff] }
0x1525   :  { %v2922_v57 = vpop.permute.xlu0 %2921 }
0x1526   :  { %v2924_v19 = vmul.f32 %v10647_v33, %v2922_v57  ;;  %v11835_v57 = vld [vmem:[%s12472_s12] ss:$0 sm:$0xff] }
0x1528   :  { %2926 = vrot.lane.b32.xlu0 %v2924_v19, %s10962_s3 }
0x158a   :  { %v2756_v50 = vpop.permute.xlu1 %2755 }
0x158b   :  { %v2758_v60 = vadd.f32 %v2756_v50, %v2748_v56 }
0x158d   :  { %10648 = vtanh.f32 %v2758_v60  ;;  %v11838_v60 = vld [vmem:[#allocation8] ss:$0 sm:$0xff] }
0x1597   :  { %v10649_v38 = vpop.eup %10648 }
0x1598   :  { %2761 = vrot.lane.b32.xlu1 %v10649_v38, %s10961_s5 }
0x159a   :  { %v2927_v61 = vpop.permute.xlu0 %2926 }
0x159b   :  { %v2929_v11 = vadd.f32 %v2927_v61, %v2919_v3 }
0x159d   :  { %10650 = vtanh.f32 %v2929_v11 }
0x15a7   :  { %v10651_v18 = vpop.eup %10650 }
0x15a8   :  { %2932 = vrot.lane.b32.xlu0 %v10651_v18, %s10961_s5 }
0x160a   :  { %v2762_v26 = vpop.permute.xlu1 %2761 }
0x160b   :  { %v2764_v34 = vmul.f32 %v10645_v32, %v2762_v26  ;;  %v11765_v32 = vpack.c.bf16 %v2945_v48, %v2944_v29 }
0x160d   :  { %3211 = vrot.lane.b32.xlu1 %v2764_v34, %s10962_s3 }
0x161a   :  { %v2933_v40 = vpop.permute.xlu0 %2932 }
0x161b   :  { %v2935_v41 = vmul.f32 %v10647_v33, %v2933_v40  ;;  %v11781_v33 = vpack.c.bf16 %v2947_v51, %v2946_v53 }
0x161d   :  { %3040 = vrot.lane.b32.xlu1 %v2935_v41, %s10962_s3 }
0x167f   :  { %v11736_v47 = vpop.permute.xlu1 %3211 }
0x1680   :  { %9222 = vmatmul.mubr.msk.f32.vlgmr.msra.gmra.mrb[22].mxu1 %vm158_vm2, %v11736_v47 }
0x1681   :  { %9926 = vmatpush3.bf16.msra.mxu1 %v11728_v45  ;;  %9232 = vmatprep.mubr.msk.f32.mxu1 %vm10959_vm0, %v10960_v1 }
0x1682   :  { %9927 = vmatprep.subr.bf16.mxu1 %v10958_v0 }
0x1685   :  { %9929 = vmatpush3.bf16.msra.mxu1 %v11741_v8 }
0x1686   :  { %9930 = vmatprep.subr.bf16.mxu1 %v10958_v0 }
0x1688   :  { %9233 = vmatmul.mubr.msk.f32.vlgmr.msra.gmra.mrb[22].mxu1 %vm158_vm2, %v11310_v21 }
0x1689   :  { %9932 = vmatpush3.bf16.msra.mxu1 %v11747_v20  ;;  %9243 = vmatprep.mubr.msk.f32.mxu1 %vm10959_vm0, %v10960_v1 }
0x168a   :  { %9933 = vmatprep.subr.bf16.mxu1 %v10958_v0 }
0x168d   :  { %9935 = vmatpush3.bf16.msra.mxu1 %v11753_v28 }
0x168e   :  { %9954 = vmatprep.subr.bf16.mxu1 %v10958_v0 }
0x168f   :  { %v11774_v54 = vpop.permute.xlu1 %3040 }
0x1690   :  { %9200 = vmatmul.mubr.msk.f32.vlgmr.msra.gmra.mrb[10].mxu0 %vm158_vm2, %v11774_v54  ;;  %9244 = vmatmul.mubr.f32.vlgmr.msra.gmra.mrb[22].mxu1 %v10960_v1 }
0x1691   :  { %9914 = vmatpush3.bf16.msra.mxu0 %v11765_v32  ;;  %9956 = vmatpush3.bf16.msra.mxu1 %v11688_v59 }
0x1692   :  { %9915 = vmatprep.subr.bf16.mxu0 %v10958_v0  ;;  %9957 = vmatprep.subr.bf16.mxu1 %v10958_v0 }
0x1693   :  { %9287 = vmatprep.mubr.msk.f32.mxu1 %vm10959_vm0, %v10960_v1  ;;  %9210 = vmatprep.mubr.msk.f32.mxu0 %vm10959_vm0, %v10960_v1 }
0x1695   :  { %9917 = vmatpush3.bf16.msra.mxu0 %v11781_v33  ;;  %9959 = vmatpush3.bf16.msra.mxu1 %v11694_v16 }
0x1696   :  { %9936 = vmatprep.subr.bf16.mxu0 %v10958_v0  ;;  %9960 = vmatprep.subr.bf16.mxu1 %v10958_v0 }
0x1698   :  { %9288 = vmatmul.mubr.msk.f32.vlgmr.msra.gmra.mrb[24].mxu1 %vm158_vm2, %v11650_v36  ;;  %9211 = vmatmul.mubr.f32.vlgmr.msra.gmra.mrb[10].mxu0 %v10960_v1 }
0x1699   :  { %9938 = vmatpush3.bf16.msra.mxu0 %v11642_v31  ;;  %9962 = vmatpush3.bf16.msra.mxu1 %v11728_v45 }
0x169a   :  { %9939 = vmatprep.subr.bf16.mxu0 %v10958_v0  ;;  %9963 = vmatprep.subr.bf16.mxu1 %v10958_v0 }
0x169b   :  { %9254 = vmatprep.mubr.msk.f32.mxu0 %vm10959_vm0, %v10960_v1  ;;  %9298 = vmatprep.mubr.msk.f32.mxu1 %vm10959_vm0, %v10960_v1 }
0x169d   :  { %9941 = vmatpush3.bf16.msra.mxu0 %v11655_v37  ;;  %9965 = vmatpush3.bf16.msra.mxu1 %v11741_v8 }
0x169e   :  { %9942 = vmatprep.subr.bf16.mxu0 %v10958_v0  ;;  %9966 = vmatprep.subr.bf16.mxu1 %v10958_v0 }
0x16a0   :  { %9255 = vmatmul.mubr.msk.f32.vlgmr.msra.gmra.mrb[12].mxu0 %vm158_vm2, %v11351_v4  ;;  %9299 = vmatmul.mubr.msk.f32.vlgmr.msra.gmra.mrb[24].mxu1 %vm158_vm2, %v11374_v12 }
0x16a1   :  { %9944 = vmatpush3.bf16.msra.mxu0 %v11706_v25  ;;  %9265 = vmatprep.mubr.msk.f32.mxu0 %vm10959_vm0, %v10960_v1 }
0x16a2   :  { %9945 = vmatprep.subr.bf16.mxu0 %v10958_v0  ;;  %9968 = vmatpush3.bf16.msra.mxu1 %v11747_v20 }
0x16a3   :  { %9969 = vmatprep.subr.bf16.mxu1 %v10958_v0  ;;  %9309 = vmatprep.mubr.msk.f32.mxu1 %vm10959_vm0, %v10960_v1 }
0x16a5   :  { %9947 = vmatpush3.bf16.msra.mxu0 %v11716_v35 }
0x16a6   :  { %9971 = vmatpush3.bf16.msra.mxu1 %v11753_v28  ;;  %9948 = vmatprep.subr.bf16.mxu0 %v10958_v0 }
0x16a7   :  { %9990 = vmatprep.subr.bf16.mxu1 %v10958_v0 }
0x16a8   :  { %9266 = vmatmul.mubr.msk.f32.vlgmr.msra.gmra.mrb[12].mxu0 %vm158_vm2, %v11666_v39 }
0x16a9   :  { %9950 = vmatpush3.bf16.msra.mxu0 %v11765_v32  ;;  %9276 = vmatprep.mubr.msk.f32.mxu0 %vm10959_vm0, %v10960_v1 }
0x16aa   :  { %9951 = vmatprep.subr.bf16.mxu0 %v10958_v0 }
0x16ad   :  { %9953 = vmatpush3.bf16.msra.mxu0 %v11781_v33 }
0x16ae   :  { %9972 = vmatprep.subr.bf16.mxu0 %v10958_v0 }
0x1763   :  { %v3429_v19 = vpop.f32.mrb[22].mxu1 }
0x1764   :  { %v10365_v56 = vadd.f32 %v11835_v57, %v3429_v19  ;;  %v9245_v50 = vpop.f32.mrb[23].mxu1 }
0x1766   :  { %10652 = vtanh.f32 %v10365_v56  ;;  %v3434_v7 = vsub.f32 0.0, %v10365_v56 }
0x1768   :  { %v3435_v2 = vmul.f32 1.442695, %v3434_v7 }
0x176b   :  { %v3181_v38 = vpop.f32.mrb[10].mxu0 }
0x176c   :  { %v10364_v3 = vadd.f32 %v11838_v60, %v3181_v38  ;;  %v9212_v61 = vpop.f32.mrb[11].mxu0 }
0x176e   :  { %10654 = vtanh.f32 %v10364_v3  ;;  %v3186_v10 = vsub.f32 0.0, %v10364_v3 }
0x176f   :  { %10656 = vpow2.f32 %v3435_v2 }
0x1770   :  { %v10653_v11 = vpop.eup %10652  ;;  %v3187_v18 = vmul.f32 1.442695, %v3186_v10 }
0x1771   :  { %3443 = vrot.lane.b32.xlu0 %v10653_v11, %s10961_s5 }
0x1772   :  { %10658 = vpow2.f32 %v3187_v18 }
0x1778   :  { %v10655_v63 = vpop.eup %10654 }
0x1779   :  { %3195 = vrot.lane.b32.xlu0 %v10655_v63, %s10961_s5  ;;  %v10657_v22 = vpop.eup %10656 }
0x177a   :  { %v3437_v24 = vadd.f32 1.0, %v10657_v22 }
0x177c   :  { %10660 = vrcp.f32 %v3437_v24  ;;  %v10659_v26 = vpop.eup %10658 }
0x177d   :  { %v3189_v27 = vadd.f32 1.0, %v10659_v26 }
0x177f   :  { %10662 = vrcp.f32 %v3189_v27 }
0x1786   :  { %v10661_v30 = vpop.eup %10660 }
0x1787   :  { %v3441_v44 = vmul.f32 0.0, %v10661_v30 }
0x1789   :  { %v10663_v41 = vpop.eup %10662 }
0x178a   :  { %v3193_v17 = vmul.f32 0.0, %v10663_v41 }
0x17e3   :  { %v3444_v34 = vpop.permute.xlu0 %3443 }
0x17e4   :  { %v3446_v40 = vmul.f32 %v10661_v30, %v3444_v34 }
0x17e6   :  { %3448 = vrot.lane.b32.xlu1 %v3446_v40, %s10962_s3 }
0x17eb   :  { %v3196_v42 = vpop.permute.xlu0 %3195 }
0x17ec   :  { %v3198_v43 = vmul.f32 %v10663_v41, %v3196_v42 }
0x17ee   :  { %3200 = vrot.lane.b32.xlu0 %v3198_v43, %s10962_s3 }
0x1858   :  { %v3449_v46 = vpop.permute.xlu1 %3448 }
0x1859   :  { %v11845_v14 = vadd.f32 %v3449_v46, %v3441_v44 }
0x185b   :  { %10664 = vtanh.f32 %v11845_v14 }
0x1860   :  { %v3201_v13 = vpop.permute.xlu0 %3200 }
0x1861   :  { %v11848_v23 = vadd.f32 %v3201_v13, %v3193_v17 }
0x1863   :  { %10666 = vtanh.f32 %v11848_v23 }
0x1865   :  { %v10665_v29 = vpop.eup %10664 }
0x1866   :  { %3454 = vrot.lane.b32.xlu1 %v10665_v29, %s10961_s5 }
0x186d   :  { %v10667_v48 = vpop.eup %10666 }
0x186e   :  { %3206 = vrot.lane.b32.xlu0 %v10667_v48, %s10961_s5 }
0x18d8   :  { %v3455_v53 = vpop.permute.xlu1 %3454 }
0x18d9   :  { %v3457_v51 = vmul.f32 %v10661_v30, %v3455_v53 }
0x18db   :  { %3843 = vrot.lane.b32.xlu1 %v3457_v51, %s10962_s3 }
0x18e0   :  { %v3207_v19 = vpop.permute.xlu0 %3206 }
0x18e1   :  { %v3209_v56 = vmul.f32 %v10663_v41, %v3207_v19 }
0x18e3   :  { %3601 = vrot.lane.b32.xlu1 %v3209_v56, %s10962_s3 }
0x194d   :  { %v11855_v50 = vpop.permute.xlu1 %3843 }
0x194e   :  { %9310 = vmatmul.mubr.msk.f32.vlgmr.msra.gmra.mrb[24].mxu1 %vm158_vm2, %v11855_v50 }
0x194f   :  { %9992 = vmatpush3.bf16.msra.mxu1 %v11688_v59  ;;  %9353 = vmatprep.mubr.msk.f32.mxu1 %vm10959_vm0, %v10960_v1 }
0x1950   :  { %9993 = vmatprep.subr.bf16.mxu1 %v10958_v0 }
0x1953   :  { %9995 = vmatpush3.bf16.msra.mxu1 %v11694_v16 }
0x1954   :  { %9996 = vmatprep.subr.bf16.mxu1 %v10958_v0 }
0x1955   :  { %v11865_v38 = vpop.permute.xlu1 %3601 }
0x1956   :  { %9354 = vmatmul.mubr.msk.f32.vlgmr.msra.gmra.mrb[26].mxu1 %vm158_vm2, %v11582_v49  ;;  %9277 = vmatmul.mubr.msk.f32.vlgmr.msra.gmra.mrb[12].mxu0 %vm158_vm2, %v11865_v38 }
0x1957   :  { %9974 = vmatpush3.bf16.msra.mxu0 %v11642_v31  ;;  %9998 = vmatpush3.bf16.msra.mxu1 %v11728_v45 }
0x1958   :  { %9975 = vmatprep.subr.bf16.mxu0 %v10958_v0  ;;  %9999 = vmatprep.subr.bf16.mxu1 %v10958_v0 }
0x1959   :  { %9320 = vmatprep.mubr.msk.f32.mxu0 %vm10959_vm0, %v10960_v1  ;;  %9364 = vmatprep.mubr.msk.f32.mxu1 %vm10959_vm0, %v10960_v1 }
0x195b   :  { %9977 = vmatpush3.bf16.msra.mxu0 %v11655_v37  ;;  %10001 = vmatpush3.bf16.msra.mxu1 %v11741_v8 }
0x195c   :  { %9978 = vmatprep.subr.bf16.mxu0 %v10958_v0  ;;  %10002 = vmatprep.subr.bf16.mxu1 %v10958_v0 }
0x195e   :  { %9321 = vmatmul.mubr.msk.f32.vlgmr.msra.gmra.mrb[14].mxu0 %vm158_vm2, %v11422_v6  ;;  %9365 = vmatmul.mubr.msk.f32.vlgmr.msra.gmra.mrb[26].mxu1 %vm158_vm2, %v11439_v9 }
0x195f   :  { %9980 = vmatpush3.bf16.msra.mxu0 %v11706_v25  ;;  %9331 = vmatprep.mubr.msk.f32.mxu0 %vm10959_vm0, %v10960_v1 }
0x1960   :  { %9981 = vmatprep.subr.bf16.mxu0 %v10958_v0  ;;  %10004 = vmatpush3.bf16.msra.mxu1 %v11747_v20 }
0x1961   :  { %10005 = vmatprep.subr.bf16.mxu1 %v10958_v0  ;;  %9375 = vmatprep.mubr.msk.f32.mxu1 %vm10959_vm0, %v10960_v1 }
0x1963   :  { %9983 = vmatpush3.bf16.msra.mxu0 %v11716_v35 }
0x1964   :  { %10007 = vmatpush3.bf16.msra.mxu1 %v11753_v28  ;;  %9984 = vmatprep.subr.bf16.mxu0 %v10958_v0 }
0x1965   :  { %10026 = vmatprep.subr.bf16.mxu1 %v10958_v0 }
0x1966   :  { %9332 = vmatmul.mubr.msk.f32.vlgmr.msra.gmra.mrb[14].mxu0 %vm158_vm2, %v11600_v5 }
0x1967   :  { %9986 = vmatpush3.bf16.msra.mxu0 %v11765_v32  ;;  %9342 = vmatprep.mubr.msk.f32.mxu0 %vm10959_vm0, %v10960_v1 }
0x1968   :  { %9987 = vmatprep.subr.bf16.mxu0 %v10958_v0 }
0x196b   :  { %9989 = vmatpush3.bf16.msra.mxu0 %v11781_v33 }
0x196c   :  { %10008 = vmatprep.subr.bf16.mxu0 %v10958_v0 }
0x1a21   :  { %v3913_v3 = vpop.f32.mrb[24].mxu1 }
0x1a22   :  { %v10367_v61 = vadd.f32 %v11835_v57, %v3913_v3  ;;  %v9311_v11 = vpop.f32.mrb[25].mxu1 }
0x1a24   :  { %10668 = vtanh.f32 %v10367_v61  ;;  %v3918_v22 = vsub.f32 0.0, %v10367_v61 }
0x1a26   :  { %v3919_v24 = vmul.f32 1.442695, %v3918_v22 }
0x1a29   :  { %v3671_v63 = vpop.f32.mrb[12].mxu0 }
0x1a2a   :  { %v10366_v7 = vadd.f32 %v11838_v60, %v3671_v63  ;;  %v9278_v2 = vpop.f32.mrb[13].mxu0 }
0x1a2c   :  { %10670 = vtanh.f32 %v10366_v7  ;;  %v3676_v26 = vsub.f32 0.0, %v10366_v7 }
0x1a2d   :  { %10672 = vpow2.f32 %v3919_v24 }
0x1a2e   :  { %v10669_v10 = vpop.eup %10668  ;;  %v3677_v27 = vmul.f32 1.442695, %v3676_v26 }
0x1a2f   :  { %3927 = vrot.lane.b32.xlu0 %v10669_v10, %s10961_s5 }
0x1a30   :  { %10674 = vpow2.f32 %v3677_v27 }
0x1a36   :  { %v10671_v18 = vpop.eup %10670 }
0x1a37   :  { %3685 = vrot.lane.b32.xlu0 %v10671_v18, %s10961_s5  ;;  %v10673_v30 = vpop.eup %10672 }
0x1a38   :  { %v3921_v34 = vadd.f32 1.0, %v10673_v30 }
0x1a3a   :  { %10676 = vrcp.f32 %v3921_v34  ;;  %v10675_v40 = vpop.eup %10674 }
0x1a3b   :  { %v3679_v41 = vadd.f32 1.0, %v10675_v40 }
0x1a3d   :  { %10678 = vrcp.f32 %v3679_v41 }
0x1a44   :  { %v10677_v42 = vpop.eup %10676 }
0x1a45   :  { %v3925_v29 = vmul.f32 %v10677_v42, %v11845_v14 }
0x1a47   :  { %v10679_v46 = vpop.eup %10678 }
0x1a48   :  { %v3683_v51 = vmul.f32 %v10679_v46, %v11848_v23 }
0x1aa1   :  { %v3928_v43 = vpop.permute.xlu0 %3927 }
0x1aa2   :  { %v3930_v44 = vmul.f32 %v10677_v42, %v3928_v43 }
0x1aa4   :  { %3932 = vrot.lane.b32.xlu1 %v3930_v44, %s10962_s3 }
0x1aa9   :  { %v3686_v17 = vpop.permute.xlu0 %3685 }
0x1aaa   :  { %v3688_v13 = vmul.f32 %v10679_v46, %v3686_v17 }
0x1aac   :  { %3690 = vrot.lane.b32.xlu0 %v3688_v13, %s10962_s3 }
0x1b16   :  { %v3933_v48 = vpop.permute.xlu1 %3932 }
0x1b17   :  { %v11914_v53 = vadd.f32 %v3933_v48, %v3925_v29 }
0x1b19   :  { %10680 = vtanh.f32 %v11914_v53 }
0x1b1e   :  { %v3691_v19 = vpop.permute.xlu0 %3690 }
0x1b1f   :  { %v11918_v56 = vadd.f32 %v3691_v19, %v3683_v51 }
0x1b21   :  { %10682 = vtanh.f32 %v11918_v56 }
0x1b23   :  { %v10681_v3 = vpop.eup %10680 }
0x1b24   :  { %3938 = vrot.lane.b32.xlu1 %v10681_v3, %s10961_s5 }
0x1b2b   :  { %v10683_v61 = vpop.eup %10682 }
0x1b2c   :  { %3696 = vrot.lane.b32.xlu0 %v10683_v61, %s10961_s5 }
0x1b96   :  { %v3939_v11 = vpop.permute.xlu1 %3938 }
0x1b97   :  { %v3941_v14 = vmul.f32 %v10677_v42, %v3939_v11 }
0x1b99   :  { %4327 = vrot.lane.b32.xlu1 %v3941_v14, %s10962_s3 }
0x1b9e   :  { %v3697_v63 = vpop.permute.xlu0 %3696 }
0x1b9f   :  { %v3699_v7 = vmul.f32 %v10679_v46, %v3697_v63 }
0x1ba1   :  { %4085 = vrot.lane.b32.xlu1 %v3699_v7, %s10962_s3 }
0x1c0b   :  { %v11925_v23 = vpop.permute.xlu1 %4327 }
0x1c0c   :  { %9376 = vmatmul.mubr.msk.f32.vlgmr.msra.gmra.mrb[26].mxu1 %vm158_vm2, %v11925_v23 }
0x1c0d   :  { %10028 = vmatpush3.bf16.msra.mxu1 %v11688_v59  ;;  %9419 = vmatprep.mubr.msk.f32.mxu1 %vm10959_vm0, %v10960_v1 }
0x1c0e   :  { %10029 = vmatprep.subr.bf16.mxu1 %v10958_v0 }
0x1c11   :  { %10031 = vmatpush3.bf16.msra.mxu1 %v11694_v16 }
0x1c12   :  { %10032 = vmatprep.subr.bf16.mxu1 %v10958_v0 }
0x1c13   :  { %v11935_v2 = vpop.permute.xlu1 %4085 }
0x1c14   :  { %9420 = vmatmul.mubr.msk.f32.vlgmr.msra.gmra.mrb[28].mxu1 %vm158_vm2, %v11528_v52  ;;  %9343 = vmatmul.mubr.msk.f32.vlgmr.msra.gmra.mrb[14].mxu0 %vm158_vm2, %v11935_v2 }
0x1c15   :  { %10010 = vmatpush3.bf16.msra.mxu0 %v11642_v31  ;;  %10034 = vmatpush3.bf16.msra.mxu1 %v11728_v45 }
0x1c16   :  { %10011 = vmatprep.subr.bf16.mxu0 %v10958_v0  ;;  %10035 = vmatprep.subr.bf16.mxu1 %v10958_v0 }
0x1c17   :  { %9386 = vmatprep.mubr.msk.f32.mxu0 %vm10959_vm0, %v10960_v1  ;;  %9430 = vmatprep.mubr.msk.f32.mxu1 %vm10959_vm0, %v10960_v1 }
0x1c19   :  { %10013 = vmatpush3.bf16.msra.mxu0 %v11655_v37  ;;  %10037 = vmatpush3.bf16.msra.mxu1 %v11741_v8 }
0x1c1a   :  { %10014 = vmatprep.subr.bf16.mxu0 %v10958_v0  ;;  %10038 = vmatprep.subr.bf16.mxu1 %v10958_v0 }
0x1c1c   :  { %9387 = vmatmul.mubr.msk.f32.vlgmr.msra.gmra.mrb[16].mxu0 %vm158_vm2, %v11474_v62  ;;  %9431 = vmatmul.mubr.msk.f32.vlgmr.msra.gmra.mrb[28].mxu1 %vm158_vm2, %v11492_v55 }
0x1c1d   :  { %10016 = vmatpush3.bf16.msra.mxu0 %v11706_v25  ;;  %9397 = vmatprep.mubr.msk.f32.mxu0 %vm10959_vm0, %v10960_v1 }
0x1c1e   :  { %10017 = vmatprep.subr.bf16.mxu0 %v10958_v0  ;;  %10040 = vmatpush3.bf16.msra.mxu1 %v11747_v20 }
0x1c1f   :  { %10041 = vmatprep.subr.bf16.mxu1 %v10958_v0  ;;  %9441 = vmatprep.mubr.msk.f32.mxu1 %vm10959_vm0, %v10960_v1 }
0x1c21   :  { %10019 = vmatpush3.bf16.msra.mxu0 %v11716_v35 }
0x1c22   :  { %10043 = vmatpush3.bf16.msra.mxu1 %v11753_v28  ;;  %10020 = vmatprep.subr.bf16.mxu0 %v10958_v0 }
0x1c23   :  { %10062 = vmatprep.subr.bf16.mxu1 %v10958_v0 }
0x1c24   :  { %9398 = vmatmul.mubr.msk.f32.vlgmr.msra.gmra.mrb[16].mxu0 %vm158_vm2, %v11546_v58 }
0x1c25   :  { %10022 = vmatpush3.bf16.msra.mxu0 %v11765_v32  ;;  %9408 = vmatprep.mubr.msk.f32.mxu0 %vm10959_vm0, %v10960_v1 }
0x1c26   :  { %10023 = vmatprep.subr.bf16.mxu0 %v10958_v0 }
0x1c29   :  { %10025 = vmatpush3.bf16.msra.mxu0 %v11781_v33 }
0x1c2a   :  { %10044 = vmatprep.subr.bf16.mxu0 %v10958_v0 }
0x1cdf   :  { %v4397_v10 = vpop.f32.mrb[26].mxu1 }
0x1ce0   :  { %v10369_v18 = vadd.f32 %v11835_v57, %v4397_v10  ;;  %v9377_v22 = vpop.f32.mrb[27].mxu1 }
0x1ce2   :  { %10684 = vtanh.f32 %v10369_v18  ;;  %v4402_v40 = vsub.f32 0.0, %v10369_v18 }
0x1ce4   :  { %v4403_v41 = vmul.f32 1.442695, %v4402_v40 }
0x1ce7   :  { %v4155_v24 = vpop.f32.mrb[14].mxu0 }
0x1ce8   :  { %v10368_v26 = vadd.f32 %v11838_v60, %v4155_v24  ;;  %v9344_v27 = vpop.f32.mrb[15].mxu0 }
0x1cea   :  { %10686 = vtanh.f32 %v10368_v26  ;;  %v4160_v42 = vsub.f32 0.0, %v10368_v26 }
0x1ceb   :  { %10688 = vpow2.f32 %v4403_v41 }
0x1cec   :  { %v10685_v30 = vpop.eup %10684  ;;  %v4161_v43 = vmul.f32 1.442695, %v4160_v42 }
0x1ced   :  { %4411 = vrot.lane.b32.xlu0 %v10685_v30, %s10961_s5 }
0x1cee   :  { %10690 = vpow2.f32 %v4161_v43 }
0x1cf4   :  { %v10687_v34 = vpop.eup %10686 }
0x1cf5   :  { %4169 = vrot.lane.b32.xlu0 %v10687_v34, %s10961_s5  ;;  %v10689_v44 = vpop.eup %10688 }
0x1cf6   :  { %v4405_v46 = vadd.f32 1.0, %v10689_v44 }
0x1cf8   :  { %10692 = vrcp.f32 %v4405_v46  ;;  %v10691_v17 = vpop.eup %10690 }
0x1cf9   :  { %v4163_v13 = vadd.f32 1.0, %v10691_v17 }
0x1cfb   :  { %10694 = vrcp.f32 %v4163_v13 }
0x1d02   :  { %v10693_v29 = vpop.eup %10692 }
0x1d03   :  { %v4409_v11 = vmul.f32 %v10693_v29, %v11914_v53 }
0x1d05   :  { %v10695_v19 = vpop.eup %10694 }
0x1d06   :  { %v4167_v7 = vmul.f32 %v10695_v19, %v11918_v56 }
0x1d5f   :  { %v4412_v48 = vpop.permute.xlu0 %4411 }
0x1d60   :  { %v4414_v51 = vmul.f32 %v10693_v29, %v4412_v48 }
0x1d62   :  { %4416 = vrot.lane.b32.xlu1 %v4414_v51, %s10962_s3 }
0x1d67   :  { %v4170_v3 = vpop.permute.xlu0 %4169 }
0x1d68   :  { %v4172_v61 = vmul.f32 %v10695_v19, %v4170_v3 }
0x1d6a   :  { %4174 = vrot.lane.b32.xlu0 %v4172_v61, %s10962_s3 }
0x1dd4   :  { %v4417_v14 = vpop.permute.xlu1 %4416 }
0x1dd5   :  { %v11984_v63 = vadd.f32 %v4417_v14, %v4409_v11 }
0x1dd7   :  { %10696 = vtanh.f32 %v11984_v63 }
0x1ddc   :  { %v4175_v10 = vpop.permute.xlu0 %4174 }
0x1ddd   :  { %v11988_v18 = vadd.f32 %v4175_v10, %v4167_v7 }
0x1ddf   :  { %10698 = vtanh.f32 %v11988_v18 }
0x1de1   :  { %v10697_v22 = vpop.eup %10696 }
0x1de2   :  { %4422 = vrot.lane.b32.xlu1 %v10697_v22, %s10961_s5 }
0x1de9   :  { %v10699_v24 = vpop.eup %10698 }
0x1dea   :  { %4180 = vrot.lane.b32.xlu0 %v10699_v24, %s10961_s5 }
0x1e54   :  { %v4423_v26 = vpop.permute.xlu1 %4422 }
0x1e55   :  { %v4425_v53 = vmul.f32 %v10693_v29, %v4423_v26 }
0x1e57   :  { %4811 = vrot.lane.b32.xlu1 %v4425_v53, %s10962_s3 }
0x1e5c   :  { %v4181_v27 = vpop.permute.xlu0 %4180 }
0x1e5d   :  { %v4183_v30 = vmul.f32 %v10695_v19, %v4181_v27 }
0x1e5f   :  { %4569 = vrot.lane.b32.xlu1 %v4183_v30, %s10962_s3 }
0x1ec9   :  { %v11995_v56 = vpop.permute.xlu1 %4811 }
0x1eca   :  { %9442 = vmatmul.mubr.msk.f32.vlgmr.msra.gmra.mrb[28].mxu1 %vm158_vm2, %v11995_v56 }
0x1ecb   :  { %10064 = vmatpush3.bf16.msra.mxu1 %v11688_v59  ;;  %9485 = vmatprep.mubr.msk.f32.mxu1 %vm10959_vm0, %v10960_v1 }
0x1ecc   :  { %10065 = vmatprep.subr.bf16.mxu1 %v10958_v0 }
0x1ecf   :  { %10067 = vmatpush3.bf16.msra.mxu1 %v11694_v16 }
0x1ed0   :  { %10068 = vmatprep.subr.bf16.mxu1 %v10958_v0 }
0x1ed1   :  { %v12005_v34 = vpop.permute.xlu1 %4569 }
0x1ed2   :  { %9486 = vmatmul.mubr.msk.f32.vlgmr.msra.gmra.mrb[30].mxu1 %vm158_vm2, %v11474_v62  ;;  %9409 = vmatmul.mubr.msk.f32.vlgmr.msra.gmra.mrb[16].mxu0 %vm158_vm2, %v12005_v34 }
0x1ed3   :  { %10046 = vmatpush3.bf16.msra.mxu0 %v11642_v31  ;;  %10070 = vmatpush3.bf16.msra.mxu1 %v11728_v45 }
0x1ed4   :  { %10047 = vmatprep.subr.bf16.mxu0 %v10958_v0  ;;  %10071 = vmatprep.subr.bf16.mxu1 %v10958_v0 }
0x1ed5   :  { %9452 = vmatprep.mubr.msk.f32.mxu0 %vm10959_vm0, %v10960_v1  ;;  %9496 = vmatprep.mubr.msk.f32.mxu1 %vm10959_vm0, %v10960_v1 }
0x1ed7   :  { %10049 = vmatpush3.bf16.msra.mxu0 %v11655_v37  ;;  %10073 = vmatpush3.bf16.msra.mxu1 %v11741_v8 }
0x1ed8   :  { %10050 = vmatprep.subr.bf16.mxu0 %v10958_v0  ;;  %10074 = vmatprep.subr.bf16.mxu1 %v10958_v0 }
0x1eda   :  { %9453 = vmatmul.mubr.msk.f32.vlgmr.msra.gmra.mrb[18].mxu0 %vm158_vm2, %v11528_v52  ;;  %9497 = vmatmul.mubr.msk.f32.vlgmr.msra.gmra.mrb[30].mxu1 %vm158_vm2, %v11546_v58 }
0x1edb   :  { %10052 = vmatpush3.bf16.msra.mxu0 %v11706_v25  ;;  %9463 = vmatprep.mubr.msk.f32.mxu0 %vm10959_vm0, %v10960_v1 }
0x1edc   :  { %10053 = vmatprep.subr.bf16.mxu0 %v10958_v0  ;;  %10076 = vmatpush3.bf16.msra.mxu1 %v11747_v20 }
0x1edd   :  { %10077 = vmatprep.subr.bf16.mxu1 %v10958_v0  ;;  %9507 = vmatprep.mubr.msk.f32.mxu1 %vm10959_vm0, %v10960_v1 }
0x1edf   :  { %10055 = vmatpush3.bf16.msra.mxu0 %v11716_v35 }
0x1ee0   :  { %10079 = vmatpush3.bf16.msra.mxu1 %v11753_v28  ;;  %10056 = vmatprep.subr.bf16.mxu0 %v10958_v0 }
0x1ee1   :  { %10098 = vmatprep.subr.bf16.mxu1 %v10958_v0 }
0x1ee2   :  { %9464 = vmatmul.mubr.msk.f32.vlgmr.msra.gmra.mrb[18].mxu0 %vm158_vm2, %v11492_v55 }
0x1ee3   :  { %10058 = vmatpush3.bf16.msra.mxu0 %v11765_v32  ;;  %9474 = vmatprep.mubr.msk.f32.mxu0 %vm10959_vm0, %v10960_v1 }
0x1ee4   :  { %10059 = vmatprep.subr.bf16.mxu0 %v10958_v0 }
0x1ee7   :  { %10061 = vmatpush3.bf16.msra.mxu0 %v11781_v33 }
0x1ee8   :  { %10080 = vmatprep.subr.bf16.mxu0 %v10958_v0 }
0x1f9d   :  { %v4881_v62 = vpop.f32.mrb[28].mxu1 }
0x1f9e   :  { %v10371_v52 = vadd.f32 %v11835_v57, %v4881_v62  ;;  %v9443_v58 = vpop.f32.mrb[29].mxu1 }
0x1fa0   :  { %10700 = vtanh.f32 %v10371_v52  ;;  %v4886_v44 = vsub.f32 0.0, %v10371_v52 }
0x1fa2   :  { %v4887_v46 = vmul.f32 1.442695, %v4886_v44 }
0x1fa5   :  { %v4639_v40 = vpop.f32.mrb[16].mxu0 }
0x1fa6   :  { %v10370_v41 = vadd.f32 %v11838_v60, %v4639_v40  ;;  %v9410_v55 = vpop.f32.mrb[17].mxu0 }
0x1fa8   :  { %10702 = vtanh.f32 %v10370_v41  ;;  %v4644_v17 = vsub.f32 0.0, %v10370_v41 }
0x1fa9   :  { %10704 = vpow2.f32 %v4887_v46 }
0x1faa   :  { %v10701_v42 = vpop.eup %10700  ;;  %v4645_v13 = vmul.f32 1.442695, %v4644_v17 }
0x1fab   :  { %4895 = vrot.lane.b32.xlu0 %v10701_v42, %s10961_s5 }
0x1fac   :  { %10706 = vpow2.f32 %v4645_v13 }
0x1fb2   :  { %v10703_v43 = vpop.eup %10702 }
0x1fb3   :  { %4653 = vrot.lane.b32.xlu0 %v10703_v43, %s10961_s5  ;;  %v10705_v29 = vpop.eup %10704 }
0x1fb4   :  { %v4889_v48 = vadd.f32 1.0, %v10705_v29 }
0x1fb6   :  { %10708 = vrcp.f32 %v4889_v48  ;;  %v10707_v51 = vpop.eup %10706 }
0x1fb7   :  { %v4647_v19 = vadd.f32 1.0, %v10707_v51 }
0x1fb9   :  { %10710 = vrcp.f32 %v4647_v19 }
0x1fc0   :  { %v10709_v3 = vpop.eup %10708 }
0x1fc1   :  { %v4893_v22 = vmul.f32 %v10709_v3, %v11984_v63 }
0x1fc3   :  { %v10711_v14 = vpop.eup %10710 }
0x1fc4   :  { %v4651_v53 = vmul.f32 %v10711_v14, %v11988_v18 }
0x201d   :  { %v4896_v61 = vpop.permute.xlu0 %4895 }
0x201e   :  { %v4898_v11 = vmul.f32 %v10709_v3, %v4896_v61 }
0x2020   :  { %4900 = vrot.lane.b32.xlu1 %v4898_v11, %s10962_s3 }
0x2025   :  { %v4654_v7 = vpop.permute.xlu0 %4653 }
0x2026   :  { %v4656_v10 = vmul.f32 %v10711_v14, %v4654_v7 }
0x2028   :  { %4658 = vrot.lane.b32.xlu0 %v4656_v10, %s10962_s3 }
0x2092   :  { %v4901_v24 = vpop.permute.xlu1 %4900 }
0x2093   :  { %v12054_v26 = vadd.f32 %v4901_v24, %v4893_v22 }
0x2095   :  { %10712 = vtanh.f32 %v12054_v26 }
0x209a   :  { %v4659_v27 = vpop.permute.xlu0 %4658 }
0x209b   :  { %v12058_v30 = vadd.f32 %v4659_v27, %v4651_v53 }
0x209d   :  { %10714 = vtanh.f32 %v12058_v30 }
0x209f   :  { %v10713_v62 = vpop.eup %10712 }
0x20a0   :  { %4906 = vrot.lane.b32.xlu1 %v10713_v62, %s10961_s5 }
0x20a7   :  { %v10715_v52 = vpop.eup %10714 }
0x20a8   :  { %4664 = vrot.lane.b32.xlu0 %v10715_v52, %s10961_s5 }
0x2112   :  { %v4907_v58 = vpop.permute.xlu1 %4906 }
0x2113   :  { %v4909_v63 = vmul.f32 %v10709_v3, %v4907_v58 }
0x2115   :  { %5295 = vrot.lane.b32.xlu1 %v4909_v63, %s10962_s3 }
0x211a   :  { %v4665_v40 = vpop.permute.xlu0 %4664 }
0x211b   :  { %v4667_v41 = vmul.f32 %v10711_v14, %v4665_v40 }
0x211d   :  { %5053 = vrot.lane.b32.xlu1 %v4667_v41, %s10962_s3 }
0x2187   :  { %v12065_v18 = vpop.permute.xlu1 %5295 }
0x2188   :  { %9508 = vmatmul.mubr.msk.f32.vlgmr.msra.gmra.mrb[30].mxu1 %vm158_vm2, %v12065_v18 }
0x2189   :  { %10100 = vmatpush3.bf16.msra.mxu1 %v11688_v59  ;;  %9551 = vmatprep.mubr.msk.f32.mxu1 %vm10959_vm0, %v10960_v1 }
0x218a   :  { %10101 = vmatprep.subr.bf16.mxu1 %v10958_v0 }
0x218d   :  { %10103 = vmatpush3.bf16.msra.mxu1 %v11694_v16 }
0x218e   :  { %10104 = vmatprep.subr.bf16.mxu1 %v10958_v0 }
0x218f   :  { %v12075_v55 = vpop.permute.xlu1 %5053 }
0x2190   :  { %9552 = vmatmul.mubr.msk.f32.vlgmr.msra.gmra.mrb[32].mxu1 %vm158_vm2, %v11422_v6  ;;  %9475 = vmatmul.mubr.msk.f32.vlgmr.msra.gmra.mrb[18].mxu0 %vm158_vm2, %v12075_v55 }
0x2191   :  { %10082 = vmatpush3.bf16.msra.mxu0 %v11642_v31  ;;  %10106 = vmatpush3.bf16.msra.mxu1 %v11728_v45 }
0x2192   :  { %10083 = vmatprep.subr.bf16.mxu0 %v10958_v0  ;;  %10107 = vmatprep.subr.bf16.mxu1 %v10958_v0 }
0x2193   :  { %9518 = vmatprep.mubr.msk.f32.mxu0 %vm10959_vm0, %v10960_v1  ;;  %9562 = vmatprep.mubr.msk.f32.mxu1 %vm10959_vm0, %v10960_v1 }
0x2195   :  { %10085 = vmatpush3.bf16.msra.mxu0 %v11655_v37  ;;  %10109 = vmatpush3.bf16.msra.mxu1 %v11741_v8 }
0x2196   :  { %10086 = vmatprep.subr.bf16.mxu0 %v10958_v0  ;;  %10110 = vmatprep.subr.bf16.mxu1 %v10958_v0 }
0x2198   :  { %9519 = vmatmul.mubr.msk.f32.vlgmr.msra.gmra.mrb[20].mxu0 %vm158_vm2, %v11582_v49  ;;  %9563 = vmatmul.mubr.msk.f32.vlgmr.msra.gmra.mrb[32].mxu1 %vm158_vm2, %v11600_v5 }
0x2199   :  { %10088 = vmatpush3.bf16.msra.mxu0 %v11706_v25  ;;  %9529 = vmatprep.mubr.msk.f32.mxu0 %vm10959_vm0, %v10960_v1 }
0x219a   :  { %10089 = vmatprep.subr.bf16.mxu0 %v10958_v0  ;;  %10112 = vmatpush3.bf16.msra.mxu1 %v11747_v20 }
0x219b   :  { %10113 = vmatprep.subr.bf16.mxu1 %v10958_v0  ;;  %9573 = vmatprep.mubr.msk.f32.mxu1 %vm10959_vm0, %v10960_v1 }
0x219d   :  { %10091 = vmatpush3.bf16.msra.mxu0 %v11716_v35 }
0x219e   :  { %10115 = vmatpush3.bf16.msra.mxu1 %v11753_v28  ;;  %10092 = vmatprep.subr.bf16.mxu0 %v10958_v0 }
0x219f   :  { %10134 = vmatprep.subr.bf16.mxu1 %v10958_v0 }
0x21a0   :  { %9530 = vmatmul.mubr.msk.f32.vlgmr.msra.gmra.mrb[20].mxu0 %vm158_vm2, %v11439_v9 }
0x21a1   :  { %10094 = vmatpush3.bf16.msra.mxu0 %v11765_v32  ;;  %9540 = vmatprep.mubr.msk.f32.mxu0 %vm10959_vm0, %v10960_v1 }
0x21a2   :  { %10095 = vmatprep.subr.bf16.mxu0 %v10958_v0 }
0x21a5   :  { %10097 = vmatpush3.bf16.msra.mxu0 %v11781_v33 }
0x21a6   :  { %10116 = vmatprep.subr.bf16.mxu0 %v10958_v0 }
0x225b   :  { %v5365_v6 = vpop.f32.mrb[30].mxu1 }
0x225c   :  { %v10373_v49 = vadd.f32 %v11835_v57, %v5365_v6  ;;  %v9509_v5 = vpop.f32.mrb[31].mxu1 }
0x225e   :  { %10716 = vtanh.f32 %v10373_v49  ;;  %v5370_v17 = vsub.f32 0.0, %v10373_v49 }
0x2260   :  { %v5371_v13 = vmul.f32 1.442695, %v5370_v17 }
0x2263   :  { %v5123_v42 = vpop.f32.mrb[18].mxu0 }
0x2264   :  { %v10372_v43 = vadd.f32 %v11838_v60, %v5123_v42  ;;  %v9476_v9 = vpop.f32.mrb[19].mxu0 }
0x2266   :  { %10718 = vtanh.f32 %v10372_v43  ;;  %v5128_v29 = vsub.f32 0.0, %v10372_v43 }
0x2267   :  { %10720 = vpow2.f32 %v5371_v13 }
0x2268   :  { %v10717_v44 = vpop.eup %10716  ;;  %v5129_v48 = vmul.f32 1.442695, %v5128_v29 }
0x2269   :  { %5379 = vrot.lane.b32.xlu0 %v10717_v44, %s10961_s5 }
0x226a   :  { %10722 = vpow2.f32 %v5129_v48 }
0x2270   :  { %v10719_v46 = vpop.eup %10718 }
0x2271   :  { %5137 = vrot.lane.b32.xlu0 %v10719_v46, %s10961_s5  ;;  %v10721_v51 = vpop.eup %10720 }
0x2272   :  { %v5373_v19 = vadd.f32 1.0, %v10721_v51 }
0x2274   :  { %10724 = vrcp.f32 %v5373_v19  ;;  %v10723_v3 = vpop.eup %10722 }
0x2275   :  { %v5131_v61 = vadd.f32 1.0, %v10723_v3 }
0x2277   :  { %10726 = vrcp.f32 %v5131_v61 }
0x227e   :  { %v10725_v11 = vpop.eup %10724 }
0x227f   :  { %v5377_v53 = vmul.f32 %v10725_v11, %v12054_v26 }
0x2281   :  { %v10727_v10 = vpop.eup %10726 }
0x2282   :  { %v5135_v52 = vmul.f32 %v10727_v10, %v12058_v30 }
0x22db   :  { %v5380_v14 = vpop.permute.xlu0 %5379 }
0x22dc   :  { %v5382_v7 = vmul.f32 %v10725_v11, %v5380_v14 }
0x22de   :  { %5384 = vrot.lane.b32.xlu1 %v5382_v7, %s10962_s3 }
0x22e3   :  { %v5138_v22 = vpop.permute.xlu0 %5137 }
0x22e4   :  { %v5140_v24 = vmul.f32 %v10727_v10, %v5138_v22 }
0x22e6   :  { %5142 = vrot.lane.b32.xlu0 %v5140_v24, %s10962_s3 }
0x2350   :  { %v5385_v27 = vpop.permute.xlu1 %5384 }
0x2351   :  { %v12124_v62 = vadd.f32 %v5385_v27, %v5377_v53 }
0x2353   :  { %10728 = vtanh.f32 %v12124_v62 }
0x2358   :  { %v5143_v58 = vpop.permute.xlu0 %5142 }
0x2359   :  { %v12128_v63 = vadd.f32 %v5143_v58, %v5135_v52 }
0x235b   :  { %10730 = vtanh.f32 %v12128_v63 }
0x235d   :  { %v10729_v40 = vpop.eup %10728 }
0x235e   :  { %5390 = vrot.lane.b32.xlu1 %v10729_v40, %s10961_s5 }
0x2365   :  { %v10731_v41 = vpop.eup %10730 }
0x2366   :  { %5148 = vrot.lane.b32.xlu0 %v10731_v41, %s10961_s5 }
0x23d0   :  { %v5391_v6 = vpop.permute.xlu1 %5390 }
0x23d1   :  { %v5393_v26 = vmul.f32 %v10725_v11, %v5391_v6 }
0x23d3   :  { %5779 = vrot.lane.b32.xlu1 %v5393_v26, %s10962_s3 }
0x23d8   :  { %v5149_v49 = vpop.permute.xlu0 %5148 }
0x23d9   :  { %v5151_v5 = vmul.f32 %v10727_v10, %v5149_v49 }
0x23db   :  { %5537 = vrot.lane.b32.xlu1 %v5151_v5, %s10962_s3 }
0x2445   :  { %v12135_v30 = vpop.permute.xlu1 %5779 }
0x2446   :  { %9574 = vmatmul.mubr.msk.f32.vlgmr.msra.gmra.mrb[32].mxu1 %vm158_vm2, %v12135_v30 }
0x2447   :  { %10136 = vmatpush3.bf16.msra.mxu1 %v11688_v59  ;;  %9617 = vmatprep.mubr.msk.f32.mxu1 %vm10959_vm0, %v10960_v1 }
0x2448   :  { %10137 = vmatprep.subr.bf16.mxu1 %v10958_v0 }
0x244b   :  { %10139 = vmatpush3.bf16.msra.mxu1 %v11694_v16 }
0x244c   :  { %10140 = vmatprep.subr.bf16.mxu1 %v10958_v0 }
0x244d   :  { %v12145_v42 = vpop.permute.xlu1 %5537 }
0x244e   :  { %9618 = vmatmul.mubr.msk.f32.vlgmr.msra.gmra.mrb[34].mxu1 %vm158_vm2, %v11351_v4  ;;  %9541 = vmatmul.mubr.msk.f32.vlgmr.msra.gmra.mrb[20].mxu0 %vm158_vm2, %v12145_v42 }
0x244f   :  { %10118 = vmatpush3.bf16.msra.mxu0 %v11642_v31  ;;  %10142 = vmatpush3.bf16.msra.mxu1 %v11728_v45 }
0x2450   :  { %10119 = vmatprep.subr.bf16.mxu0 %v10958_v0  ;;  %10143 = vmatprep.subr.bf16.mxu1 %v10958_v0 }
0x2451   :  { %9584 = vmatprep.mubr.msk.f32.mxu0 %vm10959_vm0, %v10960_v1  ;;  %9628 = vmatprep.mubr.msk.f32.mxu1 %vm10959_vm0, %v10960_v1 }
0x2453   :  { %10121 = vmatpush3.bf16.msra.mxu0 %v11655_v37  ;;  %10145 = vmatpush3.bf16.msra.mxu1 %v11741_v8 }
0x2454   :  { %10122 = vmatprep.subr.bf16.mxu0 %v10958_v0  ;;  %10146 = vmatprep.subr.bf16.mxu1 %v10958_v0 }
0x2456   :  { %9585 = vmatmul.mubr.msk.f32.vlgmr.msra.gmra.mrb[22].mxu0 %vm158_vm2, %v11650_v36  ;;  %9629 = vmatmul.mubr.msk.f32.vlgmr.msra.gmra.mrb[34].mxu1 %vm158_vm2, %v11666_v39 }
0x2457   :  { %10124 = vmatpush3.bf16.msra.mxu0 %v11706_v25  ;;  %9595 = vmatprep.mubr.msk.f32.mxu0 %vm10959_vm0, %v10960_v1 }
0x2458   :  { %10125 = vmatprep.subr.bf16.mxu0 %v10958_v0  ;;  %10148 = vmatpush3.bf16.msra.mxu1 %v11747_v20 }
0x2459   :  { %10149 = vmatprep.subr.bf16.mxu1 %v10958_v0  ;;  %9639 = vmatprep.mubr.msk.f32.mxu1 %vm10959_vm0, %v10960_v1 }
0x245b   :  { %10127 = vmatpush3.bf16.msra.mxu0 %v11716_v35 }
0x245c   :  { %10151 = vmatpush3.bf16.msra.mxu1 %v11753_v28  ;;  %10128 = vmatprep.subr.bf16.mxu0 %v10958_v0 }
0x245d   :  { %10170 = vmatprep.subr.bf16.mxu1 %v10958_v0 }
0x245e   :  { %9596 = vmatmul.mubr.msk.f32.vlgmr.msra.gmra.mrb[22].mxu0 %vm158_vm2, %v11374_v12 }
0x245f   :  { %10130 = vmatpush3.bf16.msra.mxu0 %v11765_v32  ;;  %9606 = vmatprep.mubr.msk.f32.mxu0 %vm10959_vm0, %v10960_v1 }
0x2460   :  { %10131 = vmatprep.subr.bf16.mxu0 %v10958_v0 }
0x2463   :  { %10133 = vmatpush3.bf16.msra.mxu0 %v11781_v33 }
0x2464   :  { %10152 = vmatprep.subr.bf16.mxu0 %v10958_v0 }
0x2519   :  { %v5849_v4 = vpop.f32.mrb[32].mxu1 }
0x251a   :  { %v10375_v36 = vadd.f32 %v11835_v57, %v5849_v4  ;;  %v9575_v39 = vpop.f32.mrb[33].mxu1 }
0x251c   :  { %10732 = vtanh.f32 %v10375_v36  ;;  %v5854_v17 = vsub.f32 0.0, %v10375_v36 }
0x251e   :  { %v5855_v13 = vmul.f32 1.442695, %v5854_v17 }
0x2521   :  { %v5607_v43 = vpop.f32.mrb[20].mxu0 }
0x2522   :  { %v10374_v9 = vadd.f32 %v11838_v60, %v5607_v43  ;;  %v9542_v12 = vpop.f32.mrb[21].mxu0 }
0x2524   :  { %10734 = vtanh.f32 %v10374_v9  ;;  %v5612_v29 = vsub.f32 0.0, %v10374_v9 }
0x2525   :  { %10736 = vpow2.f32 %v5855_v13 }
0x2526   :  { %v10733_v44 = vpop.eup %10732  ;;  %v5613_v48 = vmul.f32 1.442695, %v5612_v29 }
0x2527   :  { %5863 = vrot.lane.b32.xlu0 %v10733_v44, %s10961_s5 }
0x2528   :  { %10738 = vpow2.f32 %v5613_v48 }
0x252e   :  { %v10735_v46 = vpop.eup %10734 }
0x252f   :  { %5621 = vrot.lane.b32.xlu0 %v10735_v46, %s10961_s5  ;;  %v10737_v57 = vpop.eup %10736 }
0x2530   :  { %v5857_v51 = vadd.f32 1.0, %v10737_v57 }
0x2532   :  { %10740 = vrcp.f32 %v5857_v51  ;;  %v10739_v19 = vpop.eup %10738 }
0x2533   :  { %v5615_v3 = vadd.f32 1.0, %v10739_v19 }
0x2535   :  { %10742 = vrcp.f32 %v5615_v3  ;;  %v6848_v3 = vld [vmem:[#allocation11 + $0x8] sm:$0xff] }
0x253c   :  { %v10741_v60 = vpop.eup %10740 }
0x253d   :  { %v5861_v22 = vmul.f32 %v10741_v60, %v12124_v62 }
0x253f   :  { %v10743_v14 = vpop.eup %10742 }
0x2540   :  { %v5619_v27 = vmul.f32 %v10743_v14, %v12128_v63 }
0x2599   :  { %v5864_v61 = vpop.permute.xlu0 %5863 }
0x259a   :  { %v5866_v11 = vmul.f32 %v10741_v60, %v5864_v61 }
0x259c   :  { %5868 = vrot.lane.b32.xlu1 %v5866_v11, %s10962_s3 }
0x25a1   :  { %v5622_v7 = vpop.permute.xlu0 %5621 }
0x25a2   :  { %v5624_v10 = vmul.f32 %v10743_v14, %v5622_v7 }
0x25a4   :  { %5626 = vrot.lane.b32.xlu0 %v5624_v10, %s10962_s3 }
0x260e   :  { %v5869_v24 = vpop.permute.xlu1 %5868 }
0x260f   :  { %v12194_v53 = vadd.f32 %v5869_v24, %v5861_v22  ;;  %v6847_v24 = vld [vmem:[#allocation11] sm:$0xff] }
0x2611   :  { %10744 = vtanh.f32 %v12194_v53 }
0x2616   :  { %v5627_v52 = vpop.permute.xlu0 %5626 }
0x2617   :  { %v12198_v58 = vadd.f32 %v5627_v52, %v5619_v27  ;;  %v6852_v27 = vld [vmem:[#allocation11 + $0x28] sm:$0xff]  ;;  %v6854_v52 = vld [vmem:[#allocation11 + $0x38] sm:$0xff] }
0x2619   :  { %10746 = vtanh.f32 %v12198_v58 }
0x261b   :  { %v10745_v40 = vpop.eup %10744 }
0x261c   :  { %5874 = vrot.lane.b32.xlu1 %v10745_v40, %s10961_s5  ;;  %v10192_v40 = vpack.c.bf16 %v6854_v52, %v6852_v27  ;;  %v7028_v27 = vld [vmem:[#allocation11 + $0x98] sm:$0xff] }
0x2623   :  { %v10747_v41 = vpop.eup %10746 }
0x2624   :  { %5632 = vrot.lane.b32.xlu0 %v10747_v41, %s10961_s5  ;;  %v6851_v41 = vld [vmem:[#allocation11 + $0x20] sm:$0xff] }
0x268e   :  { %v5875_v6 = vpop.permute.xlu1 %5874 }
0x268f   :  { %v5877_v62 = vmul.f32 %v10741_v60, %v5875_v6  ;;  %v6850_v60 = vld [vmem:[#allocation11 + $0x18] sm:$0xff]  ;;  %v6853_v6 = vld [vmem:[#allocation11 + $0x30] sm:$0xff] }
0x2690   :  { %v10188_v61 = vpack.c.bf16 %v6850_v60, %v6848_v3  ;;  %v6941_v3 = vld [vmem:[#allocation11 + $0x50] sm:$0xff]  ;;  %v6944_v60 = vld [vmem:[#allocation11 + $0x68] sm:$0xff] }
0x2691   :  { %6263 = vrot.lane.b32.xlu1 %v5877_v62, %s10962_s3 }
0x2696   :  { %v5633_v26 = vpop.permute.xlu0 %5632 }
0x2697   :  { %v5635_v49 = vmul.f32 %v10743_v14, %v5633_v26  ;;  %v10194_v26 = vpack.c.bf16 %v6853_v6, %v6851_v41 }
0x2699   :  { %6021 = vrot.lane.b32.xlu1 %v5635_v49, %s10962_s3 }
0x2703   :  { %v12205_v63 = vpop.permute.xlu1 %6263 }
0x2704   :  { %9640 = vmatmul.mubr.msk.f32.vlgmr.msra.gmra.mrb[34].mxu1 %vm158_vm2, %v12205_v63 }
0x2705   :  { %10172 = vmatpush3.bf16.msra.mxu1 %v11688_v59  ;;  %9683 = vmatprep.mubr.msk.f32.mxu1 %vm10959_vm0, %v10960_v1 }
0x2706   :  { %10173 = vmatprep.subr.bf16.mxu1 %v10958_v0 }
0x2709   :  { %10175 = vmatpush3.bf16.msra.mxu1 %v11694_v16  ;;  %v12261_v16 = vld [vmem:[#allocation8] ss:$0 sm:$0xff] }
0x270a   :  { %10176 = vmatprep.subr.bf16.mxu1 %v10958_v0 }
0x270b   :  { %v12215_v5 = vpop.permute.xlu1 %6021 }
0x270c   :  { %9684 = vmatmul.mubr.msk.f32.vlgmr.msra.gmra.mrb[36].mxu1 %vm158_vm2, %v11287_v15  ;;  %9607 = vmatmul.mubr.msk.f32.vlgmr.msra.gmra.mrb[22].mxu0 %vm158_vm2, %v12215_v5 }
0x270d   :  { %10154 = vmatpush3.bf16.msra.mxu0 %v11642_v31  ;;  %10178 = vmatpush3.bf16.msra.mxu1 %v11728_v45  ;;  %v12258_v31 = vld [vmem:[%s12472_s12] ss:$0 sm:$0xff] }
0x270e   :  { %10155 = vmatprep.subr.bf16.mxu0 %v10958_v0  ;;  %10179 = vmatprep.subr.bf16.mxu1 %v10958_v0 }
0x270f   :  { %9650 = vmatprep.mubr.msk.f32.mxu0 %vm10959_vm0, %v10960_v1  ;;  %9694 = vmatprep.mubr.msk.f32.mxu1 %vm10959_vm0, %v10960_v1 }
0x2711   :  { %10157 = vmatpush3.bf16.msra.mxu0 %v11655_v37  ;;  %10181 = vmatpush3.bf16.msra.mxu1 %v11741_v8 }
0x2712   :  { %10158 = vmatprep.subr.bf16.mxu0 %v10958_v0  ;;  %10182 = vmatprep.subr.bf16.mxu1 %v10958_v0 }
0x2714   :  { %9651 = vmatmul.mubr.msk.f32.vlgmr.msra.gmra.mrb[24].mxu0 %vm158_vm2, %v11736_v47  ;;  %9695 = vmatmul.mubr.msk.f32.vlgmr.msra.gmra.mrb[36].mxu1 %vm158_vm2, %v11774_v54 }
0x2715   :  { %10160 = vmatpush3.bf16.msra.mxu0 %v11706_v25  ;;  %9661 = vmatprep.mubr.msk.f32.mxu0 %vm10959_vm0, %v10960_v1 }
0x2716   :  { %10161 = vmatprep.subr.bf16.mxu0 %v10958_v0  ;;  %10184 = vmatpush3.bf16.msra.mxu1 %v11747_v20 }
0x2717   :  { %10185 = vmatprep.subr.bf16.mxu1 %v10958_v0  ;;  %9705 = vmatprep.mubr.msk.f32.mxu1 %vm10959_vm0, %v10960_v1 }
0x2719   :  { %10163 = vmatpush3.bf16.msra.mxu0 %v11716_v35 }
0x271a   :  { %10187 = vmatpush3.bf16.msra.mxu1 %v11753_v28  ;;  %10164 = vmatprep.subr.bf16.mxu0 %v10958_v0 }
0x271c   :  { %9662 = vmatmul.mubr.msk.f32.vlgmr.msra.gmra.mrb[24].mxu0 %vm158_vm2, %v11310_v21 }
0x271d   :  { %10166 = vmatpush3.bf16.msra.mxu0 %v11765_v32  ;;  %9672 = vmatprep.mubr.msk.f32.mxu0 %vm10959_vm0, %v10960_v1 }
0x271e   :  { %10167 = vmatprep.subr.bf16.mxu0 %v10958_v0 }
0x2721   :  { %10169 = vmatpush3.bf16.msra.mxu0 %v11781_v33 }
0x2722   :  { %10189 = vmatprep.subr.bf16.mxu0 %v10188_v61  ;;  %v6946_v61 = vld [vmem:[#allocation11 + $0x78] sm:$0xff] }
0x27d7   :  { %v6333_v15 = vpop.f32.mrb[34].mxu1 }
0x27d8   :  { %v10377_v37 = vadd.f32 %v12258_v31, %v6333_v15  ;;  %v9641_v59 = vpop.f32.mrb[35].mxu1 }
0x27da   :  { %10748 = vtanh.f32 %v10377_v37  ;;  %v6338_v47 = vsub.f32 0.0, %v10377_v37 }
0x27dc   :  { %v6339_v8 = vmul.f32 1.442695, %v6338_v47 }
0x27df   :  { %v6091_v21 = vpop.f32.mrb[22].mxu0 }
0x27e0   :  { %v10376_v25 = vadd.f32 %v12261_v16, %v6091_v21  ;;  %v9608_v35 = vpop.f32.mrb[23].mxu0 }
0x27e2   :  { %10750 = vtanh.f32 %v10376_v25  ;;  %v6096_v20 = vsub.f32 0.0, %v10376_v25 }
0x27e3   :  { %10752 = vpow2.f32 %v6339_v8 }
0x27e4   :  { %v10749_v0 = vpop.eup %10748  ;;  %v6097_v28 = vmul.f32 1.442695, %v6096_v20 }
0x27e5   :  { %6347 = vrot.lane.b32.xlu0 %v10749_v0, %s10961_s5 }
0x27e6   :  { %10754 = vpow2.f32 %v6097_v28 }
0x27ec   :  { %v10751_v45 = vpop.eup %10750 }
0x27ed   :  { %6105 = vrot.lane.b32.xlu0 %v10751_v45, %s10961_s5  ;;  %v10753_v32 = vpop.eup %10752 }
0x27ee   :  { %v6341_v54 = vadd.f32 1.0, %v10753_v32 }
0x27f0   :  { %10756 = vrcp.f32 %v6341_v54  ;;  %v10755_v33 = vpop.eup %10754 }
0x27f1   :  { %v6099_v4 = vadd.f32 1.0, %v10755_v33 }
0x27f3   :  { %10758 = vrcp.f32 %v6099_v4 }
0x27fa   :  { %v10757_v36 = vpop.eup %10756 }
0x27fb   :  { %v6345_v46 = vmul.f32 %v10757_v36, %v12194_v53  ;;  %v6849_v53 = vld [vmem:[#allocation11 + $0x10] sm:$0xff] }
0x27fd   :  { %v10759_v9 = vpop.eup %10758 }
0x27fe   :  { %v6103_v29 = vmul.f32 %v10759_v9, %v12198_v58  ;;  %v10190_v58 = vpack.c.bf16 %v6849_v53, %v6847_v24  ;;  %v7026_v53 = vld [vmem:[#allocation11 + $0x88] sm:$0xff] }
0x27ff   :  { %v10204_v52 = vpack.c.bf16 %v7028_v27, %v7026_v53 }
0x2857   :  { %v6348_v39 = vpop.permute.xlu0 %6347 }
0x2858   :  { %v6350_v43 = vmul.f32 %v10757_v36, %v6348_v39 }
0x285a   :  { %6352 = vrot.lane.b32.xlu1 %v6350_v43, %s10962_s3 }
0x285f   :  { %v6106_v12 = vpop.permute.xlu0 %6105 }
0x2860   :  { %v6108_v44 = vmul.f32 %v10759_v9, %v6106_v12 }
0x2862   :  { %6110 = vrot.lane.b32.xlu0 %v6108_v44, %s10962_s3 }
0x28cc   :  { %v6353_v17 = vpop.permute.xlu1 %6352 }
0x28cd   :  { %v12269_v13 = vadd.f32 %v6353_v17, %v6345_v46 }
0x28cf   :  { %10760 = vtanh.f32 %v12269_v13 }
0x28d4   :  { %v6111_v48 = vpop.permute.xlu0 %6110 }
0x28d5   :  { %v12273_v57 = vadd.f32 %v6111_v48, %v6103_v29  ;;  %v6940_v29 = vld [vmem:[#allocation11 + $0x48] sm:$0xff]  ;;  %v6942_v48 = vld [vmem:[#allocation11 + $0x58] sm:$0xff] }
0x28d7   :  { %10762 = vtanh.f32 %v12273_v57 }
0x28d9   :  { %v10761_v51 = vpop.eup %10760 }
0x28da   :  { %6358 = vrot.lane.b32.xlu1 %v10761_v51, %s10961_s5  ;;  %v6939_v51 = vld [vmem:[#allocation11 + $0x40] sm:$0xff] }
0x28e1   :  { %v10763_v19 = vpop.eup %10762 }
0x28e2   :  { %6116 = vrot.lane.b32.xlu0 %v10763_v19, %s10961_s5  ;;  %v10196_v19 = vpack.c.bf16 %v6942_v48, %v6940_v29 }
0x294c   :  { %v6359_v11 = vpop.permute.xlu1 %6358 }
0x294d   :  { %v6361_v14 = vmul.f32 %v10757_v36, %v6359_v11 }
0x294f   :  { %6747 = vrot.lane.b32.xlu1 %v6361_v14, %s10962_s3  ;;  %v10198_v14 = vpack.c.bf16 %v6941_v3, %v6939_v51  ;;  %v7029_v51 = vld [vmem:[#allocation11 + $0xa0] sm:$0xff]  ;;  %v8175_v3 = vld [vmem:[%s12475_s15 + $0x48] sm:$0xff] }
0x2954   :  { %v6117_v7 = vpop.permute.xlu0 %6116 }
0x2955   :  { %v6119_v10 = vmul.f32 %v10759_v9, %v6117_v7  ;;  %v10200_v7 = vpack.c.bf16 %v6946_v61, %v6944_v60  ;;  %v7031_v61 = vld [vmem:[#allocation11 + $0xb0] sm:$0xff] }
0x2956   :  { %v10210_v53 = vpack.c.bf16 %v7031_v61, %v7029_v51  ;;  %v7272_v51 = vld [vmem:[#allocation11 + $0x160] sm:$0xff] }
0x2957   :  { %6505 = vrot.lane.b32.xlu1 %v6119_v10, %s10962_s3  ;;  %v6943_v10 = vld [vmem:[#allocation11 + $0x60] sm:$0xff] }
0x29c1   :  { %v12280_v22 = vpop.permute.xlu1 %6747 }
0x29c2   :  { %9706 = vmatmul.mubr.msk.f32.vlgmr.msra.gmra.mrb[36].mxu1 %vm158_vm2, %v12280_v22 }
0x29c9   :  { %v12284_v62 = vpop.permute.xlu1 %6505 }
0x29ca   :  { %9673 = vmatmul.mubr.msk.f32.vlgmr.msra.gmra.mrb[24].mxu0 %vm158_vm2, %v12284_v62 }
0x29cb   :  { %10191 = vmatpush1.bf16.msra.mxu0 %v10190_v58  ;;  %6919 = vmatprep.mubr.f32.mxu0 %v10960_v1 }
0x29cc   :  { %10193 = vmatprep.subr.bf16.mxu0 %v10192_v40 }
0x29cf   :  { %10195 = vmatpush1.bf16.msra.mxu0 %v10194_v26  ;;  %v8182_v26 = vld [vmem:[%s12475_s15 + $0x80] sm:$0xff] }
0x29d0   :  { %10197 = vmatprep.subr.bf16.mxu0 %v10196_v19  ;;  %v8174_v19 = vld [vmem:[%s12475_s15 + $0x40] sm:$0xff] }
0x29d2   :  { %8376 = vmatmul.mubr.msk.f32.vlgmr.msra.gmra.mrb[26].mxu0 %vm158_vm2, %v11865_v38 }
0x29d3   :  { %7016 = vmatprep.mubr.f32.mxu0 %v10960_v1  ;;  %10199 = vmatpush1.bf16.msra.mxu0 %v10198_v14  ;;  %v8192_v14 = vld [vmem:[%s12475_s15 + $0xd0] sm:$0xff] }
0x29d4   :  { %10201 = vmatprep.subr.bf16.mxu0 %v10200_v7  ;;  %v8193_v7 = vld [vmem:[%s12475_s15 + $0xd8] sm:$0xff] }
0x29d5   :  { %v10336_v27 = vpack.c.bf16 %v8193_v7, %v8192_v14  ;;  %v7351_v14 = vld [vmem:[#allocation11 + $0x190] sm:$0xff]  ;;  %v7354_v7 = vld [vmem:[#allocation11 + $0x1a8] sm:$0xff] }
0x2a95   :  { %v6817_v49 = vpop.f32.mrb[36].mxu1 }
0x2a96   :  { %v10379_v15 = vadd.f32 %v12258_v31, %v6817_v49  ;;  %v9707_v37 = vpop.f32.mrb[37].mxu1  ;;  %v8183_v49 = vld [vmem:[%s12475_s15 + $0x88] sm:$0xff] }
0x2a97   :  { %v10316_v37 = vpack.c.bf16 %v8183_v49, %v8182_v26  ;;  %v7111_v26 = vld [vmem:[#allocation11 + $0xe8] sm:$0xff]  ;;  %v7113_v49 = vld [vmem:[#allocation11 + $0xf8] sm:$0xff] }
0x2a98   :  { %10764 = vtanh.f32 %v10379_v15  ;;  %v6822_v45 = vsub.f32 0.0, %v10379_v15  ;;  %v8166_v15 = vld [vmem:[%s12475_s15] sm:$0xff] }
0x2a99   :  { %10317 = vmatprep.subr.bf16.mxu1 %v10316_v37  ;;  %v8195_v37 = vld [vmem:[%s12475_s15 + $0xe8] sm:$0xff] }
0x2a9a   :  { %v6823_v38 = vmul.f32 1.442695, %v6822_v45  ;;  %v8168_v45 = vld [vmem:[%s12475_s15 + $0x10] sm:$0xff] }
0x2a9d   :  { %v6575_v59 = vpop.f32.mrb[24].mxu0 }
0x2a9e   :  { %v10378_v21 = vadd.f32 %v12261_v16, %v6575_v59  ;;  %v9674_v25 = vpop.f32.mrb[25].mxu0  ;;  %v8167_v59 = vld [vmem:[%s12475_s15 + $0x8] sm:$0xff] }
0x2a9f   :  { %v8185_v25 = vld [vmem:[%s12475_s15 + $0x98] sm:$0xff] }
0x2aa0   :  { %10766 = vtanh.f32 %v10378_v21  ;;  %v6580_v47 = vsub.f32 0.0, %v10378_v21  ;;  %v8184_v21 = vld [vmem:[%s12475_s15 + $0x90] sm:$0xff] }
0x2aa1   :  { %10768 = vpow2.f32 %v6823_v38  ;;  %v8169_v38 = vld [vmem:[%s12475_s15 + $0x18] sm:$0xff] }
0x2aa2   :  { %v10765_v35 = vpop.eup %10764  ;;  %v6581_v8 = vmul.f32 1.442695, %v6580_v47  ;;  %v8186_v47 = vld [vmem:[%s12475_s15 + $0xa0] sm:$0xff] }
0x2aa3   :  { %6831 = vrot.lane.b32.xlu0 %v10765_v35, %s10961_s5  ;;  %v10318_v35 = vpack.c.bf16 %v8167_v59, %v8166_v15  ;;  %v8194_v15 = vld [vmem:[%s12475_s15 + $0xe0] sm:$0xff] }
0x2aa4   :  { %10770 = vpow2.f32 %v6581_v8  ;;  %v8187_v8 = vld [vmem:[%s12475_s15 + $0xa8] sm:$0xff] }
0x2aa5   :  { %10319 = vmatpush3.bf16.msra.mxu1 %v10318_v35  ;;  %v7110_v35 = vld [vmem:[#allocation11 + $0xe0] sm:$0xff] }
0x2aaa   :  { %v10767_v0 = vpop.eup %10766 }
0x2aab   :  { %6589 = vrot.lane.b32.xlu0 %v10767_v0, %s10961_s5  ;;  %v10769_v31 = vpop.eup %10768  ;;  %v10320_v0 = vpack.c.bf16 %v8185_v25, %v8184_v21  ;;  %v10216_v25 = vpack.c.bf16 %v7113_v49, %v7111_v26  ;;  %v7437_v26 = vld [vmem:[#allocation11 + $0x1f8] sm:$0xff] }
0x2aac   :  { %v6825_v20 = vadd.f32 1.0, %v10769_v31  ;;  %v10322_v31 = vpack.c.bf16 %v8169_v38, %v8168_v45  ;;  %v10340_v45 = vpack.c.bf16 %v8195_v37, %v8194_v15  ;;  %v7188_v38 = vld [vmem:[#allocation11 + $0x108] sm:$0xff]  ;;  %v7434_v37 = vld [vmem:[#allocation11 + $0x1e0] sm:$0xff] }
0x2aad   :  { %10321 = vmatprep.subr.bf16.mxu1 %v10320_v0  ;;  %v7112_v0 = vld [vmem:[#allocation11 + $0xf0] sm:$0xff] }
0x2aae   :  { %10772 = vrcp.f32 %v6825_v20  ;;  %v10771_v28 = vpop.eup %10770  ;;  %v10324_v20 = vpack.c.bf16 %v8187_v8, %v8186_v47  ;;  %10323 = vmatpush3.bf16.msra.mxu1 %v10322_v31  ;;  %v7190_v47 = vld [vmem:[#allocation11 + $0x118] sm:$0xff]  ;;  %v10218_v8 = vpack.c.bf16 %v7112_v0, %v7110_v35  ;;  %v7511_v0 = vld [vmem:[#allocation11 + $0x200] sm:$0xff] }
0x2aaf   :  { %v6583_v32 = vadd.f32 1.0, %v10771_v28  ;;  %v8170_v28 = vld [vmem:[%s12475_s15 + $0x20] sm:$0xff]  ;;  %v10220_v31 = vpack.c.bf16 %v7190_v47, %v7188_v38  ;;  %v7518_v47 = vld [vmem:[#allocation11 + $0x238] sm:$0xff] }
0x2ab0   :  { %10325 = vmatprep.subr.bf16.mxu1 %v10324_v20  ;;  %v7187_v20 = vld [vmem:[#allocation11 + $0x100] sm:$0xff]  ;;  %v7516_v38 = vld [vmem:[#allocation11 + $0x228] sm:$0xff] }
0x2ab1   :  { %10774 = vrcp.f32 %v6583_v32  ;;  %v8171_v32 = vld [vmem:[%s12475_s15 + $0x28] sm:$0xff] }
0x2ab8   :  { %v10773_v16 = vpop.eup %10772 }
0x2ab9   :  { %v6829_v43 = vmul.f32 %v10773_v16, %v12269_v13  ;;  %v6945_v13 = vld [vmem:[#allocation11 + $0x70] sm:$0xff] }
0x2abb   :  { %v10775_v4 = vpop.eup %10774 }
0x2abc   :  { %v6587_v44 = vmul.f32 %v10775_v4, %v12273_v57  ;;  %v10202_v57 = vpack.c.bf16 %v6945_v13, %v6943_v10  ;;  %v7107_v13 = vld [vmem:[#allocation11 + $0xc8] sm:$0xff] }
0x2abe   :  { %10203 = vmatpush1.bf16.msra.mxu0 %v10202_v57  ;;  %v7109_v57 = vld [vmem:[#allocation11 + $0xd8] sm:$0xff] }
0x2abf   :  { %10205 = vmatprep.subr.bf16.mxu0 %v10204_v52  ;;  %v8176_v52 = vld [vmem:[%s12475_s15 + $0x50] sm:$0xff] }
0x2b15   :  { %v6832_v54 = vpop.permute.xlu0 %6831 }
0x2b16   :  { %v6834_v33 = vmul.f32 %v10773_v16, %v6832_v54  ;;  %v8189_v54 = vld [vmem:[%s12475_s15 + $0xb8] sm:$0xff] }
0x2b18   :  { %6836 = vrot.lane.b32.xlu1 %v6834_v33, %s10962_s3  ;;  %v10326_v33 = vpack.c.bf16 %v8171_v32, %v8170_v28  ;;  %v7189_v28 = vld [vmem:[#allocation11 + $0x110] sm:$0xff]  ;;  %v7192_v32 = vld [vmem:[#allocation11 + $0x128] sm:$0xff] }
0x2b1a   :  { %10327 = vmatpush3.bf16.msra.mxu1 %v10326_v33 }
0x2b1d   :  { %v6590_v36 = vpop.permute.xlu0 %6589 }
0x2b1e   :  { %v6592_v39 = vmul.f32 %v10775_v4, %v6590_v36  ;;  %v8172_v36 = vld [vmem:[%s12475_s15 + $0x30] sm:$0xff] }
0x2b20   :  { %6594 = vrot.lane.b32.xlu0 %v6592_v39, %s10962_s3  ;;  %v8173_v39 = vld [vmem:[%s12475_s15 + $0x38] sm:$0xff] }
0x2b21   :  { %v10330_v29 = vpack.c.bf16 %v8173_v39, %v8172_v36  ;;  %v7193_v36 = vld [vmem:[#allocation11 + $0x130] sm:$0xff]  ;;  %v7269_v39 = vld [vmem:[#allocation11 + $0x148] sm:$0xff] }
0x2b8a   :  { %v6837_v9 = vpop.permute.xlu1 %6836 }
0x2b8b   :  { %v6839_v12 = vadd.f32 %v6837_v9, %v6829_v43  ;;  %v7025_v43 = vld [vmem:[#allocation11 + $0x80] sm:$0xff]  ;;  %v7027_v9 = vld [vmem:[#allocation11 + $0x90] sm:$0xff] }
0x2b8c   :  { %v10206_v48 = vpack.c.bf16 %v7027_v9, %v7025_v43 }
0x2b8d   :  { %10776 = vtanh.f32 %v6839_v12  ;;  %v7030_v12 = vld [vmem:[#allocation11 + $0xa8] sm:$0xff] }
0x2b92   :  { %v6595_v46 = vpop.permute.xlu0 %6594 }
0x2b93   :  { %v6597_v17 = vadd.f32 %v6595_v46, %v6587_v44  ;;  %v7032_v44 = vld [vmem:[#allocation11 + $0xb8] sm:$0xff]  ;;  %v8190_v46 = vld [vmem:[%s12475_s15 + $0xc0] sm:$0xff] }
0x2b94   :  { %v10208_v60 = vpack.c.bf16 %v7032_v44, %v7030_v12  ;;  %v7268_v12 = vld [vmem:[#allocation11 + $0x140] sm:$0xff]  ;;  %v7270_v44 = vld [vmem:[#allocation11 + $0x150] sm:$0xff] }
0x2b95   :  { %10778 = vtanh.f32 %v6597_v17  ;;  %v8191_v17 = vld [vmem:[%s12475_s15 + $0xc8] sm:$0xff] }
0x2b97   :  { %v10777_v11 = vpop.eup %10776 }
0x2b98   :  { %6842 = vrot.lane.b32.xlu1 %v10777_v11, %s10961_s5  ;;  %v10332_v11 = vpack.c.bf16 %v8191_v17, %v8190_v46  ;;  %v7273_v46 = vld [vmem:[#allocation11 + $0x168] sm:$0xff]  ;;  %v7275_v17 = vld [vmem:[#allocation11 + $0x178] sm:$0xff] }
0x2b9f   :  { %v10779_v24 = vpop.eup %10778 }
0x2ba0   :  { %6600 = vrot.lane.b32.xlu0 %v10779_v24, %s10961_s5  ;;  %v10334_v24 = vpack.c.bf16 %v8175_v3, %v8174_v19  ;;  %v7274_v19 = vld [vmem:[#allocation11 + $0x170] sm:$0xff]  ;;  %v7350_v3 = vld [vmem:[#allocation11 + $0x188] sm:$0xff] }
0x2c0a   :  { %v6843_v58 = vpop.permute.xlu1 %6842 }
0x2c0b   :  { %v6845_v40 = vmul.f32 %v10773_v16, %v6843_v58  ;;  %v8188_v16 = vld [vmem:[%s12475_s15 + $0xb0] sm:$0xff]  ;;  %v8177_v58 = vld [vmem:[%s12475_s15 + $0x58] sm:$0xff] }
0x2c0c   :  { %v10338_v59 = vpack.c.bf16 %v8177_v58, %v8176_v52  ;;  %v7433_v52 = vld [vmem:[#allocation11 + $0x1d8] sm:$0xff] }
0x2c0d   :  { %6948 = vrot.lane.b32.xlu1 %v6845_v40, %s10962_s3  ;;  %v10212_v40 = vpack.c.bf16 %v7109_v57, %v7107_v13 }
0x2c12   :  { %v6601_v41 = vpop.permute.xlu0 %6600 }
0x2c13   :  { %v6603_v6 = vmul.f32 %v10775_v4, %v6601_v41  ;;  %v10328_v4 = vpack.c.bf16 %v8189_v54, %v8188_v16  ;;  %v7106_v41 = vld [vmem:[#allocation11 + $0xc0] sm:$0xff]  ;;  %v7194_v16 = vld [vmem:[#allocation11 + $0x138] sm:$0xff]  ;;  %v10222_v54 = vpack.c.bf16 %v7189_v28, %v7187_v20  ;;  %v7517_v28 = vld [vmem:[#allocation11 + $0x230] sm:$0xff] }
0x2c14   :  { %v10224_v33 = vpack.c.bf16 %v7194_v16, %v7192_v32  ;;  %v7515_v20 = vld [vmem:[#allocation11 + $0x220] sm:$0xff]  ;;  %v7593_v32 = vld [vmem:[#allocation11 + $0x248] sm:$0xff]  ;;  %v7595_v16 = vld [vmem:[#allocation11 + $0x258] sm:$0xff] }
0x2c15   :  { %8006 = vrot.lane.b32.xlu1 %v6603_v6, %s10962_s3  ;;  %10329 = vmatprep.subr.bf16.mxu1 %v10328_v4  ;;  %v7108_v6 = vld [vmem:[#allocation11 + $0xd0] sm:$0xff]  ;;  %v7191_v4 = vld [vmem:[#allocation11 + $0x120] sm:$0xff] }
0x2c16   :  { %10331 = vmatpush3.bf16.msra.mxu1 %v10330_v29  ;;  %v10214_v21 = vpack.c.bf16 %v7108_v6, %v7106_v41  ;;  %v10226_v43 = vpack.c.bf16 %v7193_v36, %v7191_v4  ;;  %v10230_v29 = vpack.c.bf16 %v7270_v44, %v7268_v12  ;;  %v7432_v41 = vld [vmem:[#allocation11 + $0x1d0] sm:$0xff]  ;;  %v7435_v6 = vld [vmem:[#allocation11 + $0x1e8] sm:$0xff] }
0x2c17   :  { %10333 = vmatprep.subr.bf16.mxu1 %v10332_v11  ;;  %v7349_v11 = vld [vmem:[#allocation11 + $0x180] sm:$0xff]  ;;  %v10248_v15 = vpack.c.bf16 %v7437_v26, %v7435_v6  ;;  %v7594_v4 = vld [vmem:[#allocation11 + $0x250] sm:$0xff]  ;;  %v7597_v36 = vld [vmem:[#allocation11 + $0x268] sm:$0xff] }
0x2c18   :  { %v10238_v13 = vpack.c.bf16 %v7351_v14, %v7349_v11  ;;  %v7598_v12 = vld [vmem:[#allocation11 + $0x270] sm:$0xff]  ;;  %v7674_v44 = vld [vmem:[#allocation11 + $0x288] sm:$0xff]  ;;  %v7757_v14 = vld [vmem:[#allocation11 + $0x2d8] sm:$0xff] }
0x2c19   :  { %v7755_v11 = vld [vmem:[#allocation11 + $0x2c8] sm:$0xff]  ;;  %v7835_v6 = vld [vmem:[#allocation11 + $0x300] sm:$0xff]  ;;  %v7837_v26 = vld [vmem:[#allocation11 + $0x310] sm:$0xff] }
0x2c1a   :  { %10335 = vmatpush3.bf16.msra.mxu1 %v10334_v24  ;;  %v7353_v24 = vld [vmem:[#allocation11 + $0x1a0] sm:$0xff] }
0x2c1b   :  { %10337 = vmatprep.subr.bf16.mxu1 %v10336_v27  ;;  %v7431_v27 = vld [vmem:[#allocation11 + $0x1c8] sm:$0xff] }
0x2c1c   :  { %v10244_v58 = vpack.c.bf16 %v7433_v52, %v7431_v27  ;;  %v7758_v52 = vld [vmem:[#allocation11 + $0x2e0] sm:$0xff] }
0x2c1e   :  { %10339 = vmatpush3.bf16.msra.mxu1 %v10338_v59  ;;  %v7436_v59 = vld [vmem:[#allocation11 + $0x1f0] sm:$0xff] }
0x2c1f   :  { %10341 = vmatprep.subr.bf16.mxu1 %v10340_v45  ;;  %v7513_v45 = vld [vmem:[#allocation11 + $0x210] sm:$0xff] }
0x2c7f   :  { %v6949_v10 = vpop.permute.xlu1 %6948 }
0x2c80   :  { %8377 = vmatmul.mubr.msk.f32.vlgmr.msra.gmra.mrb[26].mxu0 %vm158_vm2, %v6949_v10  ;;  %v7356_v10 = vld [vmem:[#allocation11 + $0x1b8] sm:$0xff] }
0x2c81   :  { %10207 = vmatpush1.bf16.msra.mxu0 %v10206_v48  ;;  %7097 = vmatprep.mubr.f32.mxu0 %v10960_v1  ;;  %v10232_v48 = vpack.c.bf16 %v7275_v17, %v7273_v46  ;;  %v10240_v57 = vpack.c.bf16 %v7356_v10, %v7354_v7  ;;  %v7676_v46 = vld [vmem:[#allocation11 + $0x298] sm:$0xff]  ;;  %v10276_v7 = vpack.c.bf16 %v7757_v14, %v7755_v11  ;;  %v7754_v10 = vld [vmem:[#allocation11 + $0x2c0] sm:$0xff]  ;;  %v8178_v11 = vld [vmem:[%s12475_s15 + $0x60] sm:$0xff] }
0x2c82   :  { %10209 = vmatprep.subr.bf16.mxu0 %v10208_v60  ;;  %v7352_v60 = vld [vmem:[#allocation11 + $0x198] sm:$0xff]  ;;  %v10268_v17 = vpack.c.bf16 %v7676_v46, %v7674_v44  ;;  %v8084_v44 = vld [vmem:[#allocation11 + $0x3c8] sm:$0xff] }
0x2c83   :  { %v10236_v61 = vpack.c.bf16 %v7352_v60, %v7350_v3  ;;  %v8086_v46 = vld [vmem:[#allocation11 + $0x3d8] sm:$0xff] }
0x2c84   :  { %v8179_v14 = vld [vmem:[%s12475_s15 + $0x68] sm:$0xff] }
0x2c85   :  { %10211 = vmatpush1.bf16.msra.mxu0 %v10210_v53  ;;  %v7355_v53 = vld [vmem:[#allocation11 + $0x1b0] sm:$0xff] }
0x2c86   :  { %10213 = vmatprep.subr.bf16.mxu0 %v10212_v40  ;;  %v7430_v40 = vld [vmem:[#allocation11 + $0x1c0] sm:$0xff] }
0x2c87   :  { %v10246_v49 = vpack.c.bf16 %v7432_v41, %v7430_v40  ;;  %v7838_v40 = vld [vmem:[#allocation11 + $0x318] sm:$0xff] }
0x2c88   :  { %8378 = vmatmul.mubr.msk.f32.vlgmr.msra.gmra.mrb[26].mxu0 %vm158_vm2, %v11935_v2  ;;  %v7271_v2 = vld [vmem:[#allocation11 + $0x158] sm:$0xff] }
0x2c89   :  { %10215 = vmatpush1.bf16.msra.mxu0 %v10214_v21  ;;  %7178 = vmatprep.mubr.f32.mxu0 %v10960_v1  ;;  %v10228_v9 = vpack.c.bf16 %v7271_v2, %v7269_v39  ;;  %v7512_v21 = vld [vmem:[#allocation11 + $0x208] sm:$0xff]  ;;  %v7599_v39 = vld [vmem:[#allocation11 + $0x278] sm:$0xff] }
0x2c8a   :  { %10217 = vmatprep.subr.bf16.mxu0 %v10216_v25  ;;  %v7514_v25 = vld [vmem:[#allocation11 + $0x218] sm:$0xff] }
0x2c8b   :  { %v10252_v35 = vpack.c.bf16 %v7514_v25, %v7512_v21  ;;  %v7839_v21 = vld [vmem:[#allocation11 + $0x320] sm:$0xff]  ;;  %v7841_v25 = vld [vmem:[#allocation11 + $0x330] sm:$0xff] }
0x2c8d   :  { %10219 = vmatpush1.bf16.msra.mxu0 %v10218_v8  ;;  %v10254_v8 = vpack.c.bf16 %v7513_v45, %v7511_v0  ;;  %v7916_v45 = vld [vmem:[#allocation11 + $0x340] sm:$0xff] }
0x2c8e   :  { %10221 = vmatprep.subr.bf16.mxu0 %v10220_v31  ;;  %v10256_v31 = vpack.c.bf16 %v7518_v47, %v7516_v38  ;;  %v7918_v38 = vld [vmem:[#allocation11 + $0x350] sm:$0xff]  ;;  %v7921_v47 = vld [vmem:[#allocation11 + $0x368] sm:$0xff] }
0x2c90   :  { %8379 = vmatmul.mubr.msk.f32.vlgmr.msra.gmra.mrb[26].mxu0 %vm158_vm2, %v12280_v22  ;;  %v10234_v22 = vpack.c.bf16 %v7274_v19, %v7272_v51  ;;  %v7678_v51 = vld [vmem:[#allocation11 + $0x2a8] sm:$0xff]  ;;  %v7680_v19 = vld [vmem:[#allocation11 + $0x2b8] sm:$0xff] }
0x2c91   :  { %10223 = vmatpush1.bf16.msra.mxu0 %v10222_v54  ;;  %7259 = vmatprep.mubr.f32.mxu0 %v10960_v1  ;;  %v10260_v54 = vpack.c.bf16 %v7595_v16, %v7593_v32  ;;  %v10272_v60 = vpack.c.bf16 %v7680_v19, %v7678_v51  ;;  %v7922_v32 = vld [vmem:[#allocation11 + $0x370] sm:$0xff]  ;;  %v7998_v16 = vld [vmem:[#allocation11 + $0x388] sm:$0xff]  ;;  %v8090_v51 = vld [vmem:[#allocation11 + $0x3f8] sm:$0xff] }
0x2c92   :  { %10225 = vmatprep.subr.bf16.mxu0 %v10224_v33  ;;  %v7592_v33 = vld [vmem:[#allocation11 + $0x240] sm:$0xff] }
0x2c93   :  { %v10262_v2 = vpack.c.bf16 %v7594_v4, %v7592_v33  ;;  %v7997_v33 = vld [vmem:[#allocation11 + $0x380] sm:$0xff]  ;;  %v7999_v4 = vld [vmem:[#allocation11 + $0x390] sm:$0xff] }
0x2c95   :  { %10227 = vmatpush1.bf16.msra.mxu0 %v10226_v43  ;;  %v10264_v43 = vpack.c.bf16 %v7599_v39, %v7597_v36  ;;  %v8002_v36 = vld [vmem:[#allocation11 + $0x3a8] sm:$0xff]  ;;  %v8004_v39 = vld [vmem:[#allocation11 + $0x3b8] sm:$0xff] }
0x2c96   :  { %10229 = vmatprep.subr.bf16.mxu0 %v10228_v9  ;;  %v7596_v9 = vld [vmem:[#allocation11 + $0x260] sm:$0xff] }
0x2c98   :  { %8380 = vmatmul.mubr.msk.f32.vlgmr.msra.gmra.mrb[26].mxu0 %vm158_vm2, %v12005_v34  ;;  %v10242_v34 = vpack.c.bf16 %v7355_v53, %v7353_v24  ;;  %v7761_v24 = vld [vmem:[#allocation11 + $0x2f8] sm:$0xff] }
0x2c99   :  { %10231 = vmatpush1.bf16.msra.mxu0 %v10230_v29  ;;  %7340 = vmatprep.mubr.f32.mxu0 %v10960_v1  ;;  %v7673_v29 = vld [vmem:[#allocation11 + $0x280] sm:$0xff] }
0x2c9a   :  { %10233 = vmatprep.subr.bf16.mxu0 %v10232_v48  ;;  %v7675_v48 = vld [vmem:[#allocation11 + $0x290] sm:$0xff] }
0x2c9b   :  { %v10270_v3 = vpack.c.bf16 %v7675_v48, %v7673_v29  ;;  %v8085_v29 = vld [vmem:[#allocation11 + $0x3d0] sm:$0xff]  ;;  %v8088_v48 = vld [vmem:[#allocation11 + $0x3e8] sm:$0xff] }
0x2c9d   :  { %10235 = vmatpush1.bf16.msra.mxu0 %v10234_v22  ;;  %v7677_v22 = vld [vmem:[#allocation11 + $0x2a0] sm:$0xff] }
0x2c9e   :  { %10237 = vmatprep.subr.bf16.mxu0 %v10236_v61  ;;  %v7679_v61 = vld [vmem:[#allocation11 + $0x2b0] sm:$0xff] }
0x2ca0   :  { %8381 = vmatmul.mubr.msk.f32.vlgmr.msra.gmra.mrb[26].mxu0 %vm158_vm2, %v12205_v63  ;;  %v10250_v63 = vpack.c.bf16 %v7436_v59, %v7434_v37  ;;  %v10286_v37 = vpack.c.bf16 %v7837_v26, %v7835_v6 }
0x2ca1   :  { %10239 = vmatpush1.bf16.msra.mxu0 %v10238_v13  ;;  %7421 = vmatprep.mubr.f32.mxu0 %v10960_v1  ;;  %v7756_v13 = vld [vmem:[#allocation11 + $0x2d0] sm:$0xff] }
0x2ca2   :  { %10241 = vmatprep.subr.bf16.mxu0 %v10240_v57  ;;  %v7759_v57 = vld [vmem:[#allocation11 + $0x2e8] sm:$0xff]  ;;  %v10278_v53 = vpack.c.bf16 %v7756_v13, %v7754_v10 }
0x2ca3   :  { %v10280_v27 = vpack.c.bf16 %v7761_v24, %v7759_v57  ;;  %v8181_v13 = vld [vmem:[%s12475_s15 + $0x78] sm:$0xff]  ;;  %v6927_v24 = vlaneseq }
0x2ca5   :  { %10243 = vmatpush1.bf16.msra.mxu0 %v10242_v34  ;;  %v7760_v34 = vld [vmem:[#allocation11 + $0x2f0] sm:$0xff] }
0x2ca6   :  { %10245 = vmatprep.subr.bf16.mxu0 %v10244_v58  ;;  %v7836_v58 = vld [vmem:[#allocation11 + $0x308] sm:$0xff] }
0x2ca7   :  { %v10284_v41 = vpack.c.bf16 %v7838_v40, %v7836_v58 }
0x2ca8   :  { %8382 = vmatmul.mubr.msk.f32.vlgmr.msra.gmra.mrb[26].mxu0 %vm158_vm2, %v12075_v55  ;;  %v10258_v55 = vpack.c.bf16 %v7517_v28, %v7515_v20  ;;  %v7920_v28 = vld [vmem:[#allocation11 + $0x360] sm:$0xff] }
0x2ca9   :  { %10247 = vmatpush1.bf16.msra.mxu0 %v10246_v49  ;;  %7502 = vmatprep.mubr.f32.mxu0 %v10960_v1  ;;  %v7840_v49 = vld [vmem:[#allocation11 + $0x328] sm:$0xff] }
0x2caa   :  { %10249 = vmatprep.subr.bf16.mxu0 %v10248_v15  ;;  %v7842_v15 = vld [vmem:[#allocation11 + $0x338] sm:$0xff] }
0x2cab   :  { %v10288_v59 = vpack.c.bf16 %v7842_v15, %v7840_v49 }
0x2cad   :  { %10251 = vmatpush1.bf16.msra.mxu0 %v10250_v63  ;;  %v7917_v63 = vld [vmem:[#allocation11 + $0x348] sm:$0xff] }
0x2cae   :  { %10253 = vmatprep.subr.bf16.mxu0 %v10252_v35  ;;  %v7919_v35 = vld [vmem:[#allocation11 + $0x358] sm:$0xff] }
0x2caf   :  { %v10292_v0 = vpack.c.bf16 %v7919_v35, %v7917_v63 }
0x2cb0   :  { %8383 = vmatmul.mubr.msk.f32.vlgmr.msra.gmra.mrb[26].mxu0 %vm158_vm2, %v12135_v30  ;;  %v10266_v30 = vpack.c.bf16 %v7598_v12, %v7596_v9  ;;  %v8001_v9 = vld [vmem:[#allocation11 + $0x3a0] sm:$0xff]  ;;  %v8003_v12 = vld [vmem:[#allocation11 + $0x3b0] sm:$0xff] }
0x2cb1   :  { %10255 = vmatpush1.bf16.msra.mxu0 %v10254_v8  ;;  %7583 = vmatprep.mubr.f32.mxu0 %v10960_v1  ;;  %v7923_v8 = vld [vmem:[#allocation11 + $0x378] sm:$0xff] }
0x2cb2   :  { %10257 = vmatprep.subr.bf16.mxu0 %v10256_v31  ;;  %v10294_v31 = vpack.c.bf16 %v7918_v38, %v7916_v45  ;;  %v10296_v20 = vpack.c.bf16 %v7923_v8, %v7921_v47 }
0x2cb5   :  { %10259 = vmatpush1.bf16.msra.mxu0 %v10258_v55  ;;  %v8000_v55 = vld [vmem:[#allocation11 + $0x398] sm:$0xff] }
0x2cb6   :  { %10261 = vmatprep.subr.bf16.mxu0 %v10260_v54  ;;  %v10300_v54 = vpack.c.bf16 %v8000_v55, %v7998_v16 }
0x2cb8   :  { %8384 = vmatmul.mubr.msk.f32.vlgmr.msra.gmra.mrb[26].mxu0 %vm158_vm2, %v12145_v42  ;;  %v10274_v42 = vpack.c.bf16 %v7679_v61, %v7677_v22  ;;  %v8089_v22 = vld [vmem:[#allocation11 + $0x3f0] sm:$0xff]  ;;  %v8007_v61 = vpop.permute.xlu1 %8006 }
0x2cb9   :  { %10263 = vmatpush1.bf16.msra.mxu0 %v10262_v2  ;;  %7664 = vmatprep.mubr.f32.mxu0 %v10960_v1  ;;  %v10302_v2 = vpack.c.bf16 %v7999_v4, %v7997_v33 }
0x2cba   :  { %10265 = vmatprep.subr.bf16.mxu0 %v10264_v43  ;;  %v10304_v43 = vpack.c.bf16 %v8004_v39, %v8002_v36 }
0x2cbd   :  { %10267 = vmatpush1.bf16.msra.mxu0 %v10266_v30  ;;  %v10308_v30 = vpack.c.bf16 %v8086_v46, %v8084_v44 }
0x2cbe   :  { %10269 = vmatprep.subr.bf16.mxu0 %v10268_v17  ;;  %v8083_v17 = vld [vmem:[#allocation11 + $0x3c0] sm:$0xff] }
0x2cbf   :  { %v10310_v19 = vpack.c.bf16 %v8085_v29, %v8083_v17 }
0x2cc0   :  { %8385 = vmatmul.mubr.msk.f32.vlgmr.msra.gmra.mrb[26].mxu0 %vm158_vm2, %v12065_v18  ;;  %v10282_v18 = vpack.c.bf16 %v7760_v34, %v7758_v52  ;;  %v6846_v52 = vld [vmem:[%s12474_s14] sm:$0x3]  ;;  %s8284_s14 = sshll.u32 %s10963_s2, 4  ;;  %s8285_s14 = int_to_ptr.vmem [resolvable:$true] %s8284_s14 }
0x2cc1   :  { %10271 = vmatpush1.bf16.msra.mxu0 %v10270_v3  ;;  %7745 = vmatprep.mubr.f32.mxu0 %v10960_v1  ;;  %v10312_v3 = vpack.c.bf16 %v8090_v51, %v8088_v48  ;;  %s10916_s13 = scalar_lea.vmem %s8285_s14, 32  ;;  %p10921_p7 = scmp.lt.s32.totalorder %s8285_s14, %s8285_s14 }
0x2cc2   :  { %10273 = vmatprep.subr.bf16.mxu0 %v10272_v60  ;;  %v8087_v60 = vld [vmem:[#allocation11 + $0x3e0] sm:$0xff]  ;;  %p10917_p6 = scmp.ne.s32.totalorder %s8285_s14, %s10916_s13  ;;  %p10922_p8 = scmp.lt.s32.totalorder %s10916_s13, %s10916_s13 }
0x2cc4   :  { %p10923_p9 = por %p10922_p8, %p10921_p7 }
0x2cc5   :  { %10275 = vmatpush1.bf16.msra.mxu0 %v10274_v42  ;;  %v10342_v42 = vpack.c.bf16 %v8179_v14, %v8178_v11 }
0x2cc6   :  { %10277 = vmatprep.subr.bf16.mxu0 %v10276_v7  ;;  %v8196_v7 = vld [vmem:[%s12475_s15 + $0xf0] sm:$0xff]  ;;  %p10924_p10 = pnand %p10923_p9, %p10917_p6 }
0x2cc7   :  { %10343 = vmatpush3.bf16.msra.mxu1 %v10342_v42 }
0x2cc8   :  { %8386 = vmatmul.mubr.msk.f32.vlgmr.msra.gmra.mrb[26].mxu0 %vm158_vm2, %v12215_v5  ;;  %v10290_v5 = vpack.c.bf16 %v7841_v25, %v7839_v21 }
0x2cc9   :  { %10279 = vmatpush1.bf16.msra.mxu0 %v10278_v53  ;;  %7826 = vmatprep.mubr.f32.mxu0 %v10960_v1  ;;  %v6928_v53 = vshrl.u32 %v6927_v24, 7 }
0x2cca   :  { %10281 = vmatprep.subr.bf16.mxu0 %v10280_v27 }
0x2ccb   :  { %v6929_v27 = vsub.s32 0, %v6928_v53  ;;  %v6933_v34 = vsub.s32 1, %v6928_v53 }
0x2ccd   :  { %10283 = vmatpush1.bf16.msra.mxu0 %v10282_v18  ;;  %v6930_v58 = vrot.slane %v6846_v52, %v6929_v27  ;;  %v6934_v40 = vrot.slane %v6846_v52, %v6933_v34 }
0x2cce   :  { %10285 = vmatprep.subr.bf16.mxu0 %v10284_v41 }
0x2cd0   :  { %8387 = vmatmul.mubr.msk.f32.vlgmr.msra.gmra.mrb[26].mxu0 %vm158_vm2, %v11995_v56  ;;  %v10298_v56 = vpack.c.bf16 %v7922_v32, %v7920_v28 }
0x2cd1   :  { %10287 = vmatpush1.bf16.msra.mxu0 %v10286_v37  ;;  %7907 = vmatprep.mubr.f32.mxu0 %v10960_v1 }
0x2cd2   :  { %10289 = vmatprep.subr.bf16.mxu0 %v10288_v59  ;;  %v8392_v59 = vld [vmem:[%s12476_s16] ss:$0 sm:$0xff] }
0x2cd5   :  { %10291 = vmatpush1.bf16.msra.mxu0 %v10290_v5 }
0x2cd6   :  { %10293 = vmatprep.subr.bf16.mxu0 %v10292_v0 }
0x2cd8   :  { %8388 = vmatmul.mubr.msk.f32.vlgmr.msra.gmra.mrb[26].mxu0 %vm158_vm2, %v12284_v62  ;;  %v10306_v62 = vpack.c.bf16 %v8003_v12, %v8001_v9 }
0x2cd9   :  { %10295 = vmatpush1.bf16.msra.mxu0 %v10294_v31  ;;  %7988 = vmatprep.mubr.f32.mxu0 %v10960_v1 }
0x2cda   :  { %10297 = vmatprep.subr.bf16.mxu0 %v10296_v20 }
0x2cdd   :  { %10299 = vmatpush1.bf16.msra.mxu0 %v10298_v56 }
0x2cde   :  { %10301 = vmatprep.subr.bf16.mxu0 %v10300_v54 }
0x2ce0   :  { %8389 = vmatmul.mubr.msk.f32.vlgmr.msra.gmra.mrb[26].mxu0 %vm158_vm2, %v11925_v23  ;;  %v10314_v23 = vpack.c.bf16 %v8089_v22, %v8087_v60 }
0x2ce1   :  { %10303 = vmatpush1.bf16.msra.mxu0 %v10302_v2  ;;  %8074 = vmatprep.mubr.f32.mxu0 %v10960_v1 }
0x2ce2   :  { %10305 = vmatprep.subr.bf16.mxu0 %v10304_v43 }
0x2ce5   :  { %10307 = vmatpush1.bf16.msra.mxu0 %v10306_v62 }
0x2ce6   :  { %10309 = vmatprep.subr.bf16.mxu0 %v10308_v30 }
0x2ce8   :  { %8390 = vmatmul.mubr.msk.f32.vlgmr.msra.gmra.mrb[26].mxu0 %vm158_vm2, %v8007_v61 }
0x2ce9   :  { %10311 = vmatpush1.bf16.msra.mxu0 %v10310_v19  ;;  %8155 = vmatprep.mubr.f32.mxu0 %v10960_v1  ;;  %v8197_v1 = vld [vmem:[%s12475_s15 + $0xf8] sm:$0xff] }
0x2cea   :  { %10313 = vmatprep.subr.bf16.mxu0 %v10312_v3  ;;  %v10344_v10 = vpack.c.bf16 %v8197_v1, %v8196_v7 }
0x2cec   :  { %10345 = vmatprep.subr.bf16.mxu1 %v10344_v10 }
0x2ced   :  { %10315 = vmatpush1.bf16.msra.mxu0 %v10314_v23 }
0x2cf0   :  { %8391 = vmatmul.mubr.msk.f32.vlgmr.msra.gmra.mrb[26].mxu0 %vm158_vm2, %v11855_v50  ;;  %v8180_v50 = vld [vmem:[%s12475_s15 + $0x70] sm:$0xff] }
0x2cf1   :  { %v10346_v57 = vpack.c.bf16 %v8181_v13, %v8180_v50 }
0x2cf3   :  { %10347 = vmatpush3.bf16.msra.mxu1 %v10346_v57 }
0x2dc3   :  { %v8157_v18 = vpop.f32.mrb[26].mxu0 }
0x2dc4   :  { %v10380_v41 = vadd.f32 %v8157_v18, %v6930_v58  ;;  %v8159_v6 = vpop.f32.mrb[27].mxu0 }
0x2dc5   :  { %v10381_v26 = vadd.f32 %v8159_v6, %v6934_v40 }
0x2dc6   :  { %v8164_v15 = vmax.f32 %v10380_v41, 0.0 }
0x2dc7   :  { %v8165_v49 = vmax.f32 %v10381_v26, 0.0 }
0x2dc9   :  { %8269 = vmatprep.mubr.f32.mxu1 %v8165_v49 }
0x2dca   :  { %8270 = vmatmul.mubr.f32.vlgmr.msra.gmra.mrb[38].mxu1 %v8164_v15 }
0x2e9d   :  { %v8825_v37 = vpop.f32.mrb[38].mxu1 }
0x2e9e   :  { %v8826_v21 = vpop.f32.mrb[39].mxu1 }
0x2e9f   :  { %v8827_v25 = vadd.f32 %v8826_v21, %v8825_v37 }
0x2ea1   :  { %v8272_v63 = vadd.f32 %v8827_v25, %v8392_v59 }
0x2ea3   :  { %v8275_v35 = vmax.f32 %v8272_v63, 0.0 }
0x2ea5   :  { %8277 = vst.msk [vmem:[#allocation13] sm:$0x3] %vm8276_vm3, %v8275_v35 }
0x2ea6   :  { %10927 = shalt.err (!%p10924_p10)
}
0x2ea7   :  { %s10928_s16 = scalar_lea.hbm %s12477_s17, 32 }
0x2ea8   :  { %p10929_p11 = scmp.ne.s32.totalorder %s12477_s17, %s10928_s16  ;;  %p10932_p12 = scmp.lt.u32.totalorder %s10928_s16, %s12477_s17 }
0x2eaa   :  { %p10934_p13 = pnand %p10932_p12, %p10929_p11 }
0x2eac   :  { %10937 = shalt.err (!%p10934_p13)
}
0x2ead   :  { %8287 = dma.vmem_to_hbm [thread:$0]  %s8285_s14, 32, %s12477_s17, [#allocation4]  }
0x2eae   :  { %10946 = dma.done.wait [#allocation4], 32  }
0x2eaf   :  { %10947 = vsyncadd [#allocation4], 4294967264 }
0x2eb0   :  { %8291 = vsyncpa [#allocation3], 1 }
0x2eb1   :  { %8292 = vsyncpa [#allocation6], 1 }
0x2eb2   :  { %8293 = vsyncpa [#allocation9], 1 }
0x2eb3   :  { %8294 = vsyncpa [#allocation12], 1 }
0x2eb4   :  { %8295 = vsyncpa [#allocation4], 1 }

</bundles_post_ra>
